<compile_context>
chip_gen: v6e
topology: v6e:2x2x1
jax: 0.10.0
libtpu: 0.0.40
codegen_flags: <defaults>
</compile_context>

<pallas_src>
import jax
import jax.numpy as jnp
from jax.experimental import pallas as pl
from jax.experimental.pallas import tpu as pltpu

H1, H2, H3 = 1024, 256, 64

_VMEM_LIMIT = 32 * 1024 * 1024            # <= scoped/physical VMEM on v5e/v6e/v7x
_VMEM_BUDGET = 26 * 1024 * 1024           # headroom under the scoped limit
_RESIDENT_MAX_W1_BYTES = 16 * 1024 * 1024  # keep w1 VMEM-resident up to input_dim ~8192


def _round_up(x, m):
    return ((x + m - 1) // m) * m


def _epilogue(h1, b1_ref, w2_ref, b2_ref, w3_ref, b3_ref, w4t_ref, b4_ref, out_ref):
    """Bias+ReLU of layer 1 plus layers 2..4, given h1 = x @ w1 in f32 (tm, 1024)."""
    h = jnp.maximum(h1 + b1_ref[...], 0.0)                        # (tm, 1024) f32
    # Layers 2/3: bf16 MXU matmuls, f32 accumulation. Dropout == identity (eval).
    h = jnp.dot(h.astype(jnp.bfloat16), w2_ref[...],
                preferred_element_type=jnp.float32)
    h = jnp.maximum(h + b2_ref[...], 0.0)                         # (tm, 256)
    h = jnp.dot(h.astype(jnp.bfloat16), w3_ref[...],
                preferred_element_type=jnp.float32)
    h = jnp.maximum(h + b3_ref[...], 0.0)                         # (tm, 64)
    # Layer 4 (64 -> 1): VPU multiply + lane reduce (no 1-lane MXU matmul);
    # bias comes from SMEM as a scalar.
    logits = jnp.sum(h * w4t_ref[...], axis=-1, keepdims=True) + b4_ref[0, 0]
    # Lane-dense store: (tm, 1) -> (1, tm) so the write is full-lane.
    out_ref[...] = logits.reshape(out_ref.shape).astype(out_ref.dtype)


def _mlp_kernel_resident(x_ref, w1_ref, b1_ref, w2_ref, b2_ref, w3_ref, b3_ref,
                         w4t_ref, b4_ref, out_ref):
    # Single-K fast path: whole layer-1 matmul in one call, no accumulator scratch.
    h1 = jnp.dot(x_ref[...].astype(jnp.bfloat16), w1_ref[...],
                 preferred_element_type=jnp.float32)
    _epilogue(h1, b1_ref, w2_ref, b2_ref, w3_ref, b3_ref, w4t_ref, b4_ref, out_ref)


def _mlp_kernel_stream(x_ref, w1_ref, b1_ref, w2_ref, b2_ref, w3_ref, b3_ref,
                       w4t_ref, b4_ref, out_ref, acc_ref):
    # Fallback for very large input_dim: K-streamed w1 with f32 accumulator.
    k = pl.program_id(1)

    @pl.when(k == 0)
    def _():
        acc_ref[...] = jnp.zeros_like(acc_ref)

    acc_ref[...] += jnp.dot(x_ref[...].astype(jnp.bfloat16), w1_ref[...],
                            preferred_element_type=jnp.float32)

    @pl.when(k == pl.num_programs(1) - 1)
    def _():
        _epilogue(acc_ref[...], b1_ref, w2_ref, b2_ref, w3_ref, b3_ref,
                  w4t_ref, b4_ref, out_ref)


def prepare_params(params, *, tk=1024):
    """One-time (hoisted out of the serving hot path) weight layout conversion.

    params: f32 dict with w{i} shaped (in_features, out_features), b{i} (out,).
    Returns kernel-layout weights: bf16 w1/w2/w3, f32 row biases, lane-dense w4
    row, SMEM-scalar b4, plus the resident/stream mode decision.
    """
    w1 = params["w1"]
    d = w1.shape[0]
    resident = d * H1 * 2 <= _RESIDENT_MAX_W1_BYTES
    d_pad = d if resident else _round_up(d, tk)
    if d_pad != d:
        w1 = jnp.pad(w1, ((0, d_pad - d), (0, 0)))
    return {
        "mode": "resident" if resident else "stream",
        "d": d, "d_pad": d_pad, "tk": tk,
        "w1": w1.astype(jnp.bfloat16),
        "b1": params["b1"].reshape(1, H1).astype(jnp.float32),
        "w2": params["w2"].astype(jnp.bfloat16),
        "b2": params["b2"].reshape(1, H2).astype(jnp.float32),
        "w3": params["w3"].astype(jnp.bfloat16),
        "b3": params["b3"].reshape(1, H3).astype(jnp.float32),
        "w4t": params["w4"].reshape(1, H3).astype(jnp.float32),
        "b4": params["b4"].reshape(1, 1).astype(jnp.float32),
    }


def _pick_tm(n, d, mode, tm_max, tk):
    """Largest batch tile that keeps the total VMEM footprint under budget."""
    tm = min(tm_max, _round_up(n, 16))

    if mode == "resident":
        resident_bytes = d * H1 * 2 + H1 * H2 * 2 + H2 * H3 * 2 + (H1 + H2 + 2 * H3 + 2) * 4

        def footprint(t):
            return (resident_bytes
                    + 2 * t * d * 4              # double-buffered f32 x tile
                    + t * d * 2                  # in-kernel bf16 cast of x
                    + t * H1 * (2 * 4 + 2)       # h1 f32 (+working) + bf16 cast
                    + t * (H2 * 4 + H2 * 2 + H3 * 4)
                    + 2 * t * 4)                 # output tile
    else:
        resident_bytes = H1 * H2 * 2 + H2 * H3 * 2 + (H1 + H2 + 2 * H3 + 2) * 4

        def footprint(t):
            return (resident_bytes
                    + 2 * t * tk * 4 + t * tk * 2   # x tiles (f32 + bf16 cast)
                    + 2 * tk * H1 * 2               # streamed w1 double buffer
                    + t * H1 * 4                    # accumulator scratch
                    + t * H1 * (2 * 4 + 2)
                    + t * (H2 * 4 + H2 * 2 + H3 * 4)
                    + 2 * t * 4)

    while tm > 16 and footprint(tm) > _VMEM_BUDGET:
        tm = max(16, _round_up(tm // 2, 16))

    # v7x has 2 TensorCores sharded over the "parallel" batch axis: split a
    # single mid-size batch tile into >= 2 so neither core idles.
    if n <= tm and tm >= 256:
        tm = max(128, _round_up((n + 1) // 2, 16))
    return tm


def classifier_mlp(x_flat, prep, *, tm_max=512):
    """x_flat: (N, input_dim) float32. prep: output of prepare_params()."""
    n, d = x_flat.shape
    assert d == prep["d"], (d, prep["d"])
    mode, d_pad, tk = prep["mode"], prep["d_pad"], prep["tk"]

    tm = _pick_tm(n, d_pad, mode, tm_max, tk)
    n_pad = _round_up(n, tm)
    n_tiles = n_pad // tm

    x_p = x_flat
    if n_pad != n or d_pad != d:
        x_p = jnp.pad(x_flat, ((0, n_pad - n), (0, d_pad - d)))
    # x stays f32 in HBM; the bf16 cast happens inside the kernel.

    w1, b1, w2, b2 = prep["w1"], prep["b1"], prep["w2"], prep["b2"]
    w3, b3, w4t, b4 = prep["w3"], prep["b3"], prep["w4t"], prep["b4"]

    flops = 2 * n_pad * (d_pad * H1 + H1 * H2 + H2 * H3 + H3)
    resident_bytes = ((w2.size + w3.size) * 2
                      + (b1.size + b2.size + b3.size + w4t.size + b4.size) * 4)
    out_bytes = n_pad * 4
    smem_spec = pl.BlockSpec(memory_space=pltpu.MemorySpace.SMEM)

    if mode == "resident":
        grid = (n_tiles,)
        in_specs = [
            pl.BlockSpec((tm, d_pad), lambda i: (i, 0)),       # x tile (f32)
            pl.BlockSpec((d_pad, H1), lambda i: (0, 0)),       # w1 resident (bf16)
            pl.BlockSpec((1, H1), lambda i: (0, 0)),           # b1
            pl.BlockSpec((H1, H2), lambda i: (0, 0)),          # w2 (bf16)
            pl.BlockSpec((1, H2), lambda i: (0, 0)),           # b2
            pl.BlockSpec((H2, H3), lambda i: (0, 0)),          # w3 (bf16)
            pl.BlockSpec((1, H3), lambda i: (0, 0)),           # b3
            pl.BlockSpec((1, H3), lambda i: (0, 0)),           # w4 row
            smem_spec,                                         # b4 scalar
        ]
        out_specs = pl.BlockSpec((1, tm), lambda i: (i, 0))
        scratch_shapes = []
        kernel = _mlp_kernel_resident
        dims = ("parallel",)
        bytes_accessed = x_p.size * 4 + w1.size * 2 + resident_bytes + out_bytes
    else:
        grid = (n_tiles, d_pad // tk)
        in_specs = [
            pl.BlockSpec((tm, tk), lambda i, k: (i, k)),       # x tile (f32)
            pl.BlockSpec((tk, H1), lambda i, k: (k, 0)),       # w1 K-stream (bf16)
            pl.BlockSpec((1, H1), lambda i, k: (0, 0)),        # b1 (resident)
            pl.BlockSpec((H1, H2), lambda i, k: (0, 0)),       # w2 (bf16, resident)
            pl.BlockSpec((1, H2), lambda i, k: (0, 0)),        # b2
            pl.BlockSpec((H2, H3), lambda i, k: (0, 0)),       # w3 (bf16)
            pl.BlockSpec((1, H3), lambda i, k: (0, 0)),        # b3
            pl.BlockSpec((1, H3), lambda i, k: (0, 0)),        # w4 row
            smem_spec,                                         # b4 scalar
        ]
        out_specs = pl.BlockSpec((1, tm), lambda i, k: (i, 0))
        scratch_shapes = [pltpu.VMEM((tm, H1), jnp.float32)]   # layer-1 accumulator
        kernel = _mlp_kernel_stream
        dims = ("parallel", "arbitrary")
        # w1 is re-streamed once per batch tile on this path.
        bytes_accessed = (x_p.size * 4 + n_tiles * w1.size * 2
                          + resident_bytes + out_bytes)

    out = pl.pallas_call(
        kernel,
        out_shape=jax.ShapeDtypeStruct((n_tiles, tm), jnp.float32),
        grid_spec=pltpu.PrefetchScalarGridSpec(
            num_scalar_prefetch=0,
            grid=grid,
            in_specs=in_specs,
            out_specs=out_specs,
            scratch_shapes=scratch_shapes,
        ),
        compiler_params=pltpu.CompilerParams(
            dimension_semantics=dims,
            vmem_limit_bytes=_VMEM_LIMIT,
        ),
        cost_estimate=pl.CostEstimate(flops=flops, transcendentals=0,
                                      bytes_accessed=bytes_accessed),
    )(x_p, w1, b1, w2, b2, w3, b3, w4t, b4)

    return out.reshape(n_pad, 1)[:n]


def init_params(key, input_dim):
    """Deterministic init matching the nn.Linear shapes of ClassifierMLP.

    Weights stored transposed relative to torch: (in_features, out_features),
    so y = x @ W + b matches torch's x @ W_torch.T + b.
    """
    dims = [(input_dim, H1), (H1, H2), (H2, H3), (H3, 1)]
    params = {}
    for idx, (fan_in, fan_out) in enumerate(dims, start=1):
        key, kw, kb = jax.random.split(key, 3)
        bound = 1.0 / jnp.sqrt(fan_in)
        params[f"w{idx}"] = jax.random.uniform(
            kw, (fan_in, fan_out), jnp.float32, minval=-bound, maxval=bound)
        params[f"b{idx}"] = jax.random.uniform(
            kb, (fan_out,), jnp.float32, minval=-bound, maxval=bound)
    return params


def reference_forward(x_flat, prep):
    """Pure-JAX reference mirroring the kernel numerics (bf16 matmuls, f32 accum)."""
    d = prep["d"]
    h = jnp.dot(x_flat.astype(jnp.bfloat16), prep["w1"][:d],
                preferred_element_type=jnp.float32)
    h = jnp.maximum(h + prep["b1"], 0.0)
    h = jnp.dot(h.astype(jnp.bfloat16), prep["w2"], preferred_element_type=jnp.float32)
    h = jnp.maximum(h + prep["b2"], 0.0)
    h = jnp.dot(h.astype(jnp.bfloat16), prep["w3"], preferred_element_type=jnp.float32)
    h = jnp.maximum(h + prep["b3"], 0.0)
    return jnp.sum(h * prep["w4t"], axis=-1, keepdims=True) + prep["b4"][0, 0]


if __name__ == "__main__":
    key = jax.random.PRNGKey(0)
    k_x, k_p = jax.random.split(key)

    # Small example "signal": (batch=2, channels=4, 16, 16) -> input_dim = 1024
    B, C, H, W = 2, 4, 16, 16
    input_dim = C * H * W
    x = jax.random.normal(k_x, (B, C, H, W), dtype=jnp.float32)

    params = init_params(k_p, input_dim)
    prep = prepare_params(params)          # one-time weight layout/cast (hoisted)

    # nn.Flatten(): (B, C, H, W) -> (B, C*H*W) row-major
    x_flat = x.reshape(B, -1)

    out = jax.block_until_ready(classifier_mlp(x_flat, prep))
    ref = reference_forward(x_flat, prep)

    assert out.shape == (B, 1), out.shape
    assert jnp.allclose(out, ref, atol=2e-3, rtol=2e-3), (out, ref)

    print("KERNEL_OK")
</pallas_src>

<mosaic_0001>
module attributes {stable_mosaic.version = 11 : i64} {
  func.func @_mlp_kernel_resident(%arg0: i32, %arg1: memref<16x1024xf32, #tpu.memory_space<vmem>>, %arg2: memref<1024x1024xbf16, #tpu.memory_space<vmem>>, %arg3: memref<1x1024xf32, #tpu.memory_space<vmem>>, %arg4: memref<1024x256xbf16, #tpu.memory_space<vmem>>, %arg5: memref<1x256xf32, #tpu.memory_space<vmem>>, %arg6: memref<256x64xbf16, #tpu.memory_space<vmem>>, %arg7: memref<1x64xf32, #tpu.memory_space<vmem>>, %arg8: memref<1x64xf32, #tpu.memory_space<vmem>>, %arg9: memref<1x1xf32, #tpu.memory_space<smem>>, %arg10: memref<1x16xf32, #tpu.memory_space<vmem>>) attributes {dimension_semantics = [#tpu.dimension_semantics<parallel>], iteration_bounds = array<i64: 1>, scalar_prefetch = 0 : i64, scratch_operands = 0 : i64, tpu.core_type = #tpu.core_type<tc>, window_params = [{transform_indices = @transform_0, window_bounds = array<i64: 16, 1024>}, {pipeline_mode = #tpu.pipeline_mode<synchronous>, transform_indices = @transform_1, window_bounds = array<i64: 1024, 1024>}, {pipeline_mode = #tpu.pipeline_mode<synchronous>, transform_indices = @transform_2, window_bounds = array<i64: 1, 1024>}, {pipeline_mode = #tpu.pipeline_mode<synchronous>, transform_indices = @transform_3, window_bounds = array<i64: 1024, 256>}, {pipeline_mode = #tpu.pipeline_mode<synchronous>, transform_indices = @transform_4, window_bounds = array<i64: 1, 256>}, {pipeline_mode = #tpu.pipeline_mode<synchronous>, transform_indices = @transform_5, window_bounds = array<i64: 256, 64>}, {pipeline_mode = #tpu.pipeline_mode<synchronous>, transform_indices = @transform_6, window_bounds = array<i64: 1, 64>}, {pipeline_mode = #tpu.pipeline_mode<synchronous>, transform_indices = @transform_7, window_bounds = array<i64: 1, 64>}, {transform_indices = @transform_8, window_bounds = array<i64: 1, 1>}, {transform_indices = @transform_9, window_bounds = array<i64: 1, 16>}]} {
    %c0 = arith.constant 0 : index
    %c0_0 = arith.constant 0 : index
    %0 = vector.load %arg1[%c0, %c0_0] : memref<16x1024xf32, #tpu.memory_space<vmem>>, vector<16x1024xf32>
    %1 = arith.truncf %0 : vector<16x1024xf32> to vector<16x1024xbf16>
    %c0_1 = arith.constant 0 : index
    %c0_2 = arith.constant 0 : index
    %2 = vector.load %arg2[%c0_1, %c0_2] : memref<1024x1024xbf16, #tpu.memory_space<vmem>>, vector<1024x1024xbf16>
    %cst = arith.constant dense<0.000000e+00> : vector<16x1024xf32>
    %3 = tpu.matmul %1, %2, %cst {dimension_numbers = #tpu.dot_dimension_numbers<[1], [0], [0], [1], [0, 0, 1, 1], [], []>} : vector<16x1024xbf16>, vector<1024x1024xbf16>, vector<16x1024xf32> -> vector<16x1024xf32>
    %c0_3 = arith.constant 0 : index
    %c0_4 = arith.constant 0 : index
    %4 = vector.load %arg3[%c0_3, %c0_4] : memref<1x1024xf32, #tpu.memory_space<vmem>>, vector<1x1024xf32>
    %5 = vector.broadcast %4 : vector<1x1024xf32> to vector<16x1024xf32>
    %6 = arith.addf %3, %5 : vector<16x1024xf32>
    %cst_5 = arith.constant 0.000000e+00 : f32
    %7 = vector.broadcast %cst_5 : f32 to vector<16x1024xf32>
    %8 = arith.maximumf %6, %7 : vector<16x1024xf32>
    %9 = arith.truncf %8 : vector<16x1024xf32> to vector<16x1024xbf16>
    %c0_6 = arith.constant 0 : index
    %c0_7 = arith.constant 0 : index
    %10 = vector.load %arg4[%c0_6, %c0_7] : memref<1024x256xbf16, #tpu.memory_space<vmem>>, vector<1024x256xbf16>
    %cst_8 = arith.constant dense<0.000000e+00> : vector<16x256xf32>
    %11 = tpu.matmul %9, %10, %cst_8 {dimension_numbers = #tpu.dot_dimension_numbers<[1], [0], [0], [1], [0, 0, 1, 1], [], []>} : vector<16x1024xbf16>, vector<1024x256xbf16>, vector<16x256xf32> -> vector<16x256xf32>
    %c0_9 = arith.constant 0 : index
    %c0_10 = arith.constant 0 : index
    %12 = vector.load %arg5[%c0_9, %c0_10] : memref<1x256xf32, #tpu.memory_space<vmem>>, vector<1x256xf32>
    %13 = vector.broadcast %12 : vector<1x256xf32> to vector<16x256xf32>
    %14 = arith.addf %11, %13 : vector<16x256xf32>
    %cst_11 = arith.constant 0.000000e+00 : f32
    %15 = vector.broadcast %cst_11 : f32 to vector<16x256xf32>
    %16 = arith.maximumf %14, %15 : vector<16x256xf32>
    %17 = arith.truncf %16 : vector<16x256xf32> to vector<16x256xbf16>
    %c0_12 = arith.constant 0 : index
    %c0_13 = arith.constant 0 : index
    %18 = vector.load %arg6[%c0_12, %c0_13] : memref<256x64xbf16, #tpu.memory_space<vmem>>, vector<256x64xbf16>
    %cst_14 = arith.constant dense<0.000000e+00> : vector<16x64xf32>
    %19 = tpu.matmul %17, %18, %cst_14 {dimension_numbers = #tpu.dot_dimension_numbers<[1], [0], [0], [1], [0, 0, 1, 1], [], []>} : vector<16x256xbf16>, vector<256x64xbf16>, vector<16x64xf32> -> vector<16x64xf32>
    %c0_15 = arith.constant 0 : index
    %c0_16 = arith.constant 0 : index
    %20 = vector.load %arg7[%c0_15, %c0_16] : memref<1x64xf32, #tpu.memory_space<vmem>>, vector<1x64xf32>
    %21 = vector.broadcast %20 : vector<1x64xf32> to vector<16x64xf32>
    %22 = arith.addf %19, %21 : vector<16x64xf32>
    %cst_17 = arith.constant 0.000000e+00 : f32
    %23 = vector.broadcast %cst_17 : f32 to vector<16x64xf32>
    %24 = arith.maximumf %22, %23 : vector<16x64xf32>
    %c0_18 = arith.constant 0 : index
    %c0_19 = arith.constant 0 : index
    %25 = vector.load %arg8[%c0_18, %c0_19] : memref<1x64xf32, #tpu.memory_space<vmem>>, vector<1x64xf32>
    %26 = vector.broadcast %25 : vector<1x64xf32> to vector<16x64xf32>
    %27 = arith.mulf %24, %26 : vector<16x64xf32>
    %cst_20 = arith.constant dense<0.000000e+00> : vector<16xf32>
    %28 = vector.multi_reduction <add>, %27, %cst_20 [1] : vector<16x64xf32> to vector<16xf32>
    %29 = vector.shape_cast %28 : vector<16xf32> to vector<16x1xf32>
    %c0_21 = arith.constant 0 : index
    %c0_22 = arith.constant 0 : index
    %30 = memref.load %arg9[%c0_21, %c0_22] : memref<1x1xf32, #tpu.memory_space<smem>>
    %31 = vector.broadcast %30 : f32 to vector<16x1xf32>
    %32 = arith.addf %29, %31 : vector<16x1xf32>
    %33 = vector.shape_cast %32 : vector<16x1xf32> to vector<1x16xf32>
    %c0_23 = arith.constant 0 : index
    %c0_24 = arith.constant 0 : index
    %34 = vector.load %arg10[%c0_23, %c0_24] : memref<1x16xf32, #tpu.memory_space<vmem>>, vector<1x16xf32>
    tpu.vector_store %arg10[%c0_23, %c0_24], %33 {strides = array<i32>} : memref<1x16xf32, #tpu.memory_space<vmem>>, vector<1x16xf32>,
    return
  }
  func.func @transform_0(%arg0: i32) -> (i32, i32) {
    %c0_i32 = arith.constant 0 : i32
    %c0_i32_0 = arith.constant 0 : i32
    return %arg0, %c0_i32 : i32, i32
  }
  func.func @transform_1(%arg0: i32) -> (i32, i32) {
    %c0_i32 = arith.constant 0 : i32
    %c0_i32_0 = arith.constant 0 : i32
    %c0_i32_1 = arith.constant 0 : i32
    return %c0_i32, %c0_i32_0 : i32, i32
  }
  func.func @transform_2(%arg0: i32) -> (i32, i32) {
    %c0_i32 = arith.constant 0 : i32
    %c0_i32_0 = arith.constant 0 : i32
    %c0_i32_1 = arith.constant 0 : i32
    return %c0_i32, %c0_i32_0 : i32, i32
  }
  func.func @transform_3(%arg0: i32) -> (i32, i32) {
    %c0_i32 = arith.constant 0 : i32
    %c0_i32_0 = arith.constant 0 : i32
    %c0_i32_1 = arith.constant 0 : i32
    return %c0_i32, %c0_i32_0 : i32, i32
  }
  func.func @transform_4(%arg0: i32) -> (i32, i32) {
    %c0_i32 = arith.constant 0 : i32
    %c0_i32_0 = arith.constant 0 : i32
    %c0_i32_1 = arith.constant 0 : i32
    return %c0_i32, %c0_i32_0 : i32, i32
  }
  func.func @transform_5(%arg0: i32) -> (i32, i32) {
    %c0_i32 = arith.constant 0 : i32
    %c0_i32_0 = arith.constant 0 : i32
    %c0_i32_1 = arith.constant 0 : i32
    return %c0_i32, %c0_i32_0 : i32, i32
  }
  func.func @transform_6(%arg0: i32) -> (i32, i32) {
    %c0_i32 = arith.constant 0 : i32
    %c0_i32_0 = arith.constant 0 : i32
    %c0_i32_1 = arith.constant 0 : i32
    return %c0_i32, %c0_i32_0 : i32, i32
  }
  func.func @transform_7(%arg0: i32) -> (i32, i32) {
    %c0_i32 = arith.constant 0 : i32
    %c0_i32_0 = arith.constant 0 : i32
    %c0_i32_1 = arith.constant 0 : i32
    return %c0_i32, %c0_i32_0 : i32, i32
  }
  func.func @transform_8(%arg0: i32) -> (i32, i32) {
    %c0_i32 = arith.constant 0 : i32
    %c0_i32_0 = arith.constant 0 : i32
    %c0_i32_1 = arith.constant 0 : i32
    return %c0_i32, %c0_i32_0 : i32, i32
  }
  func.func @transform_9(%arg0: i32) -> (i32, i32) {
    %c0_i32 = arith.constant 0 : i32
    %c0_i32_0 = arith.constant 0 : i32
    return %arg0, %c0_i32 : i32, i32
  }
}

</mosaic_0001>

<bundles_post_ra>
// kernel: tpu_custom_call.1
= control target key start
LH: loop header
LB: loop body
LE: loop exit
PB: predicated region body
PF: predicated region fallthrough
CT: control target
= control target key end

     0   :  { %15 = vsyncpa [#allocation4], 0  ;;  %s6542_s0 = inlined_call_operand.hbm [shape: f32[16,1024], index: 0, kind: input, shape index: {}]   ;;  %s6543_s1 = inlined_call_operand.hbm [shape: bf16[1024,1024], index: 1, kind: input, shape index: {}]   ;;  %s6544_s2 = inlined_call_operand.hbm [shape: f32[1,1024], index: 2, kind: input, shape index: {}]   ;;  %s6545_s3 = inlined_call_operand.hbm [shape: bf16[1024,256], index: 3, kind: input, shape index: {}]   ;;  %s6546_s4 = inlined_call_operand.hbm [shape: f32[1,256], index: 4, kind: input, shape index: {}]   ;;  %s6547_s5 = inlined_call_operand.vmem [shape: bf16[256,64], index: 5, kind: input, shape index: {}]   ;;  %s6548_s6 = inlined_call_operand.hbm [shape: f32[1,64], index: 6, kind: input, shape index: {}]   ;;  %s6549_s7 = inlined_call_operand.hbm [shape: f32[1,64], index: 7, kind: input, shape index: {}]   ;;  %s6550_s8 = inlined_call_operand.<no memory space> [shape: f32[1,1], index: 8, kind: input, shape index: {}]   ;;  %s6551_s9 = inlined_call_operand.hbm [shape: f32[1,16], index: 9, kind: output, shape index: {}]  }
   0x1   :  { %16 = vsyncpa [#allocation7], 0 }
   0x2   :  { %17 = vsyncpa [#allocation10], 0 }
   0x3   :  { %18 = vsyncpa [#allocation13], 0 }
   0x4   :  { %19 = vsyncpa [#allocation5], 0  ;;  %s6237_s30 = smov [#allocation6]  }
   0x5   :  { %s37_s10 = sshll.u32 %s6237_s30, 4  ;;  %s38_s10 = int_to_ptr.vmem [resolvable:$true] %s37_s10 }
   0x6   :  { %s6075_s11 = scalar_lea.vmem %s38_s10, 65536  ;;  %p6080_p1 = scmp.lt.s32.totalorder %s38_s10, %s38_s10 }
   0x7   :  { %p6076_p0 = scmp.ne.s32.totalorder %s38_s10, %s6075_s11  ;;  %p6081_p2 = scmp.lt.s32.totalorder %s6075_s11, %s6075_s11 }
   0x9   :  { %p6082_p3 = por %p6081_p2, %p6080_p1 }
   0xb   :  { %p6083_p4 = pnand %p6082_p3, %p6076_p0 }
   0xd   :  { %6086 = shalt.err (!%p6083_p4)
}
   0xe   :  { %s6238_s12 = smov 512   ;;  %s6239_s13 = smov 32  }
   0xf   :  { %43 = dma.hbm_to_vmem [thread:$0]  %s6543_s1, 65536, %s38_s10, [#allocation7], %s6238_s12, %s6238_s12, %s6239_s13  }
  0x10   :  { %s6240_s16 = smov [#allocation9]  }
  0x11   :  { %s59_s17 = sshll.u32 %s6240_s16, 4  ;;  %s60_s17 = int_to_ptr.vmem [resolvable:$true] %s59_s17 }
  0x12   :  { %s6095_s18 = scalar_lea.vmem %s60_s17, 16384  ;;  %p6100_p6 = scmp.lt.s32.totalorder %s60_s17, %s60_s17 }
  0x13   :  { %p6096_p5 = scmp.ne.s32.totalorder %s60_s17, %s6095_s18  ;;  %p6101_p7 = scmp.lt.s32.totalorder %s6095_s18, %s6095_s18 }
  0x15   :  { %p6102_p8 = por %p6101_p7, %p6100_p6 }
  0x17   :  { %p6103_p9 = pnand %p6102_p8, %p6096_p5 }
  0x19   :  { %6106 = shalt.err (!%p6103_p9)
}
  0x1a   :  { %s6241_s19 = smov 128   ;;  %s6242_s20 = smov 8  }
  0x1b   :  { %65 = dma.hbm_to_vmem [thread:$0]  %s6545_s3, 16384, %s60_s17, [#allocation10], %s6241_s19, %s6241_s19, %s6242_s20  }
  0x1c   :  { %s6243_s23 = smov [#allocation12]   ;;  %s6244_s25 = smov [#allocation3]  }
  0x1d   :  { %s84_s24 = sshll.u32 %s6243_s23, 4  ;;  %s25_s1 = sshll.u32 %s6244_s25, 4  ;;  %s85_s24 = int_to_ptr.vmem [resolvable:$true] %s84_s24  ;;  %s26_s1 = int_to_ptr.vmem [resolvable:$true] %s25_s1 }
  0x1e   :  { %s6115_s26 = scalar_lea.vmem %s85_s24, 16  ;;  %s6119_s27 = scalar_lea.vmem %s85_s24, 32 }
  0x1f   :  { %p6116_p10 = scmp.ne.s32.totalorder %s85_s24, %s6115_s26  ;;  %p6120_p11 = scmp.lt.s32.totalorder %s85_s24, %s85_s24 }
  0x20   :  { %p6121_p12 = scmp.lt.s32.totalorder %s6119_s27, %s6115_s26 }
  0x22   :  { %p6122_p13 = por %p6121_p12, %p6120_p11 }
  0x24   :  { %p6123_p0 = pnand %p6122_p13, %p6116_p10 }
  0x26   :  { %6126 = shalt.err (!%p6123_p0)
}
  0x27   :  { %87 = dma.hbm_to_vmem [thread:$0]  %s6548_s6, 16, %s85_s24, [#allocation13]  }
  0x28   :  { %s6135_s30 = scalar_lea.vmem %s26_s1, 2048  ;;  %p6140_p2 = scmp.lt.s32.totalorder %s26_s1, %s26_s1 }
  0x29   :  { %p6136_p1 = scmp.ne.s32.totalorder %s26_s1, %s6135_s30  ;;  %p6141_p3 = scmp.lt.s32.totalorder %s6135_s30, %s6135_s30 }
  0x2b   :  { %p6142_p4 = por %p6141_p3, %p6140_p2 }
  0x2d   :  { %p6143_p5 = pnand %p6142_p4, %p6136_p1 }
  0x2f   :  { %6146 = shalt.err (!%p6143_p5)
}
  0x30   :  { %s6245_s3 = smov 1024   ;;  %s6246_s10 = smov 64  }
  0x31   :  { %31 = dma.hbm_to_vmem [thread:$0]  %s6542_s0, 2048, %s26_s1, [#allocation4], %s6245_s3, %s6245_s3, %s6246_s10  }
  0x32   :  { %s6247_s13 = smov [#allocation8]   ;;  %s6248_s15 = smov [#allocation11]  }
  0x33   :  { %s50_s14 = sshll.u32 %s6247_s13, 4  ;;  %s72_s16 = sshll.u32 %s6248_s15, 4  ;;  %s51_s14 = int_to_ptr.vmem [resolvable:$true] %s50_s14  ;;  %s73_s16 = int_to_ptr.vmem [resolvable:$true] %s72_s16 }
  0x34   :  { %s6155_s6 = scalar_lea.vmem %s51_s14, 128  ;;  %p6160_p7 = scmp.lt.s32.totalorder %s51_s14, %s51_s14 }
  0x35   :  { %p6156_p6 = scmp.ne.s32.totalorder %s51_s14, %s6155_s6  ;;  %p6161_p8 = scmp.lt.s32.totalorder %s6155_s6, %s6155_s6 }
  0x37   :  { %p6162_p9 = por %p6161_p8, %p6160_p7 }
  0x39   :  { %p6163_p10 = pnand %p6162_p9, %p6156_p6 }
  0x3b   :  { %6166 = shalt.err (!%p6163_p10)
}
  0x3c   :  { %53 = dma.hbm_to_vmem [thread:$0]  %s6544_s2, 128, %s51_s14, [#allocation7]  }
  0x3d   :  { %s6175_s19 = scalar_lea.vmem %s73_s16, 32  ;;  %p6180_p12 = scmp.lt.s32.totalorder %s73_s16, %s73_s16 }
  0x3e   :  { %p6176_p11 = scmp.ne.s32.totalorder %s73_s16, %s6175_s19  ;;  %p6181_p13 = scmp.lt.s32.totalorder %s6175_s19, %s6175_s19 }
  0x40   :  { %p6182_p0 = por %p6181_p13, %p6180_p12 }
  0x42   :  { %p6183_p1 = pnand %p6182_p0, %p6176_p11 }
  0x44   :  { %6186 = shalt.err (!%p6183_p1)
}
  0x45   :  { %75 = dma.hbm_to_vmem [thread:$0]  %s6546_s4, 32, %s73_s16, [#allocation10]  }
  0x46   :  { %s6249_s21 = smov [#allocation14]  }
  0x47   :  { %s94_s22 = sshll.u32 %s6249_s21, 4  ;;  %s95_s22 = int_to_ptr.vmem [resolvable:$true] %s94_s22 }
  0x48   :  { %s6195_s23 = scalar_lea.vmem %s95_s22, 16  ;;  %s6199_s24 = scalar_lea.vmem %s95_s22, 32 }
  0x49   :  { %p6196_p2 = scmp.ne.s32.totalorder %s95_s22, %s6195_s23  ;;  %p6200_p3 = scmp.lt.s32.totalorder %s95_s22, %s95_s22 }
  0x4a   :  { %p6201_p4 = scmp.lt.s32.totalorder %s6199_s24, %s6195_s23 }
  0x4c   :  { %p6202_p5 = por %p6201_p4, %p6200_p3 }
  0x4e   :  { %p6203_p6 = pnand %p6202_p5, %p6196_p2 }
  0x50   :  { %6206 = shalt.err (!%p6203_p6)
}
  0x51   :  { %97 = dma.hbm_to_vmem [thread:$0]  %s6549_s7, 16, %s95_s22, [#allocation13]  }
  0x52   :  { %6227 = dma.done.wait [#allocation4], 2048  }
  0x53   :  { %6228 = vsyncadd [#allocation4], 4294965248 }
  0x54   :  { %6229 = dma.done.wait [#allocation7], 65664  }
  0x55   :  { %6230 = vsyncadd [#allocation7], 4294901632 }
  0x56   :  { %6231 = dma.done.wait [#allocation10], 16416  }
  0x57   :  { %6232 = vsyncadd [#allocation10], 4294950880 }
  0x58   :  { %6233 = dma.done.wait [#allocation13], 32  }
  0x59   :  { %6234 = vsyncadd [#allocation13], 4294967264  ;;  %v202_v0 = vld [vmem:[#allocation6 + $0x1c0] sm:$0xff]  ;;  %v123_v54 = vld [vmem:[#allocation3 + $0x8] sm:$0xff]  ;;  %vm5117_vm0 = vcmask 523264   ;;  %s6250_s28 = smov [#allocation15]  }
  0x5a   :  { %v206_v1 = vld [vmem:[#allocation6 + $0x1e0] sm:$0xff]  ;;  %v131_v55 = vld [vmem:[#allocation3 + $0x48] sm:$0xff]  ;;  %v125_v59 = vld [vmem:[#allocation3 + $0x18] sm:$0xff]  ;;  %s5152_s29 = sshll.u32 %s6250_s28, 4  ;;  %vm5141_vm1 = vcmask 130112   ;;  %vm5144_vm2 = vcmask 122880   ;;  %s5153_s29 = int_to_ptr.vmem [resolvable:$true] %s5152_s29 }
  0x5b   :  { %v330_v2 = vld [vmem:[#allocation6 + $0x5c0] sm:$0xff]  ;;  %v5221_v3 = vcombine.high %v202_v0, %v206_v1  ;;  %v5220_v5 = vcombine.low %v202_v0, %v206_v1  ;;  %v6322_v58 = vpack.c.bf16 %v131_v55, %v123_v54  ;;  %v133_v60 = vld [vmem:[#allocation3 + $0x58] sm:$0xff]  ;;  %s6207_s30 = scalar_lea.vmem %s5153_s29, 16  ;;  %p6212_p8 = scmp.lt.s32.totalorder %s5153_s29, %s5153_s29 }
  0x5c   :  { %v334_v4 = vld [vmem:[#allocation6 + $0x5e0] sm:$0xff]  ;;  %v6324_v63 = vpack.c.bf16 %v133_v60, %v125_v59  ;;  %p6208_p7 = scmp.ne.s32.totalorder %s5153_s29, %s6207_s30 }
  0x5d   :  { %v194_v6 = vld [vmem:[#allocation6 + $0x180] sm:$0xff]  ;;  %v5349_v8 = vcombine.high %v330_v2, %v334_v4  ;;  %v5348_v9 = vcombine.low %v330_v2, %v334_v4  ;;  %3260 = vmatprep.subr.bf16.mxu0 %v5221_v3  ;;  %3292 = vmatprep.mubr.bf16.mxu0 %v6322_v58 }
  0x5e   :  { %v198_v7 = vld [vmem:[#allocation6 + $0x1a0] sm:$0xff]  ;;  %3261 = vmatpush1.bf16.msra.mxu0 %v5220_v5  ;;  %3335 = vmatprep.mubr.bf16.mxu1 %v6324_v63 }
  0x5f   :  { %v5213_v10 = vcombine.high %v194_v6, %v198_v7  ;;  %v322_v11 = vld [vmem:[#allocation6 + $0x580] sm:$0xff]  ;;  %3303 = vmatprep.subr.bf16.mxu1 %v5349_v8  ;;  %v5212_v18 = vcombine.low %v194_v6, %v198_v7 }
  0x60   :  { %v326_v12 = vld [vmem:[#allocation6 + $0x5a0] sm:$0xff]  ;;  %3304 = vmatpush1.bf16.msra.mxu1 %v5348_v9 }
  0x61   :  { %v186_v13 = vld [vmem:[#allocation6 + $0x140] sm:$0xff]  ;;  %v5341_v14 = vcombine.high %v322_v11, %v326_v12  ;;  %3262 = vmatprep.subr.bf16.mxu0 %v5213_v10  ;;  %v5340_v19 = vcombine.low %v322_v11, %v326_v12 }
  0x62   :  { %v190_v15 = vld [vmem:[#allocation6 + $0x160] sm:$0xff]  ;;  %3263 = vmatpush1.bf16.msra.mxu0 %v5212_v18 }
  0x63   :  { %v314_v16 = vld [vmem:[#allocation6 + $0x540] sm:$0xff]  ;;  %v5205_v20 = vcombine.high %v186_v13, %v190_v15  ;;  %3305 = vmatprep.subr.bf16.mxu1 %v5341_v14  ;;  %v5204_v26 = vcombine.low %v186_v13, %v190_v15 }
  0x64   :  { %v318_v17 = vld [vmem:[#allocation6 + $0x560] sm:$0xff]  ;;  %3306 = vmatpush1.bf16.msra.mxu1 %v5340_v19 }
  0x65   :  { %v5333_v21 = vcombine.high %v314_v16, %v318_v17  ;;  %v178_v22 = vld [vmem:[#allocation6 + $0x100] sm:$0xff]  ;;  %3264 = vmatprep.subr.bf16.mxu0 %v5205_v20  ;;  %v5332_v27 = vcombine.low %v314_v16, %v318_v17 }
  0x66   :  { %v182_v23 = vld [vmem:[#allocation6 + $0x120] sm:$0xff]  ;;  %3265 = vmatpush1.bf16.msra.mxu0 %v5204_v26 }
  0x67   :  { %v306_v24 = vld [vmem:[#allocation6 + $0x500] sm:$0xff]  ;;  %v5197_v28 = vcombine.high %v178_v22, %v182_v23  ;;  %3307 = vmatprep.subr.bf16.mxu1 %v5333_v21  ;;  %v5196_v34 = vcombine.low %v178_v22, %v182_v23 }
  0x68   :  { %v310_v25 = vld [vmem:[#allocation6 + $0x520] sm:$0xff]  ;;  %3308 = vmatpush1.bf16.msra.mxu1 %v5332_v27 }
  0x69   :  { %v5325_v29 = vcombine.high %v306_v24, %v310_v25  ;;  %v170_v30 = vld [vmem:[#allocation6 + $0xc0] sm:$0xff]  ;;  %3266 = vmatprep.subr.bf16.mxu0 %v5197_v28  ;;  %v5324_v35 = vcombine.low %v306_v24, %v310_v25 }
  0x6a   :  { %v174_v31 = vld [vmem:[#allocation6 + $0xe0] sm:$0xff]  ;;  %3267 = vmatpush1.bf16.msra.mxu0 %v5196_v34 }
  0x6b   :  { %v298_v32 = vld [vmem:[#allocation6 + $0x4c0] sm:$0xff]  ;;  %v5189_v36 = vcombine.high %v170_v30, %v174_v31  ;;  %3309 = vmatprep.subr.bf16.mxu1 %v5325_v29  ;;  %v5188_v42 = vcombine.low %v170_v30, %v174_v31 }
  0x6c   :  { %v302_v33 = vld [vmem:[#allocation6 + $0x4e0] sm:$0xff]  ;;  %3310 = vmatpush1.bf16.msra.mxu1 %v5324_v35 }
  0x6d   :  { %v5317_v37 = vcombine.high %v298_v32, %v302_v33  ;;  %v162_v38 = vld [vmem:[#allocation6 + $0x80] sm:$0xff]  ;;  %3268 = vmatprep.subr.bf16.mxu0 %v5189_v36  ;;  %v5316_v43 = vcombine.low %v298_v32, %v302_v33 }
  0x6e   :  { %v166_v39 = vld [vmem:[#allocation6 + $0xa0] sm:$0xff]  ;;  %3269 = vmatpush1.bf16.msra.mxu0 %v5188_v42 }
  0x6f   :  { %v290_v40 = vld [vmem:[#allocation6 + $0x480] sm:$0xff]  ;;  %v5181_v44 = vcombine.high %v162_v38, %v166_v39  ;;  %3311 = vmatprep.subr.bf16.mxu1 %v5317_v37  ;;  %v5180_v50 = vcombine.low %v162_v38, %v166_v39 }
  0x70   :  { %v294_v41 = vld [vmem:[#allocation6 + $0x4a0] sm:$0xff]  ;;  %3312 = vmatpush1.bf16.msra.mxu1 %v5316_v43 }
  0x71   :  { %v5309_v45 = vcombine.high %v290_v40, %v294_v41  ;;  %v154_v46 = vld [vmem:[#allocation6 + $0x40] sm:$0xff]  ;;  %3270 = vmatprep.subr.bf16.mxu0 %v5181_v44  ;;  %v5308_v51 = vcombine.low %v290_v40, %v294_v41 }
  0x72   :  { %v158_v47 = vld [vmem:[#allocation6 + $0x60] sm:$0xff]  ;;  %3271 = vmatpush1.bf16.msra.mxu0 %v5180_v50 }
  0x73   :  { %v282_v48 = vld [vmem:[#allocation6 + $0x440] sm:$0xff]  ;;  %v5173_v52 = vcombine.high %v154_v46, %v158_v47  ;;  %3313 = vmatprep.subr.bf16.mxu1 %v5309_v45  ;;  %v5172_v0 = vcombine.low %v154_v46, %v158_v47 }
  0x74   :  { %v286_v49 = vld [vmem:[#allocation6 + $0x460] sm:$0xff]  ;;  %3314 = vmatpush1.bf16.msra.mxu1 %v5308_v51 }
  0x75   :  { %v146_v53 = vld [vmem:[#allocation6] sm:$0xff]  ;;  %v5301_v56 = vcombine.high %v282_v48, %v286_v49  ;;  %3272 = vmatprep.subr.bf16.mxu0 %v5173_v52  ;;  %v5300_v1 = vcombine.low %v282_v48, %v286_v49 }
  0x76   :  { %v150_v57 = vld [vmem:[#allocation6 + $0x20] sm:$0xff]  ;;  %3273 = vmatpush1.bf16.msra.mxu0 %v5172_v0 }
  0x77   :  { %v274_v61 = vld [vmem:[#allocation6 + $0x400] sm:$0xff]  ;;  %v5165_v2 = vcombine.high %v146_v53, %v150_v57  ;;  %3315 = vmatprep.subr.bf16.mxu1 %v5301_v56  ;;  %v5164_v8 = vcombine.low %v146_v53, %v150_v57 }
  0x78   :  { %v278_v62 = vld [vmem:[#allocation6 + $0x420] sm:$0xff]  ;;  %3316 = vmatpush1.bf16.msra.mxu1 %v5300_v1 }
  0x79   :  { %v5293_v3 = vcombine.high %v274_v61, %v278_v62  ;;  %v266_v4 = vld [vmem:[#allocation6 + $0x3c0] sm:$0xff]  ;;  %3274 = vmatprep.subr.bf16.mxu0 %v5165_v2  ;;  %v5292_v9 = vcombine.low %v274_v61, %v278_v62 }
  0x7a   :  { %v270_v5 = vld [vmem:[#allocation6 + $0x3e0] sm:$0xff]  ;;  %3275 = vmatpush1.bf16.msra.mxu0 %v5164_v8 }
  0x7b   :  { %v394_v6 = vld [vmem:[#allocation6 + $0x7c0] sm:$0xff]  ;;  %v5285_v10 = vcombine.high %v266_v4, %v270_v5  ;;  %3317 = vmatprep.subr.bf16.mxu1 %v5293_v3  ;;  %v5284_v16 = vcombine.low %v266_v4, %v270_v5 }
  0x7c   :  { %v398_v7 = vld [vmem:[#allocation6 + $0x7e0] sm:$0xff]  ;;  %3318 = vmatpush1.bf16.msra.mxu1 %v5292_v9 }
  0x7d   :  { %v5413_v11 = vcombine.high %v394_v6, %v398_v7  ;;  %v258_v12 = vld [vmem:[#allocation6 + $0x380] sm:$0xff]  ;;  %3276 = vmatprep.subr.bf16.mxu0 %v5285_v10  ;;  %v5412_v17 = vcombine.low %v394_v6, %v398_v7 }
  0x7e   :  { %v262_v13 = vld [vmem:[#allocation6 + $0x3a0] sm:$0xff]  ;;  %3277 = vmatpush2.bf16.msra.mxu0 %v5284_v16 }
  0x7f   :  { %v386_v14 = vld [vmem:[#allocation6 + $0x780] sm:$0xff]  ;;  %v5277_v18 = vcombine.high %v258_v12, %v262_v13  ;;  %3319 = vmatprep.subr.bf16.mxu1 %v5413_v11  ;;  %v5276_v24 = vcombine.low %v258_v12, %v262_v13 }
  0x80   :  { %v390_v15 = vld [vmem:[#allocation6 + $0x7a0] sm:$0xff]  ;;  %3320 = vmatpush2.bf16.msra.mxu1 %v5412_v17 }
  0x81   :  { %v5405_v19 = vcombine.high %v386_v14, %v390_v15  ;;  %v250_v20 = vld [vmem:[#allocation6 + $0x340] sm:$0xff]  ;;  %3278 = vmatprep.subr.bf16.mxu0 %v5277_v18  ;;  %v5404_v25 = vcombine.low %v386_v14, %v390_v15  ;;  %v124_v14 = vld [vmem:[#allocation3 + $0x10] sm:$0xff] }
  0x82   :  { %v254_v21 = vld [vmem:[#allocation6 + $0x360] sm:$0xff]  ;;  %3279 = vmatpush2.bf16.msra.mxu0 %v5276_v24  ;;  %v132_v15 = vld [vmem:[#allocation3 + $0x50] sm:$0xff]  ;;  %v135_v24 = vld [vmem:[#allocation3 + $0x68] sm:$0xff] }
  0x83   :  { %v378_v22 = vld [vmem:[#allocation6 + $0x740] sm:$0xff]  ;;  %v5269_v26 = vcombine.high %v250_v20, %v254_v21  ;;  %3321 = vmatprep.subr.bf16.mxu1 %v5405_v19  ;;  %v5268_v32 = vcombine.low %v250_v20, %v254_v21 }
  0x84   :  { %v382_v23 = vld [vmem:[#allocation6 + $0x760] sm:$0xff]  ;;  %3322 = vmatpush2.bf16.msra.mxu1 %v5404_v25  ;;  %v6330_v25 = vpack.c.bf16 %v132_v15, %v124_v14 }
  0x85   :  { %v5397_v27 = vcombine.high %v378_v22, %v382_v23  ;;  %v242_v28 = vld [vmem:[#allocation6 + $0x300] sm:$0xff]  ;;  %3280 = vmatprep.subr.bf16.mxu0 %v5269_v26  ;;  %v5396_v33 = vcombine.low %v378_v22, %v382_v23  ;;  %v127_v23 = vld [vmem:[#allocation3 + $0x28] sm:$0xff] }
  0x86   :  { %v246_v29 = vld [vmem:[#allocation6 + $0x320] sm:$0xff]  ;;  %3281 = vmatpush2.bf16.msra.mxu0 %v5268_v32 }
  0x87   :  { %v370_v30 = vld [vmem:[#allocation6 + $0x700] sm:$0xff]  ;;  %v5261_v34 = vcombine.high %v242_v28, %v246_v29  ;;  %3323 = vmatprep.subr.bf16.mxu1 %v5397_v27  ;;  %v5260_v40 = vcombine.low %v242_v28, %v246_v29  ;;  %v129_v27 = vld [vmem:[#allocation3 + $0x38] sm:$0xff] }
  0x88   :  { %v374_v31 = vld [vmem:[#allocation6 + $0x720] sm:$0xff]  ;;  %3324 = vmatpush2.bf16.msra.mxu1 %v5396_v33  ;;  %v137_v28 = vld [vmem:[#allocation3 + $0x78] sm:$0xff] }
  0x89   :  { %v5389_v35 = vcombine.high %v370_v30, %v374_v31  ;;  %v234_v36 = vld [vmem:[#allocation6 + $0x2c0] sm:$0xff]  ;;  %3282 = vmatprep.subr.bf16.mxu0 %v5261_v34  ;;  %v5388_v41 = vcombine.low %v370_v30, %v374_v31  ;;  %v6332_v34 = vpack.c.bf16 %v135_v24, %v127_v23 }
  0x8a   :  { %v238_v37 = vld [vmem:[#allocation6 + $0x2e0] sm:$0xff]  ;;  %3283 = vmatpush2.bf16.msra.mxu0 %v5260_v40 }
  0x8b   :  { %v362_v38 = vld [vmem:[#allocation6 + $0x6c0] sm:$0xff]  ;;  %v5253_v42 = vcombine.high %v234_v36, %v238_v37  ;;  %3325 = vmatprep.subr.bf16.mxu1 %v5389_v35  ;;  %v5252_v48 = vcombine.low %v234_v36, %v238_v37  ;;  %v6335_v37 = vpack.c.bf16 %v137_v28, %v129_v27 }
  0x8c   :  { %v366_v39 = vld [vmem:[#allocation6 + $0x6e0] sm:$0xff]  ;;  %3326 = vmatpush2.bf16.msra.mxu1 %v5388_v41 }
  0x8d   :  { %v5381_v43 = vcombine.high %v362_v38, %v366_v39  ;;  %v226_v44 = vld [vmem:[#allocation6 + $0x280] sm:$0xff]  ;;  %3284 = vmatprep.subr.bf16.mxu0 %v5253_v42  ;;  %v5380_v49 = vcombine.low %v362_v38, %v366_v39 }
  0x8e   :  { %v230_v45 = vld [vmem:[#allocation6 + $0x2a0] sm:$0xff]  ;;  %3285 = vmatpush2.bf16.msra.mxu0 %v5252_v48 }
  0x8f   :  { %v354_v46 = vld [vmem:[#allocation6 + $0x680] sm:$0xff]  ;;  %v5245_v50 = vcombine.high %v226_v44, %v230_v45  ;;  %3327 = vmatprep.subr.bf16.mxu1 %v5381_v43  ;;  %v5244_v56 = vcombine.low %v226_v44, %v230_v45 }
  0x90   :  { %v358_v47 = vld [vmem:[#allocation6 + $0x6a0] sm:$0xff]  ;;  %3328 = vmatpush2.bf16.msra.mxu1 %v5380_v49 }
  0x91   :  { %v5373_v51 = vcombine.high %v354_v46, %v358_v47  ;;  %v218_v52 = vld [vmem:[#allocation6 + $0x240] sm:$0xff]  ;;  %3286 = vmatprep.subr.bf16.mxu0 %v5245_v50  ;;  %v5372_v57 = vcombine.low %v354_v46, %v358_v47 }
  0x92   :  { %v222_v53 = vld [vmem:[#allocation6 + $0x260] sm:$0xff]  ;;  %3287 = vmatpush2.bf16.msra.mxu0 %v5244_v56 }
  0x93   :  { %v346_v54 = vld [vmem:[#allocation6 + $0x640] sm:$0xff]  ;;  %v5237_v59 = vcombine.high %v218_v52, %v222_v53  ;;  %3329 = vmatprep.subr.bf16.mxu1 %v5373_v51  ;;  %v5236_v2 = vcombine.low %v218_v52, %v222_v53 }
  0x94   :  { %v350_v55 = vld [vmem:[#allocation6 + $0x660] sm:$0xff]  ;;  %3330 = vmatpush2.bf16.msra.mxu1 %v5372_v57 }
  0x95   :  { %v5365_v60 = vcombine.high %v346_v54, %v350_v55  ;;  %v210_v61 = vld [vmem:[#allocation6 + $0x200] sm:$0xff]  ;;  %3288 = vmatprep.subr.bf16.mxu0 %v5237_v59  ;;  %v5364_v3 = vcombine.low %v346_v54, %v350_v55 }
  0x96   :  { %v214_v62 = vld [vmem:[#allocation6 + $0x220] sm:$0xff]  ;;  %3289 = vmatpush2.bf16.msra.mxu0 %v5236_v2 }
  0x97   :  { %v338_v0 = vld [vmem:[#allocation6 + $0x600] sm:$0xff]  ;;  %v5229_v4 = vcombine.high %v210_v61, %v214_v62  ;;  %3331 = vmatprep.subr.bf16.mxu1 %v5365_v60  ;;  %v5228_v10 = vcombine.low %v210_v61, %v214_v62 }
  0x98   :  { %v342_v1 = vld [vmem:[#allocation6 + $0x620] sm:$0xff]  ;;  %3332 = vmatpush2.bf16.msra.mxu1 %v5364_v3 }
  0x99   :  { %v5357_v5 = vcombine.high %v338_v0, %v342_v1  ;;  %v458_v6 = vld [vmem:[#allocation6 + $0x9c0] sm:$0xff]  ;;  %3290 = vmatprep.subr.bf16.mxu0 %v5229_v4  ;;  %v5356_v13 = vcombine.low %v338_v0, %v342_v1 }
  0x9a   :  { %v462_v7 = vld [vmem:[#allocation6 + $0x9e0] sm:$0xff]  ;;  %3291 = vmatpush2.bf16.msra.mxu0 %v5228_v10 }
  0x9b   :  { %v586_v8 = vld [vmem:[#allocation6 + $0xdc0] sm:$0xff]  ;;  %v5477_v16 = vcombine.high %v458_v6, %v462_v7  ;;  %3333 = vmatprep.subr.bf16.mxu1 %v5357_v5  ;;  %v5476_v26 = vcombine.low %v458_v6, %v462_v7 }
  0x9c   :  { %v590_v9 = vld [vmem:[#allocation6 + $0xde0] sm:$0xff]  ;;  %3334 = vmatpush2.bf16.msra.mxu1 %v5356_v13 }
  0x9d   :  { %v122_v11 = vld [vmem:[#allocation3] sm:$0xff]  ;;  %v5605_v17 = vcombine.high %v586_v8, %v590_v9  ;;  %3346 = vmatprep.subr.bf16.mxu0 %v5477_v16  ;;  %v5604_v29 = vcombine.low %v586_v8, %v590_v9 }
  0x9e   :  { %v130_v12 = vld [vmem:[#allocation3 + $0x40] sm:$0xff] }
  0x9f   :  { %v450_v18 = vld [vmem:[#allocation6 + $0x980] sm:$0xff]  ;;  %v6328_v21 = vpack.c.bf16 %v130_v12, %v122_v11  ;;  %3389 = vmatprep.subr.bf16.mxu1 %v5605_v17  ;;  %3336 = vmatmul.mubr.bf16.vlgmr.msra.gmra.mxu1 %v6330_v25 }
  0xa0   :  { %v454_v19 = vld [vmem:[#allocation6 + $0x9a0] sm:$0xff]  ;;  %3390 = vmatpush1.bf16.msra.mxu1 %v5604_v29  ;;  %3421 = vmatprep.mubr.bf16.mxu1 %v6335_v37 }
  0xa1   :  { %v578_v20 = vld [vmem:[#allocation6 + $0xd80] sm:$0xff]  ;;  %v5469_v30 = vcombine.high %v450_v18, %v454_v19  ;;  %3293 = vmatmul.mubr.bf16.vlgmr.msra.gmra.mxu0 %v6328_v21  ;;  %v5468_v38 = vcombine.low %v450_v18, %v454_v19 }
  0xa2   :  { %v582_v22 = vld [vmem:[#allocation6 + $0xda0] sm:$0xff]  ;;  %3347 = vmatpush1.bf16.msra.mxu0 %v5476_v26  ;;  %3378 = vmatprep.mubr.bf16.mxu0 %v6332_v34 }
  0xa3   :  { %v5597_v31 = vcombine.high %v578_v20, %v582_v22  ;;  %v442_v32 = vld [vmem:[#allocation6 + $0x940] sm:$0xff]  ;;  %3348 = vmatprep.subr.bf16.mxu0 %v5469_v30  ;;  %v5596_v39 = vcombine.low %v578_v20, %v582_v22 }
  0xa4   :  { %v446_v33 = vld [vmem:[#allocation6 + $0x960] sm:$0xff] }
  0xa5   :  { %v570_v35 = vld [vmem:[#allocation6 + $0xd40] sm:$0xff]  ;;  %v5461_v40 = vcombine.high %v442_v32, %v446_v33  ;;  %3391 = vmatprep.subr.bf16.mxu1 %v5597_v31  ;;  %v5460_v46 = vcombine.low %v442_v32, %v446_v33 }
  0xa6   :  { %v574_v36 = vld [vmem:[#allocation6 + $0xd60] sm:$0xff]  ;;  %3349 = vmatpush1.bf16.msra.mxu0 %v5468_v38  ;;  %3392 = vmatpush1.bf16.msra.mxu1 %v5596_v39 }
  0xa7   :  { %v5589_v41 = vcombine.high %v570_v35, %v574_v36  ;;  %v434_v42 = vld [vmem:[#allocation6 + $0x900] sm:$0xff]  ;;  %3350 = vmatprep.subr.bf16.mxu0 %v5461_v40  ;;  %v5588_v47 = vcombine.low %v570_v35, %v574_v36 }
  0xa8   :  { %v438_v43 = vld [vmem:[#allocation6 + $0x920] sm:$0xff] }
  0xa9   :  { %v562_v44 = vld [vmem:[#allocation6 + $0xd00] sm:$0xff]  ;;  %v5453_v48 = vcombine.high %v434_v42, %v438_v43  ;;  %3393 = vmatprep.subr.bf16.mxu1 %v5589_v41  ;;  %v5452_v54 = vcombine.low %v434_v42, %v438_v43 }
  0xaa   :  { %v566_v45 = vld [vmem:[#allocation6 + $0xd20] sm:$0xff]  ;;  %3351 = vmatpush1.bf16.msra.mxu0 %v5460_v46  ;;  %3394 = vmatpush1.bf16.msra.mxu1 %v5588_v47 }
  0xab   :  { %v426_v49 = vld [vmem:[#allocation6 + $0x8c0] sm:$0xff]  ;;  %v5581_v52 = vcombine.high %v562_v44, %v566_v45  ;;  %3352 = vmatprep.subr.bf16.mxu0 %v5453_v48  ;;  %v5580_v55 = vcombine.low %v562_v44, %v566_v45 }
  0xac   :  { %v430_v50 = vld [vmem:[#allocation6 + $0x8e0] sm:$0xff] }
  0xad   :  { %v554_v51 = vld [vmem:[#allocation6 + $0xcc0] sm:$0xff]  ;;  %v5445_v56 = vcombine.high %v426_v49, %v430_v50  ;;  %3395 = vmatprep.subr.bf16.mxu1 %v5581_v52  ;;  %v5444_v0 = vcombine.low %v426_v49, %v430_v50 }
  0xae   :  { %v558_v53 = vld [vmem:[#allocation6 + $0xce0] sm:$0xff]  ;;  %3353 = vmatpush1.bf16.msra.mxu0 %v5452_v54  ;;  %3396 = vmatpush1.bf16.msra.mxu1 %v5580_v55 }
  0xaf   :  { %v418_v57 = vld [vmem:[#allocation6 + $0x880] sm:$0xff]  ;;  %v5573_v61 = vcombine.high %v554_v51, %v558_v53  ;;  %3354 = vmatprep.subr.bf16.mxu0 %v5445_v56  ;;  %v5572_v1 = vcombine.low %v554_v51, %v558_v53 }
  0xb0   :  { %v422_v59 = vld [vmem:[#allocation6 + $0x8a0] sm:$0xff] }
  0xb1   :  { %v546_v60 = vld [vmem:[#allocation6 + $0xc80] sm:$0xff]  ;;  %v5437_v2 = vcombine.high %v418_v57, %v422_v59  ;;  %3397 = vmatprep.subr.bf16.mxu1 %v5573_v61  ;;  %v5436_v8 = vcombine.low %v418_v57, %v422_v59 }
  0xb2   :  { %v550_v62 = vld [vmem:[#allocation6 + $0xca0] sm:$0xff]  ;;  %3355 = vmatpush1.bf16.msra.mxu0 %v5444_v0  ;;  %3398 = vmatpush1.bf16.msra.mxu1 %v5572_v1 }
  0xb3   :  { %v410_v3 = vld [vmem:[#allocation6 + $0x840] sm:$0xff]  ;;  %v5565_v6 = vcombine.high %v546_v60, %v550_v62  ;;  %3356 = vmatprep.subr.bf16.mxu0 %v5437_v2  ;;  %v5564_v9 = vcombine.low %v546_v60, %v550_v62 }
  0xb4   :  { %v414_v4 = vld [vmem:[#allocation6 + $0x860] sm:$0xff] }
  0xb5   :  { %v538_v5 = vld [vmem:[#allocation6 + $0xc40] sm:$0xff]  ;;  %v5429_v10 = vcombine.high %v410_v3, %v414_v4  ;;  %3399 = vmatprep.subr.bf16.mxu1 %v5565_v6  ;;  %v5428_v16 = vcombine.low %v410_v3, %v414_v4 }
  0xb6   :  { %v542_v7 = vld [vmem:[#allocation6 + $0xc60] sm:$0xff]  ;;  %3357 = vmatpush1.bf16.msra.mxu0 %v5436_v8  ;;  %3400 = vmatpush1.bf16.msra.mxu1 %v5564_v9 }
  0xb7   :  { %v402_v11 = vld [vmem:[#allocation6 + $0x800] sm:$0xff]  ;;  %v5557_v14 = vcombine.high %v538_v5, %v542_v7  ;;  %3358 = vmatprep.subr.bf16.mxu0 %v5429_v10  ;;  %v5556_v17 = vcombine.low %v538_v5, %v542_v7 }
  0xb8   :  { %v406_v12 = vld [vmem:[#allocation6 + $0x820] sm:$0xff] }
  0xb9   :  { %v530_v13 = vld [vmem:[#allocation6 + $0xc00] sm:$0xff]  ;;  %v5421_v18 = vcombine.high %v402_v11, %v406_v12  ;;  %3401 = vmatprep.subr.bf16.mxu1 %v5557_v14  ;;  %v5420_v26 = vcombine.low %v402_v11, %v406_v12 }
  0xba   :  { %v534_v15 = vld [vmem:[#allocation6 + $0xc20] sm:$0xff]  ;;  %3359 = vmatpush1.bf16.msra.mxu0 %v5428_v16  ;;  %3402 = vmatpush1.bf16.msra.mxu1 %v5556_v17 }
  0xbb   :  { %v522_v19 = vld [vmem:[#allocation6 + $0xbc0] sm:$0xff]  ;;  %v5549_v23 = vcombine.high %v530_v13, %v534_v15  ;;  %3360 = vmatprep.subr.bf16.mxu0 %v5421_v18  ;;  %v5548_v27 = vcombine.low %v530_v13, %v534_v15 }
  0xbc   :  { %v526_v20 = vld [vmem:[#allocation6 + $0xbe0] sm:$0xff] }
  0xbd   :  { %v650_v22 = vld [vmem:[#allocation6 + $0xfc0] sm:$0xff]  ;;  %v5541_v28 = vcombine.high %v522_v19, %v526_v20  ;;  %3403 = vmatprep.subr.bf16.mxu1 %v5549_v23  ;;  %v5540_v35 = vcombine.low %v522_v19, %v526_v20 }
  0xbe   :  { %v654_v24 = vld [vmem:[#allocation6 + $0xfe0] sm:$0xff]  ;;  %3361 = vmatpush1.bf16.msra.mxu0 %v5420_v26  ;;  %3404 = vmatpush1.bf16.msra.mxu1 %v5548_v27  ;;  %v203_v27 = vld [vmem:[#allocation6 + $0x1c8] sm:$0xff] }
  0xbf   :  { %v514_v29 = vld [vmem:[#allocation6 + $0xb80] sm:$0xff]  ;;  %v5669_v32 = vcombine.high %v650_v22, %v654_v24  ;;  %3362 = vmatprep.subr.bf16.mxu0 %v5541_v28  ;;  %v5668_v36 = vcombine.low %v650_v22, %v654_v24  ;;  %v207_v28 = vld [vmem:[#allocation6 + $0x1e8] sm:$0xff] }
  0xc0   :  { %v518_v30 = vld [vmem:[#allocation6 + $0xba0] sm:$0xff] }
  0xc1   :  { %v642_v31 = vld [vmem:[#allocation6 + $0xf80] sm:$0xff]  ;;  %v5533_v38 = vcombine.high %v514_v29, %v518_v30  ;;  %3405 = vmatprep.subr.bf16.mxu1 %v5669_v32  ;;  %v5532_v44 = vcombine.low %v514_v29, %v518_v30  ;;  %v331_v29 = vld [vmem:[#allocation6 + $0x5c8] sm:$0xff] }
  0xc2   :  { %v646_v33 = vld [vmem:[#allocation6 + $0xfa0] sm:$0xff]  ;;  %3363 = vmatpush2.bf16.msra.mxu0 %v5540_v35  ;;  %3406 = vmatpush2.bf16.msra.mxu1 %v5668_v36  ;;  %v128_v35 = vld [vmem:[#allocation3 + $0x30] sm:$0xff] }
  0xc3   :  { %v506_v39 = vld [vmem:[#allocation6 + $0xb40] sm:$0xff]  ;;  %v5661_v42 = vcombine.high %v642_v31, %v646_v33  ;;  %3364 = vmatprep.subr.bf16.mxu0 %v5533_v38  ;;  %v5660_v45 = vcombine.low %v642_v31, %v646_v33  ;;  %v335_v33 = vld [vmem:[#allocation6 + $0x5e8] sm:$0xff]  ;;  %v136_v36 = vld [vmem:[#allocation3 + $0x70] sm:$0xff] }
  0xc4   :  { %v510_v40 = vld [vmem:[#allocation6 + $0xb60] sm:$0xff] }
  0xc5   :  { %v634_v41 = vld [vmem:[#allocation6 + $0xf40] sm:$0xff]  ;;  %v5525_v46 = vcombine.high %v506_v39, %v510_v40  ;;  %3407 = vmatprep.subr.bf16.mxu1 %v5661_v42  ;;  %v5524_v52 = vcombine.low %v506_v39, %v510_v40  ;;  %v5223_v40 = vcombine.high %v203_v27, %v207_v28  ;;  %v199_v42 = vld [vmem:[#allocation6 + $0x1a8] sm:$0xff] }
  0xc6   :  { %v638_v43 = vld [vmem:[#allocation6 + $0xf60] sm:$0xff]  ;;  %3365 = vmatpush2.bf16.msra.mxu0 %v5532_v44  ;;  %3408 = vmatpush2.bf16.msra.mxu1 %v5660_v45  ;;  %v5351_v44 = vcombine.high %v331_v29, %v335_v33  ;;  %v327_v45 = vld [vmem:[#allocation6 + $0x5a8] sm:$0xff] }
  0xc7   :  { %v498_v47 = vld [vmem:[#allocation6 + $0xb00] sm:$0xff]  ;;  %v5653_v50 = vcombine.high %v634_v41, %v638_v43  ;;  %3366 = vmatprep.subr.bf16.mxu0 %v5525_v46  ;;  %v5652_v53 = vcombine.low %v634_v41, %v638_v43  ;;  %v195_v41 = vld [vmem:[#allocation6 + $0x188] sm:$0xff] }
  0xc8   :  { %v502_v48 = vld [vmem:[#allocation6 + $0xb20] sm:$0xff]  ;;  %v323_v43 = vld [vmem:[#allocation6 + $0x588] sm:$0xff] }
  0xc9   :  { %v626_v49 = vld [vmem:[#allocation6 + $0xf00] sm:$0xff]  ;;  %v5517_v54 = vcombine.high %v498_v47, %v502_v48  ;;  %3409 = vmatprep.subr.bf16.mxu1 %v5653_v50  ;;  %v5516_v61 = vcombine.low %v498_v47, %v502_v48  ;;  %v6342_v47 = vpack.c.bf16 %v136_v36, %v128_v35  ;;  %v5222_v48 = vcombine.low %v203_v27, %v207_v28  ;;  %v287_v27 = vld [vmem:[#allocation6 + $0x468] sm:$0xff] }
  0xca   :  { %v630_v51 = vld [vmem:[#allocation6 + $0xf20] sm:$0xff]  ;;  %3367 = vmatpush2.bf16.msra.mxu0 %v5524_v52  ;;  %3410 = vmatpush2.bf16.msra.mxu1 %v5652_v53  ;;  %v5215_v50 = vcombine.high %v195_v41, %v199_v42  ;;  %v191_v52 = vld [vmem:[#allocation6 + $0x168] sm:$0xff]  ;;  %v5343_v53 = vcombine.high %v323_v43, %v327_v45 }
  0xcb   :  { %v490_v55 = vld [vmem:[#allocation6 + $0xac0] sm:$0xff]  ;;  %v5645_v59 = vcombine.high %v626_v49, %v630_v51  ;;  %3368 = vmatprep.subr.bf16.mxu0 %v5517_v54  ;;  %v5644_v62 = vcombine.low %v626_v49, %v630_v51  ;;  %v5350_v49 = vcombine.low %v331_v29, %v335_v33  ;;  %v187_v51 = vld [vmem:[#allocation6 + $0x148] sm:$0xff] }
  0xcc   :  { %v494_v56 = vld [vmem:[#allocation6 + $0xae0] sm:$0xff]  ;;  %v315_v54 = vld [vmem:[#allocation6 + $0x548] sm:$0xff] }
  0xcd   :  { %v618_v57 = vld [vmem:[#allocation6 + $0xec0] sm:$0xff]  ;;  %v5509_v0 = vcombine.high %v490_v55, %v494_v56  ;;  %3411 = vmatprep.subr.bf16.mxu1 %v5645_v59  ;;  %v5508_v6 = vcombine.low %v490_v55, %v494_v56  ;;  %v319_v55 = vld [vmem:[#allocation6 + $0x568] sm:$0xff]  ;;  %v5214_v56 = vcombine.low %v195_v41, %v199_v42  ;;  %v5207_v59 = vcombine.high %v187_v51, %v191_v52 }
  0xce   :  { %v622_v60 = vld [vmem:[#allocation6 + $0xee0] sm:$0xff]  ;;  %3369 = vmatpush2.bf16.msra.mxu0 %v5516_v61  ;;  %3412 = vmatpush2.bf16.msra.mxu1 %v5644_v62  ;;  %v183_v61 = vld [vmem:[#allocation6 + $0x128] sm:$0xff] }
  0xcf   :  { %v482_v1 = vld [vmem:[#allocation6 + $0xa80] sm:$0xff]  ;;  %v5637_v4 = vcombine.high %v618_v57, %v622_v60  ;;  %3370 = vmatprep.subr.bf16.mxu0 %v5509_v0  ;;  %v5636_v7 = vcombine.low %v618_v57, %v622_v60  ;;  %v5342_v57 = vcombine.low %v323_v43, %v327_v45  ;;  %v179_v60 = vld [vmem:[#allocation6 + $0x108] sm:$0xff]  ;;  %v5335_v0 = vcombine.high %v315_v54, %v319_v55 }
  0xd0   :  { %v486_v2 = vld [vmem:[#allocation6 + $0xaa0] sm:$0xff]  ;;  %v307_v62 = vld [vmem:[#allocation6 + $0x508] sm:$0xff] }
  0xd1   :  { %v610_v3 = vld [vmem:[#allocation6 + $0xe80] sm:$0xff]  ;;  %v5501_v8 = vcombine.high %v482_v1, %v486_v2  ;;  %3413 = vmatprep.subr.bf16.mxu1 %v5637_v4  ;;  %v5500_v14 = vcombine.low %v482_v1, %v486_v2  ;;  %v311_v1 = vld [vmem:[#allocation6 + $0x528] sm:$0xff]  ;;  %v5206_v2 = vcombine.low %v187_v51, %v191_v52  ;;  %v5199_v4 = vcombine.high %v179_v60, %v183_v61 }
  0xd2   :  { %v614_v5 = vld [vmem:[#allocation6 + $0xea0] sm:$0xff]  ;;  %3371 = vmatpush2.bf16.msra.mxu0 %v5508_v6  ;;  %3414 = vmatpush2.bf16.msra.mxu1 %v5636_v7  ;;  %v175_v6 = vld [vmem:[#allocation6 + $0xe8] sm:$0xff] }
  0xd3   :  { %v474_v9 = vld [vmem:[#allocation6 + $0xa40] sm:$0xff]  ;;  %v5629_v12 = vcombine.high %v610_v3, %v614_v5  ;;  %3372 = vmatprep.subr.bf16.mxu0 %v5501_v8  ;;  %v5628_v15 = vcombine.low %v610_v3, %v614_v5  ;;  %v5334_v3 = vcombine.low %v315_v54, %v319_v55  ;;  %v171_v5 = vld [vmem:[#allocation6 + $0xc8] sm:$0xff]  ;;  %v5327_v8 = vcombine.high %v307_v62, %v311_v1 }
  0xd4   :  { %v478_v10 = vld [vmem:[#allocation6 + $0xa60] sm:$0xff]  ;;  %v299_v7 = vld [vmem:[#allocation6 + $0x4c8] sm:$0xff] }
  0xd5   :  { %v602_v11 = vld [vmem:[#allocation6 + $0xe40] sm:$0xff]  ;;  %v5493_v16 = vcombine.high %v474_v9, %v478_v10  ;;  %3415 = vmatprep.subr.bf16.mxu1 %v5629_v12  ;;  %v5492_v23 = vcombine.low %v474_v9, %v478_v10  ;;  %v303_v9 = vld [vmem:[#allocation6 + $0x4e8] sm:$0xff]  ;;  %v5198_v10 = vcombine.low %v179_v60, %v183_v61  ;;  %v5191_v12 = vcombine.high %v171_v5, %v175_v6 }
  0xd6   :  { %v606_v13 = vld [vmem:[#allocation6 + $0xe60] sm:$0xff]  ;;  %3373 = vmatpush2.bf16.msra.mxu0 %v5500_v14  ;;  %3416 = vmatpush2.bf16.msra.mxu1 %v5628_v15  ;;  %v167_v14 = vld [vmem:[#allocation6 + $0xa8] sm:$0xff] }
  0xd7   :  { %v466_v17 = vld [vmem:[#allocation6 + $0xa00] sm:$0xff]  ;;  %v5621_v20 = vcombine.high %v602_v11, %v606_v13  ;;  %3374 = vmatprep.subr.bf16.mxu0 %v5493_v16  ;;  %v5620_v24 = vcombine.low %v602_v11, %v606_v13  ;;  %v5326_v11 = vcombine.low %v307_v62, %v311_v1  ;;  %v163_v13 = vld [vmem:[#allocation6 + $0x88] sm:$0xff]  ;;  %v5319_v16 = vcombine.high %v299_v7, %v303_v9 }
  0xd8   :  { %v470_v18 = vld [vmem:[#allocation6 + $0xa20] sm:$0xff]  ;;  %v291_v15 = vld [vmem:[#allocation6 + $0x488] sm:$0xff]  ;;  %v5182_v28 = vcombine.low %v163_v13, %v167_v14 }
  0xd9   :  { %v594_v19 = vld [vmem:[#allocation6 + $0xe00] sm:$0xff]  ;;  %v5485_v26 = vcombine.high %v466_v17, %v470_v18  ;;  %3417 = vmatprep.subr.bf16.mxu1 %v5621_v20  ;;  %v5484_v38 = vcombine.low %v466_v17, %v470_v18  ;;  %v295_v17 = vld [vmem:[#allocation6 + $0x4a8] sm:$0xff]  ;;  %v5190_v18 = vcombine.low %v171_v5, %v175_v6  ;;  %v5183_v20 = vcombine.high %v163_v13, %v167_v14 }
  0xda   :  { %v598_v22 = vld [vmem:[#allocation6 + $0xe20] sm:$0xff]  ;;  %3375 = vmatpush2.bf16.msra.mxu0 %v5492_v23  ;;  %3418 = vmatpush2.bf16.msra.mxu1 %v5620_v24  ;;  %v159_v23 = vld [vmem:[#allocation6 + $0x68] sm:$0xff]  ;;  %v5310_v29 = vcombine.low %v291_v15, %v295_v17 }
  0xdb   :  { %v5613_v30 = vcombine.high %v594_v19, %v598_v22  ;;  %v126_v31 = vld [vmem:[#allocation3 + $0x20] sm:$0xff]  ;;  %3376 = vmatprep.subr.bf16.mxu0 %v5485_v26  ;;  %v5612_v39 = vcombine.low %v594_v19, %v598_v22  ;;  %v5318_v19 = vcombine.low %v299_v7, %v303_v9  ;;  %v155_v22 = vld [vmem:[#allocation6 + $0x48] sm:$0xff]  ;;  %v5311_v26 = vcombine.high %v291_v15, %v295_v17 }
  0xdc   :  { %v134_v32 = vld [vmem:[#allocation3 + $0x60] sm:$0xff]  ;;  %v283_v24 = vld [vmem:[#allocation6 + $0x448] sm:$0xff] }
  0xdd   :  { %3419 = vmatprep.subr.bf16.mxu1 %v5613_v30  ;;  %v6340_v46 = vpack.c.bf16 %v134_v32, %v126_v31  ;;  %v5175_v30 = vcombine.high %v155_v22, %v159_v23  ;;  %v147_v31 = vld [vmem:[#allocation6 + $0x8] sm:$0xff]  ;;  %v5303_v35 = vcombine.high %v283_v24, %v287_v27 }
  0xde   :  { %3377 = vmatpush2.bf16.msra.mxu0 %v5484_v38  ;;  %3420 = vmatpush2.bf16.msra.mxu1 %v5612_v39  ;;  %v151_v32 = vld [vmem:[#allocation6 + $0x28] sm:$0xff]  ;;  %v5174_v38 = vcombine.low %v155_v22, %v159_v23  ;;  %v5302_v39 = vcombine.low %v283_v24, %v287_v27 }
  0xdf   :  { %3432 = vmatprep.subr.bf16.mxu0 %v5223_v40  ;;  %3475 = vmatprep.subr.bf16.mxu1 %v5351_v44  ;;  %v275_v33 = vld [vmem:[#allocation6 + $0x408] sm:$0xff]  ;;  %v5167_v40 = vcombine.high %v147_v31, %v151_v32 }
  0xe0   :  { %v279_v36 = vld [vmem:[#allocation6 + $0x428] sm:$0xff] }
  0xe1   :  { %3379 = vmatmul.mubr.bf16.vlgmr.msra.gmra.mxu0 %v6340_v46  ;;  %3422 = vmatmul.mubr.bf16.vlgmr.msra.gmra.mxu1 %v6342_v47  ;;  %v5295_v41 = vcombine.high %v275_v33, %v279_v36  ;;  %v267_v42 = vld [vmem:[#allocation6 + $0x3c8] sm:$0xff] }
  0xe2   :  { %3433 = vmatpush1.bf16.msra.mxu0 %v5222_v48  ;;  %3476 = vmatpush1.bf16.msra.mxu1 %v5350_v49  ;;  %v271_v43 = vld [vmem:[#allocation6 + $0x3e8] sm:$0xff]  ;;  %v5166_v48 = vcombine.low %v147_v31, %v151_v32  ;;  %v5294_v49 = vcombine.low %v275_v33, %v279_v36 }
  0xe3   :  { %3434 = vmatprep.subr.bf16.mxu0 %v5215_v50  ;;  %3477 = vmatprep.subr.bf16.mxu1 %v5343_v53  ;;  %v395_v44 = vld [vmem:[#allocation6 + $0x7c8] sm:$0xff]  ;;  %v5287_v50 = vcombine.high %v267_v42, %v271_v43 }
  0xe4   :  { %3464 = vmatprep.mubr.bf16.mxu0 %v6322_v58  ;;  %3507 = vmatprep.mubr.bf16.mxu1 %v6324_v63  ;;  %v399_v45 = vld [vmem:[#allocation6 + $0x7e8] sm:$0xff] }
  0xe5   :  { %v5415_v51 = vcombine.high %v395_v44, %v399_v45  ;;  %v259_v52 = vld [vmem:[#allocation6 + $0x388] sm:$0xff] }
  0xe6   :  { %3435 = vmatpush1.bf16.msra.mxu0 %v5214_v56  ;;  %3478 = vmatpush1.bf16.msra.mxu1 %v5342_v57  ;;  %v263_v53 = vld [vmem:[#allocation6 + $0x3a8] sm:$0xff]  ;;  %v5286_v56 = vcombine.low %v267_v42, %v271_v43  ;;  %v5414_v57 = vcombine.low %v395_v44, %v399_v45 }
  0xe7   :  { %3436 = vmatprep.subr.bf16.mxu0 %v5207_v59  ;;  %3479 = vmatprep.subr.bf16.mxu1 %v5335_v0  ;;  %v387_v54 = vld [vmem:[#allocation6 + $0x788] sm:$0xff]  ;;  %v5279_v59 = vcombine.high %v259_v52, %v263_v53 }
  0xe8   :  { %v391_v55 = vld [vmem:[#allocation6 + $0x7a8] sm:$0xff] }
  0xe9   :  { %v5407_v60 = vcombine.high %v387_v54, %v391_v55  ;;  %v251_v61 = vld [vmem:[#allocation6 + $0x348] sm:$0xff] }
  0xea   :  { %3437 = vmatpush1.bf16.msra.mxu0 %v5206_v2  ;;  %3480 = vmatpush1.bf16.msra.mxu1 %v5334_v3  ;;  %v255_v62 = vld [vmem:[#allocation6 + $0x368] sm:$0xff]  ;;  %v5278_v2 = vcombine.low %v259_v52, %v263_v53  ;;  %v5406_v3 = vcombine.low %v387_v54, %v391_v55 }
  0xeb   :  { %3438 = vmatprep.subr.bf16.mxu0 %v5199_v4  ;;  %3481 = vmatprep.subr.bf16.mxu1 %v5327_v8  ;;  %v379_v0 = vld [vmem:[#allocation6 + $0x748] sm:$0xff]  ;;  %v5271_v4 = vcombine.high %v251_v61, %v255_v62 }
  0xec   :  { %v383_v1 = vld [vmem:[#allocation6 + $0x768] sm:$0xff] }
  0xed   :  { %v5399_v5 = vcombine.high %v379_v0, %v383_v1  ;;  %v243_v6 = vld [vmem:[#allocation6 + $0x308] sm:$0xff] }
  0xee   :  { %3439 = vmatpush1.bf16.msra.mxu0 %v5198_v10  ;;  %3482 = vmatpush1.bf16.msra.mxu1 %v5326_v11  ;;  %v247_v7 = vld [vmem:[#allocation6 + $0x328] sm:$0xff]  ;;  %v5270_v10 = vcombine.low %v251_v61, %v255_v62  ;;  %v5398_v11 = vcombine.low %v379_v0, %v383_v1 }
  0xef   :  { %3440 = vmatprep.subr.bf16.mxu0 %v5191_v12  ;;  %3483 = vmatprep.subr.bf16.mxu1 %v5319_v16  ;;  %v371_v8 = vld [vmem:[#allocation6 + $0x708] sm:$0xff]  ;;  %v5263_v12 = vcombine.high %v243_v6, %v247_v7 }
  0xf0   :  { %v375_v9 = vld [vmem:[#allocation6 + $0x728] sm:$0xff] }
  0xf1   :  { %v5391_v13 = vcombine.high %v371_v8, %v375_v9  ;;  %v235_v14 = vld [vmem:[#allocation6 + $0x2c8] sm:$0xff] }
  0xf2   :  { %3441 = vmatpush1.bf16.msra.mxu0 %v5190_v18  ;;  %3484 = vmatpush1.bf16.msra.mxu1 %v5318_v19  ;;  %v239_v15 = vld [vmem:[#allocation6 + $0x2e8] sm:$0xff]  ;;  %v5262_v18 = vcombine.low %v243_v6, %v247_v7  ;;  %v5390_v19 = vcombine.low %v371_v8, %v375_v9 }
  0xf3   :  { %3442 = vmatprep.subr.bf16.mxu0 %v5183_v20  ;;  %3485 = vmatprep.subr.bf16.mxu1 %v5311_v26  ;;  %v363_v16 = vld [vmem:[#allocation6 + $0x6c8] sm:$0xff]  ;;  %v5255_v20 = vcombine.high %v235_v14, %v239_v15 }
  0xf4   :  { %v367_v17 = vld [vmem:[#allocation6 + $0x6e8] sm:$0xff] }
  0xf5   :  { %v5383_v22 = vcombine.high %v363_v16, %v367_v17  ;;  %v227_v23 = vld [vmem:[#allocation6 + $0x288] sm:$0xff] }
  0xf6   :  { %3443 = vmatpush1.bf16.msra.mxu0 %v5182_v28  ;;  %3486 = vmatpush1.bf16.msra.mxu1 %v5310_v29  ;;  %v231_v24 = vld [vmem:[#allocation6 + $0x2a8] sm:$0xff]  ;;  %v5254_v28 = vcombine.low %v235_v14, %v239_v15  ;;  %v5382_v29 = vcombine.low %v363_v16, %v367_v17 }
  0xf7   :  { %3444 = vmatprep.subr.bf16.mxu0 %v5175_v30  ;;  %3487 = vmatprep.subr.bf16.mxu1 %v5303_v35  ;;  %v355_v26 = vld [vmem:[#allocation6 + $0x688] sm:$0xff]  ;;  %v5247_v30 = vcombine.high %v227_v23, %v231_v24 }
  0xf8   :  { %v359_v27 = vld [vmem:[#allocation6 + $0x6a8] sm:$0xff] }
  0xf9   :  { %v5375_v31 = vcombine.high %v355_v26, %v359_v27  ;;  %v219_v32 = vld [vmem:[#allocation6 + $0x248] sm:$0xff] }
  0xfa   :  { %3445 = vmatpush1.bf16.msra.mxu0 %v5174_v38  ;;  %3488 = vmatpush1.bf16.msra.mxu1 %v5302_v39  ;;  %v223_v33 = vld [vmem:[#allocation6 + $0x268] sm:$0xff]  ;;  %v5246_v38 = vcombine.low %v227_v23, %v231_v24  ;;  %v5374_v39 = vcombine.low %v355_v26, %v359_v27 }
  0xfb   :  { %3446 = vmatprep.subr.bf16.mxu0 %v5167_v40  ;;  %3489 = vmatprep.subr.bf16.mxu1 %v5295_v41  ;;  %v347_v35 = vld [vmem:[#allocation6 + $0x648] sm:$0xff]  ;;  %v5239_v40 = vcombine.high %v219_v32, %v223_v33 }
  0xfc   :  { %v351_v36 = vld [vmem:[#allocation6 + $0x668] sm:$0xff] }
  0xfd   :  { %v5367_v41 = vcombine.high %v347_v35, %v351_v36  ;;  %v211_v42 = vld [vmem:[#allocation6 + $0x208] sm:$0xff] }
  0xfe   :  { %3447 = vmatpush1.bf16.msra.mxu0 %v5166_v48  ;;  %3490 = vmatpush1.bf16.msra.mxu1 %v5294_v49  ;;  %v215_v43 = vld [vmem:[#allocation6 + $0x228] sm:$0xff]  ;;  %v5238_v48 = vcombine.low %v219_v32, %v223_v33  ;;  %v5366_v49 = vcombine.low %v347_v35, %v351_v36 }
  0xff   :  { %3448 = vmatprep.subr.bf16.mxu0 %v5287_v50  ;;  %3491 = vmatprep.subr.bf16.mxu1 %v5415_v51  ;;  %v339_v44 = vld [vmem:[#allocation6 + $0x608] sm:$0xff]  ;;  %v5231_v50 = vcombine.high %v211_v42, %v215_v43 }
 0x100   :  { %v343_v45 = vld [vmem:[#allocation6 + $0x628] sm:$0xff] }
 0x101   :  { %v5359_v51 = vcombine.high %v339_v44, %v343_v45  ;;  %v459_v52 = vld [vmem:[#allocation6 + $0x9c8] sm:$0xff] }
 0x102   :  { %3449 = vmatpush2.bf16.msra.mxu0 %v5286_v56  ;;  %3492 = vmatpush2.bf16.msra.mxu1 %v5414_v57  ;;  %v463_v53 = vld [vmem:[#allocation6 + $0x9e8] sm:$0xff]  ;;  %v5230_v56 = vcombine.low %v211_v42, %v215_v43  ;;  %v5358_v57 = vcombine.low %v339_v44, %v343_v45 }
 0x103   :  { %3450 = vmatprep.subr.bf16.mxu0 %v5279_v59  ;;  %3493 = vmatprep.subr.bf16.mxu1 %v5407_v60  ;;  %v587_v54 = vld [vmem:[#allocation6 + $0xdc8] sm:$0xff]  ;;  %v5479_v59 = vcombine.high %v459_v52, %v463_v53 }
 0x104   :  { %v591_v55 = vld [vmem:[#allocation6 + $0xde8] sm:$0xff] }
 0x105   :  { %v5607_v60 = vcombine.high %v587_v54, %v591_v55  ;;  %v451_v61 = vld [vmem:[#allocation6 + $0x988] sm:$0xff] }
 0x106   :  { %3451 = vmatpush2.bf16.msra.mxu0 %v5278_v2  ;;  %3494 = vmatpush2.bf16.msra.mxu1 %v5406_v3  ;;  %v455_v62 = vld [vmem:[#allocation6 + $0x9a8] sm:$0xff]  ;;  %v5478_v2 = vcombine.low %v459_v52, %v463_v53  ;;  %v5606_v3 = vcombine.low %v587_v54, %v591_v55 }
 0x107   :  { %3452 = vmatprep.subr.bf16.mxu0 %v5271_v4  ;;  %3495 = vmatprep.subr.bf16.mxu1 %v5399_v5  ;;  %v579_v0 = vld [vmem:[#allocation6 + $0xd88] sm:$0xff]  ;;  %v5471_v4 = vcombine.high %v451_v61, %v455_v62 }
 0x108   :  { %v583_v1 = vld [vmem:[#allocation6 + $0xda8] sm:$0xff] }
 0x109   :  { %v5599_v5 = vcombine.high %v579_v0, %v583_v1  ;;  %v443_v6 = vld [vmem:[#allocation6 + $0x948] sm:$0xff] }
 0x10a   :  { %3453 = vmatpush2.bf16.msra.mxu0 %v5270_v10  ;;  %3496 = vmatpush2.bf16.msra.mxu1 %v5398_v11  ;;  %v447_v7 = vld [vmem:[#allocation6 + $0x968] sm:$0xff]  ;;  %v5470_v10 = vcombine.low %v451_v61, %v455_v62  ;;  %v5598_v11 = vcombine.low %v579_v0, %v583_v1 }
 0x10b   :  { %3454 = vmatprep.subr.bf16.mxu0 %v5263_v12  ;;  %3497 = vmatprep.subr.bf16.mxu1 %v5391_v13  ;;  %v571_v8 = vld [vmem:[#allocation6 + $0xd48] sm:$0xff]  ;;  %v5463_v12 = vcombine.high %v443_v6, %v447_v7 }
 0x10c   :  { %v575_v9 = vld [vmem:[#allocation6 + $0xd68] sm:$0xff] }
 0x10d   :  { %v5591_v13 = vcombine.high %v571_v8, %v575_v9  ;;  %v435_v14 = vld [vmem:[#allocation6 + $0x908] sm:$0xff] }
 0x10e   :  { %3455 = vmatpush2.bf16.msra.mxu0 %v5262_v18  ;;  %3498 = vmatpush2.bf16.msra.mxu1 %v5390_v19  ;;  %v439_v15 = vld [vmem:[#allocation6 + $0x928] sm:$0xff]  ;;  %v5462_v18 = vcombine.low %v443_v6, %v447_v7  ;;  %v5590_v19 = vcombine.low %v571_v8, %v575_v9 }
 0x10f   :  { %3456 = vmatprep.subr.bf16.mxu0 %v5255_v20  ;;  %3499 = vmatprep.subr.bf16.mxu1 %v5383_v22  ;;  %v563_v16 = vld [vmem:[#allocation6 + $0xd08] sm:$0xff]  ;;  %v5455_v20 = vcombine.high %v435_v14, %v439_v15 }
 0x110   :  { %v567_v17 = vld [vmem:[#allocation6 + $0xd28] sm:$0xff] }
 0x111   :  { %v5583_v22 = vcombine.high %v563_v16, %v567_v17  ;;  %v427_v23 = vld [vmem:[#allocation6 + $0x8c8] sm:$0xff] }
 0x112   :  { %3457 = vmatpush2.bf16.msra.mxu0 %v5254_v28  ;;  %3500 = vmatpush2.bf16.msra.mxu1 %v5382_v29  ;;  %v431_v24 = vld [vmem:[#allocation6 + $0x8e8] sm:$0xff]  ;;  %v5454_v28 = vcombine.low %v435_v14, %v439_v15  ;;  %v5582_v29 = vcombine.low %v563_v16, %v567_v17 }
 0x113   :  { %3458 = vmatprep.subr.bf16.mxu0 %v5247_v30  ;;  %3501 = vmatprep.subr.bf16.mxu1 %v5375_v31  ;;  %v555_v26 = vld [vmem:[#allocation6 + $0xcc8] sm:$0xff]  ;;  %v5447_v30 = vcombine.high %v427_v23, %v431_v24 }
 0x114   :  { %v559_v27 = vld [vmem:[#allocation6 + $0xce8] sm:$0xff] }
 0x115   :  { %v5575_v31 = vcombine.high %v555_v26, %v559_v27  ;;  %v419_v32 = vld [vmem:[#allocation6 + $0x888] sm:$0xff] }
 0x116   :  { %3459 = vmatpush2.bf16.msra.mxu0 %v5246_v38  ;;  %3502 = vmatpush2.bf16.msra.mxu1 %v5374_v39  ;;  %v423_v33 = vld [vmem:[#allocation6 + $0x8a8] sm:$0xff]  ;;  %v5446_v38 = vcombine.low %v427_v23, %v431_v24  ;;  %v5574_v39 = vcombine.low %v555_v26, %v559_v27 }
 0x117   :  { %3460 = vmatprep.subr.bf16.mxu0 %v5239_v40  ;;  %3503 = vmatprep.subr.bf16.mxu1 %v5367_v41  ;;  %v547_v35 = vld [vmem:[#allocation6 + $0xc88] sm:$0xff]  ;;  %v5439_v40 = vcombine.high %v419_v32, %v423_v33 }
 0x118   :  { %v551_v36 = vld [vmem:[#allocation6 + $0xca8] sm:$0xff] }
 0x119   :  { %v5567_v41 = vcombine.high %v547_v35, %v551_v36  ;;  %v411_v42 = vld [vmem:[#allocation6 + $0x848] sm:$0xff] }
 0x11a   :  { %3461 = vmatpush2.bf16.msra.mxu0 %v5238_v48  ;;  %3504 = vmatpush2.bf16.msra.mxu1 %v5366_v49  ;;  %v415_v43 = vld [vmem:[#allocation6 + $0x868] sm:$0xff]  ;;  %v5438_v48 = vcombine.low %v419_v32, %v423_v33  ;;  %v5566_v49 = vcombine.low %v547_v35, %v551_v36 }
 0x11b   :  { %3462 = vmatprep.subr.bf16.mxu0 %v5231_v50  ;;  %3505 = vmatprep.subr.bf16.mxu1 %v5359_v51  ;;  %v539_v44 = vld [vmem:[#allocation6 + $0xc48] sm:$0xff]  ;;  %v5431_v50 = vcombine.high %v411_v42, %v415_v43 }
 0x11c   :  { %v543_v45 = vld [vmem:[#allocation6 + $0xc68] sm:$0xff] }
 0x11d   :  { %v5559_v51 = vcombine.high %v539_v44, %v543_v45  ;;  %v403_v52 = vld [vmem:[#allocation6 + $0x808] sm:$0xff] }
 0x11e   :  { %3463 = vmatpush2.bf16.msra.mxu0 %v5230_v56  ;;  %3506 = vmatpush2.bf16.msra.mxu1 %v5358_v57  ;;  %v407_v53 = vld [vmem:[#allocation6 + $0x828] sm:$0xff]  ;;  %v5430_v56 = vcombine.low %v411_v42, %v415_v43  ;;  %v5558_v57 = vcombine.low %v539_v44, %v543_v45 }
 0x11f   :  { %3518 = vmatprep.subr.bf16.mxu0 %v5479_v59  ;;  %3561 = vmatprep.subr.bf16.mxu1 %v5607_v60  ;;  %v531_v54 = vld [vmem:[#allocation6 + $0xc08] sm:$0xff]  ;;  %v5423_v59 = vcombine.high %v403_v52, %v407_v53 }
 0x120   :  { %v535_v55 = vld [vmem:[#allocation6 + $0xc28] sm:$0xff] }
 0x121   :  { %3465 = vmatmul.mubr.bf16.vlgmr.msra.gmra.mxu0 %v6328_v21  ;;  %3508 = vmatmul.mubr.bf16.vlgmr.msra.gmra.mxu1 %v6330_v25  ;;  %v5551_v60 = vcombine.high %v531_v54, %v535_v55  ;;  %v523_v61 = vld [vmem:[#allocation6 + $0xbc8] sm:$0xff] }
 0x122   :  { %3519 = vmatpush1.bf16.msra.mxu0 %v5478_v2  ;;  %3562 = vmatpush1.bf16.msra.mxu1 %v5606_v3  ;;  %v527_v62 = vld [vmem:[#allocation6 + $0xbe8] sm:$0xff]  ;;  %v5422_v2 = vcombine.low %v403_v52, %v407_v53  ;;  %v5550_v3 = vcombine.low %v531_v54, %v535_v55 }
 0x123   :  { %3520 = vmatprep.subr.bf16.mxu0 %v5471_v4  ;;  %3563 = vmatprep.subr.bf16.mxu1 %v5599_v5  ;;  %v651_v0 = vld [vmem:[#allocation6 + $0xfc8] sm:$0xff]  ;;  %v5543_v4 = vcombine.high %v523_v61, %v527_v62 }
 0x124   :  { %3550 = vmatprep.mubr.bf16.mxu0 %v6332_v34  ;;  %3593 = vmatprep.mubr.bf16.mxu1 %v6335_v37  ;;  %v655_v1 = vld [vmem:[#allocation6 + $0xfe8] sm:$0xff] }
 0x125   :  { %v5671_v5 = vcombine.high %v651_v0, %v655_v1  ;;  %v515_v6 = vld [vmem:[#allocation6 + $0xb88] sm:$0xff] }
 0x126   :  { %3521 = vmatpush1.bf16.msra.mxu0 %v5470_v10  ;;  %3564 = vmatpush1.bf16.msra.mxu1 %v5598_v11  ;;  %v519_v7 = vld [vmem:[#allocation6 + $0xba8] sm:$0xff]  ;;  %v5542_v10 = vcombine.low %v523_v61, %v527_v62  ;;  %v5670_v11 = vcombine.low %v651_v0, %v655_v1 }
 0x127   :  { %3522 = vmatprep.subr.bf16.mxu0 %v5463_v12  ;;  %3565 = vmatprep.subr.bf16.mxu1 %v5591_v13  ;;  %v643_v8 = vld [vmem:[#allocation6 + $0xf88] sm:$0xff]  ;;  %v5535_v12 = vcombine.high %v515_v6, %v519_v7 }
 0x128   :  { %v647_v9 = vld [vmem:[#allocation6 + $0xfa8] sm:$0xff] }
 0x129   :  { %v5663_v13 = vcombine.high %v643_v8, %v647_v9  ;;  %v507_v14 = vld [vmem:[#allocation6 + $0xb48] sm:$0xff] }
 0x12a   :  { %3523 = vmatpush1.bf16.msra.mxu0 %v5462_v18  ;;  %3566 = vmatpush1.bf16.msra.mxu1 %v5590_v19  ;;  %v511_v15 = vld [vmem:[#allocation6 + $0xb68] sm:$0xff]  ;;  %v5534_v18 = vcombine.low %v515_v6, %v519_v7  ;;  %v5662_v19 = vcombine.low %v643_v8, %v647_v9  ;;  %v204_v8 = vld [vmem:[#allocation6 + $0x1d0] sm:$0xff] }
 0x12b   :  { %3524 = vmatprep.subr.bf16.mxu0 %v5455_v20  ;;  %3567 = vmatprep.subr.bf16.mxu1 %v5583_v22  ;;  %v635_v16 = vld [vmem:[#allocation6 + $0xf48] sm:$0xff]  ;;  %v5527_v20 = vcombine.high %v507_v14, %v511_v15  ;;  %v208_v9 = vld [vmem:[#allocation6 + $0x1f0] sm:$0xff] }
 0x12c   :  { %v639_v17 = vld [vmem:[#allocation6 + $0xf68] sm:$0xff] }
 0x12d   :  { %v5655_v22 = vcombine.high %v635_v16, %v639_v17  ;;  %v499_v23 = vld [vmem:[#allocation6 + $0xb08] sm:$0xff] }
 0x12e   :  { %3525 = vmatpush1.bf16.msra.mxu0 %v5454_v28  ;;  %3568 = vmatpush1.bf16.msra.mxu1 %v5582_v29  ;;  %v503_v24 = vld [vmem:[#allocation6 + $0xb28] sm:$0xff]  ;;  %v5526_v28 = vcombine.low %v507_v14, %v511_v15  ;;  %v5654_v29 = vcombine.low %v635_v16, %v639_v17  ;;  %v6356_v15 = vld [vmem:[#allocation8] sm:$0xff]  ;;  %v5225_v16 = vcombine.high %v204_v8, %v208_v9 }
 0x12f   :  { %3526 = vmatprep.subr.bf16.mxu0 %v5447_v30  ;;  %3569 = vmatprep.subr.bf16.mxu1 %v5575_v31  ;;  %v627_v26 = vld [vmem:[#allocation6 + $0xf08] sm:$0xff]  ;;  %v5519_v30 = vcombine.high %v499_v23, %v503_v24 }
 0x130   :  { %v631_v27 = vld [vmem:[#allocation6 + $0xf28] sm:$0xff] }
 0x131   :  { %v5647_v31 = vcombine.high %v627_v26, %v631_v27  ;;  %v491_v32 = vld [vmem:[#allocation6 + $0xac8] sm:$0xff] }
 0x132   :  { %3527 = vmatpush1.bf16.msra.mxu0 %v5446_v38  ;;  %3570 = vmatpush1.bf16.msra.mxu1 %v5574_v39  ;;  %v495_v33 = vld [vmem:[#allocation6 + $0xae8] sm:$0xff]  ;;  %v5518_v38 = vcombine.low %v499_v23, %v503_v24  ;;  %v5646_v39 = vcombine.low %v627_v26, %v631_v27  ;;  %v5224_v24 = vcombine.low %v204_v8, %v208_v9  ;;  %v168_v8 = vld [vmem:[#allocation6 + $0xb0] sm:$0xff] }
 0x133   :  { %3528 = vmatprep.subr.bf16.mxu0 %v5439_v40  ;;  %3571 = vmatprep.subr.bf16.mxu1 %v5567_v41  ;;  %v619_v35 = vld [vmem:[#allocation6 + $0xec8] sm:$0xff]  ;;  %v5511_v40 = vcombine.high %v491_v32, %v495_v33  ;;  %v292_v9 = vld [vmem:[#allocation6 + $0x490] sm:$0xff] }
 0x134   :  { %v623_v36 = vld [vmem:[#allocation6 + $0xee8] sm:$0xff] }
 0x135   :  { %v5639_v41 = vcombine.high %v619_v35, %v623_v36  ;;  %v483_v42 = vld [vmem:[#allocation6 + $0xa88] sm:$0xff] }
 0x136   :  { %3529 = vmatpush1.bf16.msra.mxu0 %v5438_v48  ;;  %3572 = vmatpush1.bf16.msra.mxu1 %v5566_v49  ;;  %v487_v43 = vld [vmem:[#allocation6 + $0xaa8] sm:$0xff]  ;;  %v5510_v48 = vcombine.low %v491_v32, %v495_v33  ;;  %v5638_v49 = vcombine.low %v619_v35, %v623_v36  ;;  %v316_v32 = vld [vmem:[#allocation6 + $0x550] sm:$0xff] }
 0x137   :  { %3530 = vmatprep.subr.bf16.mxu0 %v5431_v50  ;;  %3573 = vmatprep.subr.bf16.mxu1 %v5559_v51  ;;  %v611_v44 = vld [vmem:[#allocation6 + $0xe88] sm:$0xff]  ;;  %v5503_v50 = vcombine.high %v483_v42, %v487_v43  ;;  %v320_v33 = vld [vmem:[#allocation6 + $0x570] sm:$0xff] }
 0x138   :  { %v615_v45 = vld [vmem:[#allocation6 + $0xea8] sm:$0xff] }
 0x139   :  { %v5631_v51 = vcombine.high %v611_v44, %v615_v45  ;;  %v475_v52 = vld [vmem:[#allocation6 + $0xa48] sm:$0xff] }
 0x13a   :  { %3531 = vmatpush1.bf16.msra.mxu0 %v5430_v56  ;;  %3574 = vmatpush1.bf16.msra.mxu1 %v5558_v57  ;;  %v479_v53 = vld [vmem:[#allocation6 + $0xa68] sm:$0xff]  ;;  %v5502_v56 = vcombine.low %v483_v42, %v487_v43  ;;  %v660_v57 = vlaneseq }
 0x13b   :  { %3532 = vmatprep.subr.bf16.mxu0 %v5423_v59  ;;  %3575 = vmatprep.subr.bf16.mxu1 %v5551_v60  ;;  %v603_v54 = vld [vmem:[#allocation6 + $0xe48] sm:$0xff]  ;;  %v5630_v59 = vcombine.low %v611_v44, %v615_v45  ;;  %v5495_v60 = vcombine.high %v475_v52, %v479_v53  ;;  %v5337_v44 = vcombine.high %v316_v32, %v320_v33  ;;  %v180_v45 = vld [vmem:[#allocation6 + $0x110] sm:$0xff] }
 0x13c   :  { %v607_v55 = vld [vmem:[#allocation6 + $0xe68] sm:$0xff] }
 0x13d   :  { %v5623_v61 = vcombine.high %v603_v54, %v607_v55  ;;  %v467_v62 = vld [vmem:[#allocation6 + $0xa08] sm:$0xff] }
 0x13e   :  { %3533 = vmatpush1.bf16.msra.mxu0 %v5422_v2  ;;  %3576 = vmatpush1.bf16.msra.mxu1 %v5550_v3  ;;  %v471_v0 = vld [vmem:[#allocation6 + $0xa28] sm:$0xff]  ;;  %v5494_v3 = vcombine.low %v475_v52, %v479_v53 }
 0x13f   :  { %3534 = vmatprep.subr.bf16.mxu0 %v5543_v4  ;;  %3577 = vmatprep.subr.bf16.mxu1 %v5671_v5  ;;  %v595_v1 = vld [vmem:[#allocation6 + $0xe08] sm:$0xff]  ;;  %v6353_v4 = vshrl.u32 %v660_v57, 7  ;;  %v5622_v5 = vcombine.low %v603_v54, %v607_v55  ;;  %v5487_v6 = vcombine.high %v467_v62, %v471_v0  ;;  %v5336_v55 = vcombine.low %v316_v32, %v320_v33 }
 0x140   :  { %v599_v2 = vld [vmem:[#allocation6 + $0xe28] sm:$0xff] }
 0x141   :  { %v5615_v7 = vcombine.high %v595_v1, %v599_v2  ;;  %v5614_v14 = vcombine.low %v595_v1, %v599_v2  ;;  %v304_v1 = vld [vmem:[#allocation6 + $0x4f0] sm:$0xff] }
 0x142   :  { %3535 = vmatpush2.bf16.msra.mxu0 %v5542_v10  ;;  %3578 = vmatpush2.bf16.msra.mxu1 %v5670_v11  ;;  %v332_v10 = vld [vmem:[#allocation6 + $0x5d0] sm:$0xff] }
 0x143   :  { %3536 = vmatprep.subr.bf16.mxu0 %v5535_v12  ;;  %3579 = vmatprep.subr.bf16.mxu1 %v5663_v13  ;;  %v336_v11 = vld [vmem:[#allocation6 + $0x5f0] sm:$0xff]  ;;  %v5486_v12 = vcombine.low %v467_v62, %v471_v0  ;;  %v662_v13 = vsub.s32 0, %v6353_v4 }
 0x144   :  { %v5353_v17 = vcombine.high %v332_v10, %v336_v11  ;;  %v5352_v26 = vcombine.low %v332_v10, %v336_v11  ;;  %v176_v62 = vld [vmem:[#allocation6 + $0xf0] sm:$0xff] }
 0x145   :  { %v663_v23 = vrot.slane %v6356_v15, %v662_v13  ;;  %v300_v0 = vld [vmem:[#allocation6 + $0x4d0] sm:$0xff] }
 0x146   :  { %3537 = vmatpush2.bf16.msra.mxu0 %v5534_v18  ;;  %3580 = vmatpush2.bf16.msra.mxu1 %v5662_v19  ;;  %v196_v18 = vld [vmem:[#allocation6 + $0x190] sm:$0xff] }
 0x147   :  { %3538 = vmatprep.subr.bf16.mxu0 %v5527_v20  ;;  %3581 = vmatprep.subr.bf16.mxu1 %v5655_v22  ;;  %v200_v19 = vld [vmem:[#allocation6 + $0x1b0] sm:$0xff] }
 0x148   :  { %v324_v20 = vld [vmem:[#allocation6 + $0x590] sm:$0xff]  ;;  %v5217_v27 = vcombine.high %v196_v18, %v200_v19 }
 0x149   :  { %v328_v22 = vld [vmem:[#allocation6 + $0x5b0] sm:$0xff] }
 0x14a   :  { %3539 = vmatpush2.bf16.msra.mxu0 %v5526_v28  ;;  %3582 = vmatpush2.bf16.msra.mxu1 %v5654_v29  ;;  %v5345_v28 = vcombine.high %v324_v20, %v328_v22  ;;  %v188_v29 = vld [vmem:[#allocation6 + $0x150] sm:$0xff] }
 0x14b   :  { %3540 = vmatprep.subr.bf16.mxu0 %v5519_v30  ;;  %3583 = vmatprep.subr.bf16.mxu1 %v5647_v31  ;;  %v192_v30 = vld [vmem:[#allocation6 + $0x170] sm:$0xff] }
 0x14c   :  { %v5208_v53 = vcombine.low %v188_v29, %v192_v30  ;;  %v296_v10 = vld [vmem:[#allocation6 + $0x4b0] sm:$0xff] }
 0x14e   :  { %3541 = vmatpush2.bf16.msra.mxu0 %v5518_v38  ;;  %3584 = vmatpush2.bf16.msra.mxu1 %v5646_v39  ;;  %v5216_v38 = vcombine.low %v196_v18, %v200_v19  ;;  %v160_v18 = vld [vmem:[#allocation6 + $0x70] sm:$0xff] }
 0x14f   :  { %3542 = vmatprep.subr.bf16.mxu0 %v5511_v40  ;;  %3585 = vmatprep.subr.bf16.mxu1 %v5639_v41  ;;  %v5344_v40 = vcombine.low %v324_v20, %v328_v22  ;;  %v5209_v41 = vcombine.high %v188_v29, %v192_v30  ;;  %v284_v19 = vld [vmem:[#allocation6 + $0x450] sm:$0xff] }
 0x150   :  { %v288_v20 = vld [vmem:[#allocation6 + $0x470] sm:$0xff] }
 0x151   :  { %v276_v29 = vld [vmem:[#allocation6 + $0x410] sm:$0xff]  ;;  %v5304_v32 = vcombine.low %v284_v19, %v288_v20 }
 0x152   :  { %3543 = vmatpush2.bf16.msra.mxu0 %v5510_v48  ;;  %3586 = vmatpush2.bf16.msra.mxu1 %v5638_v49  ;;  %v184_v48 = vld [vmem:[#allocation6 + $0x130] sm:$0xff] }
 0x153   :  { %3544 = vmatprep.subr.bf16.mxu0 %v5503_v50  ;;  %3587 = vmatprep.subr.bf16.mxu1 %v5631_v51  ;;  %v308_v50 = vld [vmem:[#allocation6 + $0x510] sm:$0xff]  ;;  %v5200_v2 = vcombine.low %v180_v45, %v184_v48 }
 0x154   :  { %v312_v51 = vld [vmem:[#allocation6 + $0x530] sm:$0xff] }
 0x155   :  { %v280_v30 = vld [vmem:[#allocation6 + $0x430] sm:$0xff] }
 0x156   :  { %3545 = vmatpush2.bf16.msra.mxu0 %v5502_v56  ;;  %3588 = vmatpush2.bf16.msra.mxu1 %v5630_v59  ;;  %v5201_v56 = vcombine.high %v180_v45, %v184_v48  ;;  %v5296_v45 = vcombine.low %v276_v29, %v280_v30 }
 0x157   :  { %3546 = vmatprep.subr.bf16.mxu0 %v5495_v60  ;;  %3589 = vmatprep.subr.bf16.mxu1 %v5623_v61  ;;  %v5329_v60 = vcombine.high %v308_v50, %v312_v51  ;;  %v172_v61 = vld [vmem:[#allocation6 + $0xd0] sm:$0xff] }
 0x158   :  { %v5192_v11 = vcombine.low %v172_v61, %v176_v62 }
 0x15a   :  { %3547 = vmatpush2.bf16.msra.mxu0 %v5494_v3  ;;  %3590 = vmatpush2.bf16.msra.mxu1 %v5622_v5  ;;  %v5328_v3 = vcombine.low %v308_v50, %v312_v51  ;;  %v5193_v5 = vcombine.high %v172_v61, %v176_v62  ;;  %v260_v50 = vld [vmem:[#allocation6 + $0x390] sm:$0xff] }
 0x15b   :  { %3548 = vmatprep.subr.bf16.mxu0 %v5487_v6  ;;  %3591 = vmatprep.subr.bf16.mxu1 %v5615_v7  ;;  %v5321_v6 = vcombine.high %v300_v0, %v304_v1  ;;  %v164_v7 = vld [vmem:[#allocation6 + $0x90] sm:$0xff] }
 0x15c   :  { %v5184_v22 = vcombine.low %v164_v7, %v168_v8  ;;  %v264_v51 = vld [vmem:[#allocation6 + $0x3b0] sm:$0xff] }
 0x15d   :  { %v252_v61 = vld [vmem:[#allocation6 + $0x350] sm:$0xff] }
 0x15e   :  { %3549 = vmatpush2.bf16.msra.mxu0 %v5486_v12  ;;  %3592 = vmatpush2.bf16.msra.mxu1 %v5614_v14  ;;  %v5320_v12 = vcombine.low %v300_v0, %v304_v1  ;;  %v5185_v14 = vcombine.high %v164_v7, %v168_v8  ;;  %v256_v62 = vld [vmem:[#allocation6 + $0x370] sm:$0xff] }
 0x15f   :  { %3604 = vmatprep.subr.bf16.mxu0 %v5225_v16  ;;  %3647 = vmatprep.subr.bf16.mxu1 %v5353_v17  ;;  %v3337_v36 = vpop.f32.mrf.mxu1  ;;  %v5313_v16 = vcombine.high %v292_v9, %v296_v10  ;;  %v156_v17 = vld [vmem:[#allocation6 + $0x50] sm:$0xff] }
 0x160   :  { %v380_v0 = vld [vmem:[#allocation6 + $0x750] sm:$0xff] }
 0x161   :  { %v3294_v31 = vpop.f32.mrf.mxu0  ;;  %3551 = vmatmul.mubr.bf16.vlgmr.msra.gmra.mxu0 %v6340_v46  ;;  %3594 = vmatmul.mubr.bf16.vlgmr.msra.gmra.mxu1 %v6342_v47  ;;  %v6367_v43 = vpop.f32.mrf.mxu1  ;;  %v384_v1 = vld [vmem:[#allocation6 + $0x770] sm:$0xff] }
 0x162   :  { %v3295_v35 = vadd.f32 %v3294_v31, %v663_v23  ;;  %3605 = vmatpush1.bf16.msra.mxu0 %v5224_v24  ;;  %3648 = vmatpush1.bf16.msra.mxu1 %v5352_v26  ;;  %v5177_v24 = vcombine.high %v156_v17, %v160_v18  ;;  %v5305_v26 = vcombine.high %v284_v19, %v288_v20  ;;  %v244_v7 = vld [vmem:[#allocation6 + $0x310] sm:$0xff] }
 0x163   :  { %v6363_v39 = vpop.f32.mrf.mxu0  ;;  %3606 = vmatprep.subr.bf16.mxu0 %v5217_v27  ;;  %3649 = vmatprep.subr.bf16.mxu1 %v5345_v28  ;;  %v3341_v54 = vpop.f32.mrf.mxu1  ;;  %v148_v27 = vld [vmem:[#allocation6 + $0x10] sm:$0xff]  ;;  %v5176_v31 = vcombine.low %v156_v17, %v160_v18 }
 0x164   :  { %v6365_v42 = vadd.f32 %v3337_v36, %v3295_v35  ;;  %3636 = vmatprep.mubr.bf16.mxu0 %v6322_v58  ;;  %3679 = vmatprep.mubr.bf16.mxu1 %v6324_v63  ;;  %v152_v28 = vld [vmem:[#allocation6 + $0x30] sm:$0xff]  ;;  %v5297_v35 = vcombine.high %v276_v29, %v280_v30 }
 0x165   :  { %v3298_v49 = vpop.f32.mrf.mxu0  ;;  %v5169_v33 = vcombine.high %v148_v27, %v152_v28  ;;  %v268_v36 = vld [vmem:[#allocation6 + $0x3d0] sm:$0xff] }
 0x166   :  { %v3299_v52 = vadd.f32 %v3298_v49, %v663_v23  ;;  %3607 = vmatpush1.bf16.msra.mxu0 %v5216_v38  ;;  %3650 = vmatpush1.bf16.msra.mxu1 %v5344_v40  ;;  %v5312_v23 = vcombine.low %v292_v9, %v296_v10  ;;  %v272_v38 = vld [vmem:[#allocation6 + $0x3f0] sm:$0xff] }
 0x167   :  { %3608 = vmatprep.subr.bf16.mxu0 %v5209_v41  ;;  %3651 = vmatprep.subr.bf16.mxu1 %v5337_v44  ;;  %v396_v40 = vld [vmem:[#allocation6 + $0x7d0] sm:$0xff]  ;;  %v5168_v44 = vcombine.low %v148_v27, %v152_v28  ;;  %v5289_v48 = vcombine.high %v268_v36, %v272_v38 }
 0x168   :  { %v6371_v59 = vadd.f32 %v3341_v54, %v3299_v52  ;;  %v400_v41 = vld [vmem:[#allocation6 + $0x7f0] sm:$0xff]  ;;  %v5288_v54 = vcombine.low %v268_v36, %v272_v38 }
 0x169   :  { %v5417_v49 = vcombine.high %v396_v40, %v400_v41  ;;  %v388_v52 = vld [vmem:[#allocation6 + $0x790] sm:$0xff] }
 0x16a   :  { %3609 = vmatpush1.bf16.msra.mxu0 %v5208_v53  ;;  %3652 = vmatpush1.bf16.msra.mxu1 %v5336_v55  ;;  %v392_v53 = vld [vmem:[#allocation6 + $0x7b0] sm:$0xff]  ;;  %v5416_v55 = vcombine.low %v396_v40, %v400_v41 }
 0x16b   :  { %3610 = vmatprep.subr.bf16.mxu0 %v5201_v56  ;;  %3653 = vmatprep.subr.bf16.mxu1 %v5329_v60  ;;  %v5281_v56 = vcombine.high %v260_v50, %v264_v51  ;;  %v5409_v60 = vcombine.high %v388_v52, %v392_v53  ;;  %v248_v8 = vld [vmem:[#allocation6 + $0x330] sm:$0xff] }
 0x16c   :  { %v372_v9 = vld [vmem:[#allocation6 + $0x710] sm:$0xff] }
 0x16d   :  { %v376_v10 = vld [vmem:[#allocation6 + $0x730] sm:$0xff] }
 0x16e   :  { %3611 = vmatpush1.bf16.msra.mxu0 %v5200_v2  ;;  %3654 = vmatpush1.bf16.msra.mxu1 %v5328_v3  ;;  %v5280_v2 = vcombine.low %v260_v50, %v264_v51  ;;  %v5408_v3 = vcombine.low %v388_v52, %v392_v53  ;;  %v236_v17 = vld [vmem:[#allocation6 + $0x2d0] sm:$0xff] }
 0x16f   :  { %3612 = vmatprep.subr.bf16.mxu0 %v5193_v5  ;;  %3655 = vmatprep.subr.bf16.mxu1 %v5321_v6  ;;  %v5273_v5 = vcombine.high %v252_v61, %v256_v62  ;;  %v5401_v6 = vcombine.high %v380_v0, %v384_v1  ;;  %v240_v18 = vld [vmem:[#allocation6 + $0x2f0] sm:$0xff] }
 0x170   :  { %v364_v19 = vld [vmem:[#allocation6 + $0x6d0] sm:$0xff] }
 0x171   :  { %v368_v20 = vld [vmem:[#allocation6 + $0x6f0] sm:$0xff] }
 0x172   :  { %3613 = vmatpush1.bf16.msra.mxu0 %v5192_v11  ;;  %3656 = vmatpush1.bf16.msra.mxu1 %v5320_v12  ;;  %v5272_v11 = vcombine.low %v252_v61, %v256_v62  ;;  %v5400_v12 = vcombine.low %v380_v0, %v384_v1  ;;  %v228_v27 = vld [vmem:[#allocation6 + $0x290] sm:$0xff] }
 0x173   :  { %3614 = vmatprep.subr.bf16.mxu0 %v5185_v14  ;;  %3657 = vmatprep.subr.bf16.mxu1 %v5313_v16  ;;  %v5265_v14 = vcombine.high %v244_v7, %v248_v8  ;;  %v5393_v16 = vcombine.high %v372_v9, %v376_v10  ;;  %v232_v28 = vld [vmem:[#allocation6 + $0x2b0] sm:$0xff] }
 0x174   :  { %v356_v29 = vld [vmem:[#allocation6 + $0x690] sm:$0xff] }
 0x175   :  { %v360_v30 = vld [vmem:[#allocation6 + $0x6b0] sm:$0xff] }
 0x176   :  { %3615 = vmatpush1.bf16.msra.mxu0 %v5184_v22  ;;  %3658 = vmatpush1.bf16.msra.mxu1 %v5312_v23  ;;  %v5264_v22 = vcombine.low %v244_v7, %v248_v8  ;;  %v5392_v23 = vcombine.low %v372_v9, %v376_v10  ;;  %v220_v36 = vld [vmem:[#allocation6 + $0x250] sm:$0xff] }
 0x177   :  { %3616 = vmatprep.subr.bf16.mxu0 %v5177_v24  ;;  %3659 = vmatprep.subr.bf16.mxu1 %v5305_v26  ;;  %v5257_v24 = vcombine.high %v236_v17, %v240_v18  ;;  %v5385_v26 = vcombine.high %v364_v19, %v368_v20  ;;  %v224_v38 = vld [vmem:[#allocation6 + $0x270] sm:$0xff] }
 0x178   :  { %v348_v40 = vld [vmem:[#allocation6 + $0x650] sm:$0xff] }
 0x179   :  { %v352_v41 = vld [vmem:[#allocation6 + $0x670] sm:$0xff] }
 0x17a   :  { %3617 = vmatpush1.bf16.msra.mxu0 %v5176_v31  ;;  %3660 = vmatpush1.bf16.msra.mxu1 %v5304_v32  ;;  %v5256_v31 = vcombine.low %v236_v17, %v240_v18  ;;  %v5384_v32 = vcombine.low %v364_v19, %v368_v20  ;;  %v212_v50 = vld [vmem:[#allocation6 + $0x210] sm:$0xff]  ;;  %v6375_v17 = vpop.f32.mrf.mxu1 }
 0x17b   :  { %3618 = vmatprep.subr.bf16.mxu0 %v5169_v33  ;;  %3661 = vmatprep.subr.bf16.mxu1 %v5297_v35  ;;  %v5249_v33 = vcombine.high %v228_v27, %v232_v28  ;;  %v5377_v35 = vcombine.high %v356_v29, %v360_v30  ;;  %v216_v51 = vld [vmem:[#allocation6 + $0x230] sm:$0xff] }
 0x17c   :  { %v340_v52 = vld [vmem:[#allocation6 + $0x610] sm:$0xff] }
 0x17d   :  { %v344_v53 = vld [vmem:[#allocation6 + $0x630] sm:$0xff] }
 0x17e   :  { %3619 = vmatpush1.bf16.msra.mxu0 %v5168_v44  ;;  %3662 = vmatpush1.bf16.msra.mxu1 %v5296_v45  ;;  %v5248_v44 = vcombine.low %v228_v27, %v232_v28  ;;  %v5376_v45 = vcombine.low %v356_v29, %v360_v30  ;;  %v460_v61 = vld [vmem:[#allocation6 + $0x9d0] sm:$0xff] }
 0x17f   :  { %3620 = vmatprep.subr.bf16.mxu0 %v5289_v48  ;;  %3663 = vmatprep.subr.bf16.mxu1 %v5417_v49  ;;  %v5241_v48 = vcombine.high %v220_v36, %v224_v38  ;;  %v5369_v49 = vcombine.high %v348_v40, %v352_v41  ;;  %v464_v62 = vld [vmem:[#allocation6 + $0x9f0] sm:$0xff] }
 0x180   :  { %v588_v0 = vld [vmem:[#allocation6 + $0xdd0] sm:$0xff] }
 0x181   :  { %v592_v1 = vld [vmem:[#allocation6 + $0xdf0] sm:$0xff] }
 0x182   :  { %3621 = vmatpush2.bf16.msra.mxu0 %v5288_v54  ;;  %3664 = vmatpush2.bf16.msra.mxu1 %v5416_v55  ;;  %v5240_v54 = vcombine.low %v220_v36, %v224_v38  ;;  %v5368_v55 = vcombine.low %v348_v40, %v352_v41  ;;  %v452_v7 = vld [vmem:[#allocation6 + $0x990] sm:$0xff] }
 0x183   :  { %3622 = vmatprep.subr.bf16.mxu0 %v5281_v56  ;;  %3665 = vmatprep.subr.bf16.mxu1 %v5409_v60  ;;  %v5233_v56 = vcombine.high %v212_v50, %v216_v51  ;;  %v5361_v60 = vcombine.high %v340_v52, %v344_v53  ;;  %v456_v8 = vld [vmem:[#allocation6 + $0x9b0] sm:$0xff] }
 0x184   :  { %v580_v9 = vld [vmem:[#allocation6 + $0xd90] sm:$0xff]  ;;  %v5472_v28 = vcombine.low %v452_v7, %v456_v8 }
 0x185   :  { %v584_v10 = vld [vmem:[#allocation6 + $0xdb0] sm:$0xff] }
 0x186   :  { %3623 = vmatpush2.bf16.msra.mxu0 %v5280_v2  ;;  %3666 = vmatpush2.bf16.msra.mxu1 %v5408_v3  ;;  %v5232_v2 = vcombine.low %v212_v50, %v216_v51  ;;  %v5360_v3 = vcombine.low %v340_v52, %v344_v53  ;;  %v5601_v18 = vcombine.high %v580_v9, %v584_v10  ;;  %v444_v19 = vld [vmem:[#allocation6 + $0x950] sm:$0xff] }
 0x187   :  { %3624 = vmatprep.subr.bf16.mxu0 %v5273_v5  ;;  %3667 = vmatprep.subr.bf16.mxu1 %v5401_v6  ;;  %v5481_v5 = vcombine.high %v460_v61, %v464_v62  ;;  %v5609_v6 = vcombine.high %v588_v0, %v592_v1  ;;  %v448_v20 = vld [vmem:[#allocation6 + $0x970] sm:$0xff]  ;;  %v5600_v30 = vcombine.low %v580_v9, %v584_v10 }
 0x188   :  { %v436_v36 = vld [vmem:[#allocation6 + $0x910] sm:$0xff] }
 0x189   :  { %v440_v38 = vld [vmem:[#allocation6 + $0x930] sm:$0xff] }
 0x18a   :  { %3625 = vmatpush2.bf16.msra.mxu0 %v5272_v11  ;;  %3668 = vmatpush2.bf16.msra.mxu1 %v5400_v12  ;;  %v5480_v11 = vcombine.low %v460_v61, %v464_v62  ;;  %v6373_v12 = vpop.f32.mrf.mxu0  ;;  %v564_v40 = vld [vmem:[#allocation6 + $0xd10] sm:$0xff]  ;;  %v5457_v50 = vcombine.high %v436_v36, %v440_v38  ;;  %v5456_v62 = vcombine.low %v436_v36, %v440_v38 }
 0x18b   :  { %3626 = vmatprep.subr.bf16.mxu0 %v5265_v14  ;;  %3669 = vmatprep.subr.bf16.mxu1 %v5393_v16  ;;  %v5608_v14 = vcombine.low %v588_v0, %v592_v1  ;;  %v5473_v16 = vcombine.high %v452_v7, %v456_v8  ;;  %v568_v41 = vld [vmem:[#allocation6 + $0xd30] sm:$0xff] }
 0x18c   :  { %v5585_v52 = vcombine.high %v564_v40, %v568_v41  ;;  %v428_v53 = vld [vmem:[#allocation6 + $0x8d0] sm:$0xff] }
 0x18d   :  { %v552_v7 = vld [vmem:[#allocation6 + $0xcb0] sm:$0xff] }
 0x18e   :  { %3627 = vmatpush2.bf16.msra.mxu0 %v5264_v22  ;;  %3670 = vmatpush2.bf16.msra.mxu1 %v5392_v23  ;;  %v572_v23 = vld [vmem:[#allocation6 + $0xd50] sm:$0xff] }
 0x18f   :  { %3628 = vmatprep.subr.bf16.mxu0 %v5257_v24  ;;  %3671 = vmatprep.subr.bf16.mxu1 %v5385_v26  ;;  %v576_v24 = vld [vmem:[#allocation6 + $0xd70] sm:$0xff] }
 0x190   :  { %v524_v38 = vld [vmem:[#allocation6 + $0xbd0] sm:$0xff] }
 0x192   :  { %3629 = vmatpush2.bf16.msra.mxu0 %v5256_v31  ;;  %3672 = vmatpush2.bf16.msra.mxu1 %v5384_v32  ;;  %v5465_v31 = vcombine.high %v444_v19, %v448_v20 }
 0x193   :  { %3630 = vmatprep.subr.bf16.mxu0 %v5249_v33  ;;  %3673 = vmatprep.subr.bf16.mxu1 %v5377_v35  ;;  %v5593_v35 = vcombine.high %v572_v23, %v576_v24 }
 0x196   :  { %3631 = vmatpush2.bf16.msra.mxu0 %v5248_v44  ;;  %3674 = vmatpush2.bf16.msra.mxu1 %v5376_v45  ;;  %v5464_v45 = vcombine.low %v444_v19, %v448_v20  ;;  %v544_v19 = vld [vmem:[#allocation6 + $0xc70] sm:$0xff] }
 0x197   :  { %3632 = vmatprep.subr.bf16.mxu0 %v5241_v48  ;;  %3675 = vmatprep.subr.bf16.mxu1 %v5369_v49  ;;  %v5592_v49 = vcombine.low %v572_v23, %v576_v24 }
 0x19a   :  { %3633 = vmatpush2.bf16.msra.mxu0 %v5240_v54  ;;  %3676 = vmatpush2.bf16.msra.mxu1 %v5368_v55  ;;  %v432_v54 = vld [vmem:[#allocation6 + $0x8f0] sm:$0xff] }
 0x19b   :  { %3634 = vmatprep.subr.bf16.mxu0 %v5233_v56  ;;  %3677 = vmatprep.subr.bf16.mxu1 %v5361_v60  ;;  %v556_v55 = vld [vmem:[#allocation6 + $0xcd0] sm:$0xff]  ;;  %v5449_v0 = vcombine.high %v428_v53, %v432_v54  ;;  %v5448_v8 = vcombine.low %v428_v53, %v432_v54 }
 0x19c   :  { %v560_v56 = vld [vmem:[#allocation6 + $0xcf0] sm:$0xff] }
 0x19d   :  { %v5576_v9 = vcombine.low %v556_v55, %v560_v56  ;;  %v648_v53 = vld [vmem:[#allocation6 + $0xfb0] sm:$0xff] }
 0x19e   :  { %3635 = vmatpush2.bf16.msra.mxu0 %v5232_v2  ;;  %3678 = vmatpush2.bf16.msra.mxu1 %v5360_v3  ;;  %v5577_v2 = vcombine.high %v556_v55, %v560_v56  ;;  %v420_v3 = vld [vmem:[#allocation6 + $0x890] sm:$0xff] }
 0x19f   :  { %3690 = vmatprep.subr.bf16.mxu0 %v5481_v5  ;;  %3733 = vmatprep.subr.bf16.mxu1 %v5609_v6  ;;  %v424_v5 = vld [vmem:[#allocation6 + $0x8b0] sm:$0xff] }
 0x1a0   :  { %v548_v6 = vld [vmem:[#allocation6 + $0xc90] sm:$0xff]  ;;  %v5441_v10 = vcombine.high %v420_v3, %v424_v5  ;;  %v5440_v20 = vcombine.low %v420_v3, %v424_v5 }
 0x1a1   :  { %v3380_v22 = vpop.f32.mrf.mxu0  ;;  %3637 = vmatmul.mubr.bf16.vlgmr.msra.gmra.mxu0 %v6328_v21  ;;  %v3423_v27 = vpop.f32.mrf.mxu1  ;;  %3680 = vmatmul.mubr.bf16.vlgmr.msra.gmra.mxu1 %v6330_v25 }
 0x1a2   :  { %v3381_v26 = vadd.f32 %v3380_v22, %v6365_v42  ;;  %3691 = vmatpush1.bf16.msra.mxu0 %v5480_v11  ;;  %3734 = vmatpush1.bf16.msra.mxu1 %v5608_v14  ;;  %v5569_v11 = vcombine.high %v548_v6, %v552_v7  ;;  %v412_v14 = vld [vmem:[#allocation6 + $0x850] sm:$0xff]  ;;  %v5568_v22 = vcombine.low %v548_v6, %v552_v7 }
 0x1a3   :  { %v6380_v29 = vpop.f32.mrf.mxu0  ;;  %3692 = vmatprep.subr.bf16.mxu0 %v5473_v16  ;;  %v6382_v33 = vpop.f32.mrf.mxu1  ;;  %3735 = vmatprep.subr.bf16.mxu1 %v5601_v18  ;;  %v416_v16 = vld [vmem:[#allocation6 + $0x870] sm:$0xff] }
 0x1a4   :  { %v3424_v32 = vadd.f32 %v3423_v27, %v3381_v26  ;;  %3722 = vmatprep.mubr.bf16.mxu0 %v6332_v34  ;;  %3765 = vmatprep.mubr.bf16.mxu1 %v6335_v37  ;;  %v540_v18 = vld [vmem:[#allocation6 + $0xc50] sm:$0xff]  ;;  %v5433_v23 = vcombine.high %v412_v14, %v416_v16 }
 0x1a5   :  { %v3384_v42 = vpop.f32.mrf.mxu0  ;;  %v3427_v48 = vpop.f32.mrf.mxu1  ;;  %v5561_v24 = vcombine.high %v540_v18, %v544_v19  ;;  %v404_v26 = vld [vmem:[#allocation6 + $0x810] sm:$0xff] }
 0x1a6   :  { %v3385_v44 = vadd.f32 %v3384_v42, %v6371_v59  ;;  %3693 = vmatpush1.bf16.msra.mxu0 %v5472_v28  ;;  %3736 = vmatpush1.bf16.msra.mxu1 %v5600_v30  ;;  %v3948_v60 = vmax.f32 %v3424_v32, 0.0  ;;  %v5584_v59 = vcombine.low %v564_v40, %v568_v41  ;;  %v408_v27 = vld [vmem:[#allocation6 + $0x830] sm:$0xff]  ;;  %v5560_v32 = vcombine.low %v540_v18, %v544_v19 }
 0x1a7   :  { %3694 = vmatprep.subr.bf16.mxu0 %v5465_v31  ;;  %3737 = vmatprep.subr.bf16.mxu1 %v5593_v35  ;;  %v532_v28 = vld [vmem:[#allocation6 + $0xc10] sm:$0xff]  ;;  %v5432_v31 = vcombine.low %v412_v14, %v416_v16  ;;  %v5425_v35 = vcombine.high %v404_v26, %v408_v27 }
 0x1a8   :  { %v3428_v51 = vadd.f32 %v3427_v48, %v3385_v44  ;;  %v536_v30 = vld [vmem:[#allocation6 + $0xc30] sm:$0xff]  ;;  %v5424_v44 = vcombine.low %v404_v26, %v408_v27 }
 0x1a9   :  { %v5553_v36 = vcombine.high %v532_v28, %v536_v30  ;;  %v528_v42 = vld [vmem:[#allocation6 + $0xbf0] sm:$0xff] }
 0x1aa   :  { %v3956_v61 = vmax.f32 %v3428_v51, 0.0  ;;  %3695 = vmatpush1.bf16.msra.mxu0 %v5464_v45  ;;  %3738 = vmatpush1.bf16.msra.mxu1 %v5592_v49  ;;  %v652_v40 = vld [vmem:[#allocation6 + $0xfd0] sm:$0xff]  ;;  %v5552_v45 = vcombine.low %v532_v28, %v536_v30  ;;  %v5545_v48 = vcombine.high %v524_v38, %v528_v42  ;;  %v5544_v54 = vcombine.low %v524_v38, %v528_v42 }
 0x1ab   :  { %3696 = vmatprep.subr.bf16.mxu0 %v5457_v50  ;;  %3739 = vmatprep.subr.bf16.mxu1 %v5585_v52  ;;  %v656_v41 = vld [vmem:[#allocation6 + $0xff0] sm:$0xff] }
 0x1ac   :  { %v6387_v1 = vpack.c.bf16 %v3956_v61, %v3948_v60  ;;  %v5673_v49 = vcombine.high %v652_v40, %v656_v41  ;;  %v516_v50 = vld [vmem:[#allocation6 + $0xb90] sm:$0xff]  ;;  %v5672_v55 = vcombine.low %v652_v40, %v656_v41 }
 0x1ad   :  { %v520_v51 = vld [vmem:[#allocation6 + $0xbb0] sm:$0xff] }
 0x1ae   :  { %3697 = vmatpush1.bf16.msra.mxu0 %v5456_v62  ;;  %3740 = vmatpush1.bf16.msra.mxu1 %v5584_v59  ;;  %v644_v52 = vld [vmem:[#allocation6 + $0xf90] sm:$0xff]  ;;  %v5537_v56 = vcombine.high %v516_v50, %v520_v51 }
 0x1af   :  { %3698 = vmatprep.subr.bf16.mxu0 %v5449_v0  ;;  %3741 = vmatprep.subr.bf16.mxu1 %v5577_v2  ;;  %v5665_v60 = vcombine.high %v644_v52, %v648_v53  ;;  %v508_v61 = vld [vmem:[#allocation6 + $0xb50] sm:$0xff]  ;;  %v5536_v2 = vcombine.low %v516_v50, %v520_v51  ;;  %v5664_v3 = vcombine.low %v644_v52, %v648_v53 }
 0x1b0   :  { %v512_v62 = vld [vmem:[#allocation6 + $0xb70] sm:$0xff] }
 0x1b1   :  { %v636_v59 = vld [vmem:[#allocation6 + $0xf50] sm:$0xff]  ;;  %v5529_v5 = vcombine.high %v508_v61, %v512_v62 }
 0x1b2   :  { %3699 = vmatpush1.bf16.msra.mxu0 %v5448_v8  ;;  %3742 = vmatpush1.bf16.msra.mxu1 %v5576_v9  ;;  %v640_v0 = vld [vmem:[#allocation6 + $0xf70] sm:$0xff] }
 0x1b3   :  { %3700 = vmatprep.subr.bf16.mxu0 %v5441_v10  ;;  %3743 = vmatprep.subr.bf16.mxu1 %v5569_v11  ;;  %v5657_v6 = vcombine.high %v636_v59, %v640_v0  ;;  %v500_v7 = vld [vmem:[#allocation6 + $0xb10] sm:$0xff]  ;;  %v5528_v11 = vcombine.low %v508_v61, %v512_v62  ;;  %v5656_v14 = vcombine.low %v636_v59, %v640_v0  ;;  %v205_v0 = vld [vmem:[#allocation6 + $0x1d8] sm:$0xff] }
 0x1b4   :  { %v504_v8 = vld [vmem:[#allocation6 + $0xb30] sm:$0xff] }
 0x1b5   :  { %v628_v9 = vld [vmem:[#allocation6 + $0xf10] sm:$0xff]  ;;  %v5521_v16 = vcombine.high %v500_v7, %v504_v8 }
 0x1b6   :  { %3701 = vmatpush1.bf16.msra.mxu0 %v5440_v20  ;;  %3744 = vmatpush1.bf16.msra.mxu1 %v5568_v22  ;;  %v632_v10 = vld [vmem:[#allocation6 + $0xf30] sm:$0xff] }
 0x1b7   :  { %3702 = vmatprep.subr.bf16.mxu0 %v5433_v23  ;;  %3745 = vmatprep.subr.bf16.mxu1 %v5561_v24  ;;  %v5649_v18 = vcombine.high %v628_v9, %v632_v10  ;;  %v492_v19 = vld [vmem:[#allocation6 + $0xad0] sm:$0xff]  ;;  %v5520_v24 = vcombine.low %v500_v7, %v504_v8  ;;  %v5648_v26 = vcombine.low %v628_v9, %v632_v10  ;;  %v670_v7 = vsub.s32 2, %v6353_v4 }
 0x1b8   :  { %v496_v20 = vld [vmem:[#allocation6 + $0xaf0] sm:$0xff] }
 0x1b9   :  { %v620_v22 = vld [vmem:[#allocation6 + $0xed0] sm:$0xff]  ;;  %v5513_v27 = vcombine.high %v492_v19, %v496_v20 }
 0x1ba   :  { %3703 = vmatpush1.bf16.msra.mxu0 %v5432_v31  ;;  %3746 = vmatpush1.bf16.msra.mxu1 %v5560_v32  ;;  %v624_v23 = vld [vmem:[#allocation6 + $0xef0] sm:$0xff] }
 0x1bb   :  { %3704 = vmatprep.subr.bf16.mxu0 %v5425_v35  ;;  %3747 = vmatprep.subr.bf16.mxu1 %v5553_v36  ;;  %v5641_v28 = vcombine.high %v620_v22, %v624_v23  ;;  %v484_v30 = vld [vmem:[#allocation6 + $0xa90] sm:$0xff]  ;;  %v5512_v36 = vcombine.low %v492_v19, %v496_v20  ;;  %v5640_v38 = vcombine.low %v620_v22, %v624_v23  ;;  %v6391_v22 = vpop.f32.mrf.mxu0 }
 0x1bc   :  { %v488_v31 = vld [vmem:[#allocation6 + $0xab0] sm:$0xff]  ;;  %v671_v19 = vrot.slane %v6356_v15, %v670_v7 }
 0x1bd   :  { %v612_v32 = vld [vmem:[#allocation6 + $0xe90] sm:$0xff]  ;;  %v5505_v42 = vcombine.high %v484_v30, %v488_v31 }
 0x1be   :  { %3705 = vmatpush1.bf16.msra.mxu0 %v5424_v44  ;;  %3748 = vmatpush1.bf16.msra.mxu1 %v5552_v45  ;;  %v616_v35 = vld [vmem:[#allocation6 + $0xeb0] sm:$0xff] }
 0x1bf   :  { %3706 = vmatprep.subr.bf16.mxu0 %v5545_v48  ;;  %3749 = vmatprep.subr.bf16.mxu1 %v5673_v49  ;;  %v5633_v40 = vcombine.high %v612_v32, %v616_v35  ;;  %v476_v41 = vld [vmem:[#allocation6 + $0xa50] sm:$0xff]  ;;  %v5504_v49 = vcombine.low %v484_v30, %v488_v31  ;;  %v5632_v50 = vcombine.low %v612_v32, %v616_v35  ;;  %v193_v30 = vld [vmem:[#allocation6 + $0x178] sm:$0xff] }
 0x1c0   :  { %v480_v44 = vld [vmem:[#allocation6 + $0xa70] sm:$0xff]  ;;  %v317_v32 = vld [vmem:[#allocation6 + $0x558] sm:$0xff] }
 0x1c1   :  { %v604_v45 = vld [vmem:[#allocation6 + $0xe50] sm:$0xff]  ;;  %v5497_v51 = vcombine.high %v476_v41, %v480_v44  ;;  %v321_v35 = vld [vmem:[#allocation6 + $0x578] sm:$0xff] }
 0x1c2   :  { %3707 = vmatpush2.bf16.msra.mxu0 %v5544_v54  ;;  %3750 = vmatpush2.bf16.msra.mxu1 %v5672_v55  ;;  %v608_v48 = vld [vmem:[#allocation6 + $0xe70] sm:$0xff] }
 0x1c3   :  { %3708 = vmatprep.subr.bf16.mxu0 %v5537_v56  ;;  %3751 = vmatprep.subr.bf16.mxu1 %v5665_v60  ;;  %v5625_v52 = vcombine.high %v604_v45, %v608_v48  ;;  %v468_v53 = vld [vmem:[#allocation6 + $0xa10] sm:$0xff]  ;;  %v5496_v60 = vcombine.low %v476_v41, %v480_v44  ;;  %v5624_v61 = vcombine.low %v604_v45, %v608_v48 }
 0x1c4   :  { %v472_v54 = vld [vmem:[#allocation6 + $0xa30] sm:$0xff]  ;;  %v5339_v48 = vcombine.high %v317_v32, %v321_v35 }
 0x1c5   :  { %v596_v55 = vld [vmem:[#allocation6 + $0xe10] sm:$0xff]  ;;  %v5489_v62 = vcombine.high %v468_v53, %v472_v54 }
 0x1c6   :  { %3709 = vmatpush2.bf16.msra.mxu0 %v5536_v2  ;;  %3752 = vmatpush2.bf16.msra.mxu1 %v5664_v3  ;;  %v600_v56 = vld [vmem:[#allocation6 + $0xe30] sm:$0xff]  ;;  %v209_v2 = vld [vmem:[#allocation6 + $0x1f8] sm:$0xff] }
 0x1c7   :  { %3710 = vmatprep.subr.bf16.mxu0 %v5529_v5  ;;  %3753 = vmatprep.subr.bf16.mxu1 %v5657_v6  ;;  %v5617_v59 = vcombine.high %v596_v55, %v600_v56  ;;  %v333_v3 = vld [vmem:[#allocation6 + $0x5d8] sm:$0xff]  ;;  %v5488_v6 = vcombine.low %v468_v53, %v472_v54  ;;  %v5616_v8 = vcombine.low %v596_v55, %v600_v56 }
 0x1c8   :  { %v337_v5 = vld [vmem:[#allocation6 + $0x5f8] sm:$0xff]  ;;  %v5227_v9 = vcombine.high %v205_v0, %v209_v2  ;;  %v5226_v20 = vcombine.low %v205_v0, %v209_v2 }
 0x1c9   :  { %v5355_v10 = vcombine.high %v333_v3, %v337_v5  ;;  %v5354_v23 = vcombine.low %v333_v3, %v337_v5  ;;  %v313_v53 = vld [vmem:[#allocation6 + $0x538] sm:$0xff] }
 0x1ca   :  { %3711 = vmatpush2.bf16.msra.mxu0 %v5528_v11  ;;  %3754 = vmatpush2.bf16.msra.mxu1 %v5656_v14  ;;  %v197_v11 = vld [vmem:[#allocation6 + $0x198] sm:$0xff] }
 0x1cb   :  { %3712 = vmatprep.subr.bf16.mxu0 %v5521_v16  ;;  %3755 = vmatprep.subr.bf16.mxu1 %v5649_v18  ;;  %v201_v14 = vld [vmem:[#allocation6 + $0x1b8] sm:$0xff] }
 0x1cc   :  { %v325_v16 = vld [vmem:[#allocation6 + $0x598] sm:$0xff] }
 0x1cd   :  { %v329_v18 = vld [vmem:[#allocation6 + $0x5b8] sm:$0xff] }
 0x1ce   :  { %3713 = vmatpush2.bf16.msra.mxu0 %v5520_v24  ;;  %3756 = vmatpush2.bf16.msra.mxu1 %v5648_v26  ;;  %v5219_v24 = vcombine.high %v197_v11, %v201_v14  ;;  %v6393_v26 = vpop.f32.mrf.mxu1  ;;  %v173_v0 = vld [vmem:[#allocation6 + $0xd8] sm:$0xff] }
 0x1cf   :  { %3714 = vmatprep.subr.bf16.mxu0 %v5513_v27  ;;  %3757 = vmatprep.subr.bf16.mxu1 %v5641_v28  ;;  %v5347_v27 = vcombine.high %v325_v16, %v329_v18  ;;  %v189_v28 = vld [vmem:[#allocation6 + $0x158] sm:$0xff] }
 0x1d0   :  { %v5211_v41 = vcombine.high %v189_v28, %v193_v30  ;;  %v5210_v55 = vcombine.low %v189_v28, %v193_v30  ;;  %v177_v2 = vld [vmem:[#allocation6 + $0xf8] sm:$0xff] }
 0x1d1   :  { %v305_v3 = vld [vmem:[#allocation6 + $0x4f8] sm:$0xff] }
 0x1d2   :  { %3715 = vmatpush2.bf16.msra.mxu0 %v5512_v36  ;;  %3758 = vmatpush2.bf16.msra.mxu1 %v5640_v38  ;;  %v5218_v38 = vcombine.low %v197_v11, %v201_v14  ;;  %v297_v11 = vld [vmem:[#allocation6 + $0x4b8] sm:$0xff]  ;;  %v5194_v14 = vcombine.low %v173_v0, %v177_v2 }
 0x1d3   :  { %3716 = vmatprep.subr.bf16.mxu0 %v5505_v42  ;;  %3759 = vmatprep.subr.bf16.mxu1 %v5633_v40  ;;  %v5346_v40 = vcombine.low %v325_v16, %v329_v18 }
 0x1d6   :  { %3717 = vmatpush2.bf16.msra.mxu0 %v5504_v49  ;;  %3760 = vmatpush2.bf16.msra.mxu1 %v5632_v50  ;;  %v181_v49 = vld [vmem:[#allocation6 + $0x118] sm:$0xff] }
 0x1d7   :  { %3718 = vmatprep.subr.bf16.mxu0 %v5497_v51  ;;  %3761 = vmatprep.subr.bf16.mxu1 %v5625_v52  ;;  %v185_v50 = vld [vmem:[#allocation6 + $0x138] sm:$0xff] }
 0x1d8   :  { %v309_v52 = vld [vmem:[#allocation6 + $0x518] sm:$0xff]  ;;  %v5202_v5 = vcombine.low %v181_v49, %v185_v50 }
 0x1da   :  { %3719 = vmatpush2.bf16.msra.mxu0 %v5496_v60  ;;  %3762 = vmatpush2.bf16.msra.mxu1 %v5624_v61  ;;  %v5338_v60 = vcombine.low %v317_v32, %v321_v35  ;;  %v5203_v61 = vcombine.high %v181_v49, %v185_v50  ;;  %v149_v35 = vld [vmem:[#allocation6 + $0x18] sm:$0xff] }
 0x1db   :  { %3720 = vmatprep.subr.bf16.mxu0 %v5489_v62  ;;  %3763 = vmatprep.subr.bf16.mxu1 %v5617_v59  ;;  %v5331_v59 = vcombine.high %v309_v52, %v313_v53  ;;  %v269_v50 = vld [vmem:[#allocation6 + $0x3d8] sm:$0xff] }
 0x1de   :  { %3721 = vmatpush2.bf16.msra.mxu0 %v5488_v6  ;;  %3764 = vmatpush2.bf16.msra.mxu1 %v5616_v8  ;;  %v5195_v6 = vcombine.high %v173_v0, %v177_v2  ;;  %v165_v8 = vld [vmem:[#allocation6 + $0x98] sm:$0xff] }
 0x1df   :  { %3776 = vmatprep.subr.bf16.mxu0 %v5227_v9  ;;  %3819 = vmatprep.subr.bf16.mxu1 %v5355_v10  ;;  %v169_v9 = vld [vmem:[#allocation6 + $0xb8] sm:$0xff] }
 0x1e0   :  { %v293_v10 = vld [vmem:[#allocation6 + $0x498] sm:$0xff]  ;;  %v5187_v18 = vcombine.high %v165_v8, %v169_v9  ;;  %v5186_v28 = vcombine.low %v165_v8, %v169_v9 }
 0x1e1   :  { %v3466_v31 = vpop.f32.mrf.mxu0  ;;  %3723 = vmatmul.mubr.bf16.vlgmr.msra.gmra.mxu0 %v6340_v46  ;;  %v3509_v15 = vpop.f32.mrf.mxu1  ;;  %3766 = vmatmul.mubr.bf16.vlgmr.msra.gmra.mxu1 %v6342_v47  ;;  %v5314_v30 = vcombine.low %v293_v10, %v297_v11  ;;  %v389_v0 = vld [vmem:[#allocation6 + $0x798] sm:$0xff] }
 0x1e2   :  { %v3467_v36 = vadd.f32 %v3466_v31, %v671_v19  ;;  %3777 = vmatpush1.bf16.msra.mxu0 %v5226_v20  ;;  %3820 = vmatpush1.bf16.msra.mxu1 %v5354_v23  ;;  %v157_v20 = vld [vmem:[#allocation6 + $0x58] sm:$0xff] }
 0x1e3   :  { %v6397_v42 = vpop.f32.mrf.mxu0  ;;  %3778 = vmatprep.subr.bf16.mxu0 %v5219_v24  ;;  %v6401_v45 = vpop.f32.mrf.mxu1  ;;  %3821 = vmatprep.subr.bf16.mxu1 %v5347_v27  ;;  %v161_v23 = vld [vmem:[#allocation6 + $0x78] sm:$0xff] }
 0x1e4   :  { %v6399_v44 = vadd.f32 %v3509_v15, %v3467_v36  ;;  %3808 = vmatprep.mubr.bf16.mxu0 %v6322_v58  ;;  %3851 = vmatprep.mubr.bf16.mxu1 %v6324_v63  ;;  %v301_v58 = vld [vmem:[#allocation6 + $0x4d8] sm:$0xff]  ;;  %v5330_v63 = vcombine.low %v309_v52, %v313_v53  ;;  %v5179_v31 = vcombine.high %v157_v20, %v161_v23 }
 0x1e5   :  { %v3470_v51 = vpop.f32.mrf.mxu0  ;;  %v3513_v56 = vpop.f32.mrf.mxu1  ;;  %v5323_v7 = vcombine.high %v301_v58, %v305_v3  ;;  %v5322_v16 = vcombine.low %v301_v58, %v305_v3  ;;  %v285_v24 = vld [vmem:[#allocation6 + $0x458] sm:$0xff] }
 0x1e6   :  { %v3471_v54 = vadd.f32 %v3470_v51, %v671_v19  ;;  %3779 = vmatpush1.bf16.msra.mxu0 %v5218_v38  ;;  %3822 = vmatpush1.bf16.msra.mxu1 %v5346_v40  ;;  %v5315_v19 = vcombine.high %v293_v10, %v297_v11  ;;  %v289_v27 = vld [vmem:[#allocation6 + $0x478] sm:$0xff]  ;;  %v5178_v40 = vcombine.low %v157_v20, %v161_v23 }
 0x1e7   :  { %3780 = vmatprep.subr.bf16.mxu0 %v5211_v41  ;;  %3823 = vmatprep.subr.bf16.mxu1 %v5339_v48  ;;  %v5307_v32 = vcombine.high %v285_v24, %v289_v27  ;;  %v153_v36 = vld [vmem:[#allocation6 + $0x38] sm:$0xff]  ;;  %v5306_v41 = vcombine.low %v285_v24, %v289_v27 }
 0x1e8   :  { %v6405_v62 = vadd.f32 %v3513_v56, %v3471_v54  ;;  %v277_v15 = vld [vmem:[#allocation6 + $0x418] sm:$0xff]  ;;  %v5171_v48 = vcombine.high %v149_v35, %v153_v36  ;;  %v5170_v54 = vcombine.low %v149_v35, %v153_v36 }
 0x1e9   :  { %v281_v38 = vld [vmem:[#allocation6 + $0x438] sm:$0xff] }
 0x1ea   :  { %3781 = vmatpush1.bf16.msra.mxu0 %v5210_v55  ;;  %3824 = vmatpush1.bf16.msra.mxu1 %v5338_v60  ;;  %v5299_v49 = vcombine.high %v277_v15, %v281_v38  ;;  %v273_v51 = vld [vmem:[#allocation6 + $0x3f8] sm:$0xff]  ;;  %v5298_v55 = vcombine.low %v277_v15, %v281_v38 }
 0x1eb   :  { %3782 = vmatprep.subr.bf16.mxu0 %v5203_v61  ;;  %3825 = vmatprep.subr.bf16.mxu1 %v5331_v59  ;;  %v397_v52 = vld [vmem:[#allocation6 + $0x7d8] sm:$0xff]  ;;  %v5291_v56 = vcombine.high %v269_v50, %v273_v51  ;;  %v5290_v58 = vcombine.low %v269_v50, %v273_v51 }
 0x1ec   :  { %v401_v53 = vld [vmem:[#allocation6 + $0x7f8] sm:$0xff] }
 0x1ed   :  { %v5419_v60 = vcombine.high %v397_v52, %v401_v53  ;;  %v261_v61 = vld [vmem:[#allocation6 + $0x398] sm:$0xff]  ;;  %v5418_v3 = vcombine.low %v397_v52, %v401_v53 }
 0x1ee   :  { %3783 = vmatpush1.bf16.msra.mxu0 %v5202_v5  ;;  %3826 = vmatpush1.bf16.msra.mxu1 %v5330_v63  ;;  %v265_v59 = vld [vmem:[#allocation6 + $0x3b8] sm:$0xff] }
 0x1ef   :  { %3784 = vmatprep.subr.bf16.mxu0 %v5195_v6  ;;  %3827 = vmatprep.subr.bf16.mxu1 %v5323_v7  ;;  %v393_v2 = vld [vmem:[#allocation6 + $0x7b8] sm:$0xff]  ;;  %v5283_v5 = vcombine.high %v261_v61, %v265_v59  ;;  %v5282_v10 = vcombine.low %v261_v61, %v265_v59 }
 0x1f0   :  { %v5411_v63 = vcombine.high %v389_v0, %v393_v2  ;;  %v253_v6 = vld [vmem:[#allocation6 + $0x358] sm:$0xff]  ;;  %v5410_v11 = vcombine.low %v389_v0, %v393_v2 }
 0x1f1   :  { %v257_v7 = vld [vmem:[#allocation6 + $0x378] sm:$0xff] }
 0x1f2   :  { %3785 = vmatpush1.bf16.msra.mxu0 %v5194_v14  ;;  %3828 = vmatpush1.bf16.msra.mxu1 %v5322_v16  ;;  %v381_v8 = vld [vmem:[#allocation6 + $0x758] sm:$0xff]  ;;  %v5275_v14 = vcombine.high %v253_v6, %v257_v7  ;;  %v5274_v24 = vcombine.low %v253_v6, %v257_v7 }
 0x1f3   :  { %3786 = vmatprep.subr.bf16.mxu0 %v5187_v18  ;;  %3829 = vmatprep.subr.bf16.mxu1 %v5315_v19  ;;  %v385_v9 = vld [vmem:[#allocation6 + $0x778] sm:$0xff] }
 0x1f4   :  { %v5403_v16 = vcombine.high %v381_v8, %v385_v9  ;;  %v245_v18 = vld [vmem:[#allocation6 + $0x318] sm:$0xff]  ;;  %v5402_v27 = vcombine.low %v381_v8, %v385_v9 }
 0x1f5   :  { %v249_v19 = vld [vmem:[#allocation6 + $0x338] sm:$0xff] }
 0x1f6   :  { %3787 = vmatpush1.bf16.msra.mxu0 %v5186_v28  ;;  %3830 = vmatpush1.bf16.msra.mxu1 %v5314_v30  ;;  %v373_v20 = vld [vmem:[#allocation6 + $0x718] sm:$0xff]  ;;  %v5267_v28 = vcombine.high %v245_v18, %v249_v19  ;;  %v5266_v15 = vcombine.low %v245_v18, %v249_v19 }
 0x1f7   :  { %3788 = vmatprep.subr.bf16.mxu0 %v5179_v31  ;;  %3831 = vmatprep.subr.bf16.mxu1 %v5307_v32  ;;  %v377_v23 = vld [vmem:[#allocation6 + $0x738] sm:$0xff] }
 0x1f8   :  { %v5395_v30 = vcombine.high %v373_v20, %v377_v23  ;;  %v237_v31 = vld [vmem:[#allocation6 + $0x2d8] sm:$0xff]  ;;  %v5394_v38 = vcombine.low %v373_v20, %v377_v23 }
 0x1f9   :  { %v241_v32 = vld [vmem:[#allocation6 + $0x2f8] sm:$0xff] }
 0x1fa   :  { %3789 = vmatpush1.bf16.msra.mxu0 %v5178_v40  ;;  %3832 = vmatpush1.bf16.msra.mxu1 %v5306_v41  ;;  %v365_v35 = vld [vmem:[#allocation6 + $0x6d8] sm:$0xff]  ;;  %v5259_v40 = vcombine.high %v237_v31, %v241_v32  ;;  %v5258_v52 = vcombine.low %v237_v31, %v241_v32 }
 0x1fb   :  { %3790 = vmatprep.subr.bf16.mxu0 %v5171_v48  ;;  %3833 = vmatprep.subr.bf16.mxu1 %v5299_v49  ;;  %v369_v36 = vld [vmem:[#allocation6 + $0x6f8] sm:$0xff] }
 0x1fc   :  { %v5387_v41 = vcombine.high %v365_v35, %v369_v36  ;;  %v229_v48 = vld [vmem:[#allocation6 + $0x298] sm:$0xff]  ;;  %v5386_v53 = vcombine.low %v365_v35, %v369_v36  ;;  %v6407_v36 = vpop.f32.mrf.mxu0 }
 0x1fd   :  { %v233_v49 = vld [vmem:[#allocation6 + $0x2b8] sm:$0xff] }
 0x1fe   :  { %3791 = vmatpush1.bf16.msra.mxu0 %v5170_v54  ;;  %3834 = vmatpush1.bf16.msra.mxu1 %v5298_v55  ;;  %v357_v50 = vld [vmem:[#allocation6 + $0x698] sm:$0xff]  ;;  %v5251_v54 = vcombine.high %v229_v48, %v233_v49  ;;  %v5250_v0 = vcombine.low %v229_v48, %v233_v49 }
 0x1ff   :  { %3792 = vmatprep.subr.bf16.mxu0 %v5291_v56  ;;  %3835 = vmatprep.subr.bf16.mxu1 %v5419_v60  ;;  %v361_v51 = vld [vmem:[#allocation6 + $0x6b8] sm:$0xff] }
 0x200   :  { %v5379_v55 = vcombine.high %v357_v50, %v361_v51  ;;  %v221_v56 = vld [vmem:[#allocation6 + $0x258] sm:$0xff]  ;;  %v5378_v2 = vcombine.low %v357_v50, %v361_v51 }
 0x201   :  { %v225_v60 = vld [vmem:[#allocation6 + $0x278] sm:$0xff] }
 0x202   :  { %3793 = vmatpush2.bf16.msra.mxu0 %v5290_v58  ;;  %3836 = vmatpush2.bf16.msra.mxu1 %v5418_v3  ;;  %v349_v61 = vld [vmem:[#allocation6 + $0x658] sm:$0xff]  ;;  %v5243_v58 = vcombine.high %v221_v56, %v225_v60  ;;  %v5242_v8 = vcombine.low %v221_v56, %v225_v60 }
 0x203   :  { %3794 = vmatprep.subr.bf16.mxu0 %v5283_v5  ;;  %3837 = vmatprep.subr.bf16.mxu1 %v5411_v63  ;;  %v353_v59 = vld [vmem:[#allocation6 + $0x678] sm:$0xff] }
 0x204   :  { %v5371_v3 = vcombine.high %v349_v61, %v353_v59  ;;  %v213_v5 = vld [vmem:[#allocation6 + $0x218] sm:$0xff]  ;;  %v5370_v9 = vcombine.low %v349_v61, %v353_v59 }
 0x205   :  { %v217_v63 = vld [vmem:[#allocation6 + $0x238] sm:$0xff] }
 0x206   :  { %3795 = vmatpush2.bf16.msra.mxu0 %v5282_v10  ;;  %3838 = vmatpush2.bf16.msra.mxu1 %v5410_v11  ;;  %v341_v6 = vld [vmem:[#allocation6 + $0x618] sm:$0xff]  ;;  %v5235_v10 = vcombine.high %v213_v5, %v217_v63  ;;  %v5234_v20 = vcombine.low %v213_v5, %v217_v63 }
 0x207   :  { %3796 = vmatprep.subr.bf16.mxu0 %v5275_v14  ;;  %3839 = vmatprep.subr.bf16.mxu1 %v5403_v16  ;;  %v345_v7 = vld [vmem:[#allocation6 + $0x638] sm:$0xff] }
 0x208   :  { %v5363_v11 = vcombine.high %v341_v6, %v345_v7  ;;  %v461_v14 = vld [vmem:[#allocation6 + $0x9d8] sm:$0xff]  ;;  %v5362_v23 = vcombine.low %v341_v6, %v345_v7 }
 0x209   :  { %v465_v16 = vld [vmem:[#allocation6 + $0x9f8] sm:$0xff] }
 0x20a   :  { %3797 = vmatpush2.bf16.msra.mxu0 %v5274_v24  ;;  %3840 = vmatpush2.bf16.msra.mxu1 %v5402_v27  ;;  %v589_v18 = vld [vmem:[#allocation6 + $0xdd8] sm:$0xff]  ;;  %v5483_v24 = vcombine.high %v461_v14, %v465_v16  ;;  %v5482_v35 = vcombine.low %v461_v14, %v465_v16 }
 0x20b   :  { %3798 = vmatprep.subr.bf16.mxu0 %v5267_v28  ;;  %3841 = vmatprep.subr.bf16.mxu1 %v5395_v30  ;;  %v593_v19 = vld [vmem:[#allocation6 + $0xdf8] sm:$0xff] }
 0x20c   :  { %v5611_v27 = vcombine.high %v589_v18, %v593_v19  ;;  %v453_v28 = vld [vmem:[#allocation6 + $0x998] sm:$0xff] }
 0x20d   :  { %v457_v30 = vld [vmem:[#allocation6 + $0x9b8] sm:$0xff] }
 0x20e   :  { %3799 = vmatpush2.bf16.msra.mxu0 %v5266_v15  ;;  %3842 = vmatpush2.bf16.msra.mxu1 %v5394_v38  ;;  %v581_v31 = vld [vmem:[#allocation6 + $0xd98] sm:$0xff]  ;;  %v5610_v15 = vcombine.low %v589_v18, %v593_v19  ;;  %v5475_v38 = vcombine.high %v453_v28, %v457_v30 }
 0x20f   :  { %3800 = vmatprep.subr.bf16.mxu0 %v5259_v40  ;;  %3843 = vmatprep.subr.bf16.mxu1 %v5387_v41  ;;  %v585_v32 = vld [vmem:[#allocation6 + $0xdb8] sm:$0xff]  ;;  %v6409_v40 = vpop.f32.mrf.mxu1 }
 0x210   :  { %v5603_v41 = vcombine.high %v581_v31, %v585_v32  ;;  %v445_v48 = vld [vmem:[#allocation6 + $0x958] sm:$0xff]  ;;  %v5602_v60 = vcombine.low %v581_v31, %v585_v32 }
 0x211   :  { %v449_v49 = vld [vmem:[#allocation6 + $0x978] sm:$0xff] }
 0x212   :  { %3801 = vmatpush2.bf16.msra.mxu0 %v5258_v52  ;;  %3844 = vmatpush2.bf16.msra.mxu1 %v5386_v53  ;;  %v573_v51 = vld [vmem:[#allocation6 + $0xd58] sm:$0xff]  ;;  %v5467_v61 = vcombine.high %v445_v48, %v449_v49  ;;  %v5466_v63 = vcombine.low %v445_v48, %v449_v49 }
 0x213   :  { %3802 = vmatprep.subr.bf16.mxu0 %v5251_v54  ;;  %3845 = vmatprep.subr.bf16.mxu1 %v5379_v55  ;;  %v577_v52 = vld [vmem:[#allocation6 + $0xd78] sm:$0xff]  ;;  %v5474_v55 = vcombine.low %v453_v28, %v457_v30 }
 0x214   :  { %v5594_v7 = vcombine.low %v573_v51, %v577_v52  ;;  %v433_v14 = vld [vmem:[#allocation6 + $0x8f8] sm:$0xff] }
 0x215   :  { %v561_v16 = vld [vmem:[#allocation6 + $0xcf8] sm:$0xff] }
 0x216   :  { %3803 = vmatpush2.bf16.msra.mxu0 %v5250_v0  ;;  %3846 = vmatpush2.bf16.msra.mxu1 %v5378_v2  ;;  %v437_v2 = vld [vmem:[#allocation6 + $0x918] sm:$0xff] }
 0x217   :  { %3804 = vmatprep.subr.bf16.mxu0 %v5243_v58  ;;  %3847 = vmatprep.subr.bf16.mxu1 %v5371_v3  ;;  %v441_v58 = vld [vmem:[#allocation6 + $0x938] sm:$0xff] }
 0x218   :  { %v565_v3 = vld [vmem:[#allocation6 + $0xd18] sm:$0xff] }
 0x219   :  { %v425_v28 = vld [vmem:[#allocation6 + $0x8b8] sm:$0xff] }
 0x21a   :  { %3805 = vmatpush2.bf16.msra.mxu0 %v5242_v8  ;;  %3848 = vmatpush2.bf16.msra.mxu1 %v5370_v9  ;;  %v5459_v8 = vcombine.high %v437_v2, %v441_v58  ;;  %v549_v30 = vld [vmem:[#allocation6 + $0xc98] sm:$0xff] }
 0x21b   :  { %3806 = vmatprep.subr.bf16.mxu0 %v5235_v10  ;;  %3849 = vmatprep.subr.bf16.mxu1 %v5363_v11  ;;  %v429_v11 = vld [vmem:[#allocation6 + $0x8d8] sm:$0xff] }
 0x21c   :  { %v553_v31 = vld [vmem:[#allocation6 + $0xcb8] sm:$0xff]  ;;  %v5450_v32 = vcombine.low %v429_v11, %v433_v14 }
 0x21d   :  { %v417_v48 = vld [vmem:[#allocation6 + $0x878] sm:$0xff] }
 0x21e   :  { %3807 = vmatpush2.bf16.msra.mxu0 %v5234_v20  ;;  %3850 = vmatpush2.bf16.msra.mxu1 %v5362_v23  ;;  %v5451_v20 = vcombine.high %v429_v11, %v433_v14  ;;  %v541_v49 = vld [vmem:[#allocation6 + $0xc58] sm:$0xff] }
 0x21f   :  { %3862 = vmatprep.subr.bf16.mxu0 %v5483_v24  ;;  %3905 = vmatprep.subr.bf16.mxu1 %v5611_v27  ;;  %v421_v27 = vld [vmem:[#allocation6 + $0x898] sm:$0xff] }
 0x220   :  { %v521_v11 = vld [vmem:[#allocation6 + $0xbb8] sm:$0xff] }
 0x221   :  { %v3552_v50 = vpop.f32.mrf.mxu0  ;;  %3809 = vmatmul.mubr.bf16.vlgmr.msra.gmra.mxu0 %v6328_v21  ;;  %v3595_v54 = vpop.f32.mrf.mxu1  ;;  %3852 = vmatmul.mubr.bf16.vlgmr.msra.gmra.mxu1 %v6330_v25  ;;  %v5595_v21 = vcombine.high %v573_v51, %v577_v52  ;;  %v569_v25 = vld [vmem:[#allocation6 + $0xd38] sm:$0xff]  ;;  %v5442_v51 = vcombine.low %v421_v27, %v425_v28  ;;  %v5570_v52 = vcombine.low %v549_v30, %v553_v31 }
 0x222   :  { %v3553_v53 = vadd.f32 %v3552_v50, %v6399_v44  ;;  %3863 = vmatpush1.bf16.msra.mxu0 %v5482_v35  ;;  %3906 = vmatpush1.bf16.msra.mxu1 %v5610_v15  ;;  %v5587_v10 = vcombine.high %v565_v3, %v569_v25  ;;  %v5443_v15 = vcombine.high %v421_v27, %v425_v28  ;;  %v545_v50 = vld [vmem:[#allocation6 + $0xc78] sm:$0xff] }
 0x223   :  { %v6414_v56 = vpop.f32.mrf.mxu0  ;;  %3864 = vmatprep.subr.bf16.mxu0 %v5475_v38  ;;  %v6416_v0 = vpop.f32.mrf.mxu1  ;;  %3907 = vmatprep.subr.bf16.mxu1 %v5603_v41  ;;  %v5571_v38 = vcombine.high %v549_v30, %v553_v31  ;;  %v413_v41 = vld [vmem:[#allocation6 + $0x858] sm:$0xff] }
 0x224   :  { %v3596_v59 = vadd.f32 %v3595_v54, %v3553_v53  ;;  %3894 = vmatprep.mubr.bf16.mxu0 %v6332_v34  ;;  %3937 = vmatprep.mubr.bf16.mxu1 %v6335_v37  ;;  %v557_v34 = vld [vmem:[#allocation6 + $0xcd8] sm:$0xff]  ;;  %v5458_v37 = vcombine.low %v437_v2, %v441_v58  ;;  %v5435_v53 = vcombine.high %v413_v41, %v417_v48 }
 0x225   :  { %v3556_v44 = vpop.f32.mrf.mxu0  ;;  %v3599_v6 = vpop.f32.mrf.mxu1  ;;  %v5579_v24 = vcombine.high %v557_v34, %v561_v16  ;;  %v5578_v35 = vcombine.low %v557_v34, %v561_v16  ;;  %v5563_v54 = vcombine.high %v541_v49, %v545_v50  ;;  %v5562_v2 = vcombine.low %v541_v49, %v545_v50  ;;  %v645_v14 = vld [vmem:[#allocation6 + $0xf98] sm:$0xff] }
 0x226   :  { %v3557_v5 = vadd.f32 %v3556_v44, %v6405_v62  ;;  %3865 = vmatpush1.bf16.msra.mxu0 %v5474_v55  ;;  %3908 = vmatpush1.bf16.msra.mxu1 %v5602_v60  ;;  %v3950_v18 = vmax.f32 %v3596_v59, 0.0  ;;  %v5586_v62 = vcombine.low %v565_v3, %v569_v25  ;;  %v405_v55 = vld [vmem:[#allocation6 + $0x818] sm:$0xff] }
 0x227   :  { %3866 = vmatprep.subr.bf16.mxu0 %v5467_v61  ;;  %3909 = vmatprep.subr.bf16.mxu1 %v5595_v21  ;;  %v409_v60 = vld [vmem:[#allocation6 + $0x838] sm:$0xff]  ;;  %v5434_v21 = vcombine.low %v413_v41, %v417_v48 }
 0x228   :  { %v3600_v9 = vadd.f32 %v3599_v6, %v3557_v5  ;;  %v533_v61 = vld [vmem:[#allocation6 + $0xc18] sm:$0xff]  ;;  %v5427_v58 = vcombine.high %v405_v55, %v409_v60  ;;  %v5426_v6 = vcombine.low %v405_v55, %v409_v60 }
 0x229   :  { %v537_v59 = vld [vmem:[#allocation6 + $0xc38] sm:$0xff] }
 0x22a   :  { %v3958_v19 = vmax.f32 %v3600_v9, 0.0  ;;  %3867 = vmatpush1.bf16.msra.mxu0 %v5466_v63  ;;  %3910 = vmatpush1.bf16.msra.mxu1 %v5594_v7  ;;  %v5555_v44 = vcombine.high %v533_v61, %v537_v59  ;;  %v525_v3 = vld [vmem:[#allocation6 + $0xbd8] sm:$0xff]  ;;  %v5554_v7 = vcombine.low %v533_v61, %v537_v59  ;;  %v674_v61 = vsub.s32 3, %v6353_v4 }
 0x22b   :  { %3868 = vmatprep.subr.bf16.mxu0 %v5459_v8  ;;  %3911 = vmatprep.subr.bf16.mxu1 %v5587_v10  ;;  %v529_v25 = vld [vmem:[#allocation6 + $0xbf8] sm:$0xff] }
 0x22c   :  { %v6421_v23 = vpack.c.bf16 %v3958_v19, %v3950_v18  ;;  %v653_v5 = vld [vmem:[#allocation6 + $0xfd8] sm:$0xff]  ;;  %v5547_v8 = vcombine.high %v525_v3, %v529_v25  ;;  %v5546_v16 = vcombine.low %v525_v3, %v529_v25  ;;  %v6425_v25 = vld [vmem:[#allocation8] sm:$0xff] }
 0x22d   :  { %v657_v63 = vld [vmem:[#allocation6 + $0xff8] sm:$0xff] }
 0x22e   :  { %3869 = vmatpush1.bf16.msra.mxu0 %v5458_v37  ;;  %3912 = vmatpush1.bf16.msra.mxu1 %v5586_v62  ;;  %v5675_v9 = vcombine.high %v653_v5, %v657_v63  ;;  %v517_v10 = vld [vmem:[#allocation6 + $0xb98] sm:$0xff]  ;;  %v5674_v18 = vcombine.low %v653_v5, %v657_v63 }
 0x22f   :  { %3870 = vmatprep.subr.bf16.mxu0 %v5451_v20  ;;  %3913 = vmatprep.subr.bf16.mxu1 %v5579_v24  ;;  %v649_v34 = vld [vmem:[#allocation6 + $0xfb8] sm:$0xff]  ;;  %v5539_v19 = vcombine.high %v517_v10, %v521_v11  ;;  %v5538_v28 = vcombine.low %v517_v10, %v521_v11 }
 0x230   :  { %v5667_v37 = vcombine.high %v645_v14, %v649_v34  ;;  %v509_v62 = vld [vmem:[#allocation6 + $0xb58] sm:$0xff]  ;;  %v5666_v30 = vcombine.low %v645_v14, %v649_v34 }
 0x231   :  { %v513_v20 = vld [vmem:[#allocation6 + $0xb78] sm:$0xff] }
 0x232   :  { %3871 = vmatpush1.bf16.msra.mxu0 %v5450_v32  ;;  %3914 = vmatpush1.bf16.msra.mxu1 %v5578_v35  ;;  %v637_v24 = vld [vmem:[#allocation6 + $0xf58] sm:$0xff]  ;;  %v5531_v31 = vcombine.high %v509_v62, %v513_v20  ;;  %v5530_v48 = vcombine.low %v509_v62, %v513_v20 }
 0x233   :  { %3872 = vmatprep.subr.bf16.mxu0 %v5443_v15  ;;  %3915 = vmatprep.subr.bf16.mxu1 %v5571_v38  ;;  %v641_v27 = vld [vmem:[#allocation6 + $0xf78] sm:$0xff] }
 0x234   :  { %v5659_v32 = vcombine.high %v637_v24, %v641_v27  ;;  %v501_v35 = vld [vmem:[#allocation6 + $0xb18] sm:$0xff]  ;;  %v5658_v49 = vcombine.low %v637_v24, %v641_v27  ;;  %v3558_v27 = vpop.f32.mrf.mxu0 }
 0x235   :  { %v505_v15 = vld [vmem:[#allocation6 + $0xb38] sm:$0xff] }
 0x236   :  { %3873 = vmatpush1.bf16.msra.mxu0 %v5442_v51  ;;  %3916 = vmatpush1.bf16.msra.mxu1 %v5570_v52  ;;  %v629_v38 = vld [vmem:[#allocation6 + $0xf18] sm:$0xff]  ;;  %v5523_v50 = vcombine.high %v501_v35, %v505_v15  ;;  %v5522_v59 = vcombine.low %v501_v35, %v505_v15 }
 0x237   :  { %3874 = vmatprep.subr.bf16.mxu0 %v5435_v53  ;;  %3917 = vmatprep.subr.bf16.mxu1 %v5563_v54  ;;  %v633_v41 = vld [vmem:[#allocation6 + $0xf38] sm:$0xff]  ;;  %v666_v54 = vsub.s32 1, %v6353_v4 }
 0x238   :  { %v5651_v51 = vcombine.high %v629_v38, %v633_v41  ;;  %v493_v52 = vld [vmem:[#allocation6 + $0xad8] sm:$0xff] }
 0x239   :  { %v497_v53 = vld [vmem:[#allocation6 + $0xaf8] sm:$0xff]  ;;  %v667_v5 = vrot.slane %v6425_v25, %v666_v54 }
 0x23a   :  { %3875 = vmatpush1.bf16.msra.mxu0 %v5434_v21  ;;  %3918 = vmatpush1.bf16.msra.mxu1 %v5562_v2  ;;  %v621_v55 = vld [vmem:[#allocation6 + $0xed8] sm:$0xff]  ;;  %v5650_v21 = vcombine.low %v629_v38, %v633_v41  ;;  %v5515_v2 = vcombine.high %v493_v52, %v497_v53 }
 0x23b   :  { %3876 = vmatprep.subr.bf16.mxu0 %v5427_v58  ;;  %3919 = vmatprep.subr.bf16.mxu1 %v5555_v44  ;;  %v625_v60 = vld [vmem:[#allocation6 + $0xef8] sm:$0xff] }
 0x23c   :  { %v5643_v58 = vcombine.high %v621_v55, %v625_v60  ;;  %v485_v44 = vld [vmem:[#allocation6 + $0xa98] sm:$0xff]  ;;  %v5642_v10 = vcombine.low %v621_v55, %v625_v60 }
 0x23d   :  { %v489_v3 = vld [vmem:[#allocation6 + $0xab8] sm:$0xff] }
 0x23e   :  { %3877 = vmatpush1.bf16.msra.mxu0 %v5426_v6  ;;  %3920 = vmatpush1.bf16.msra.mxu1 %v5554_v7  ;;  %v613_v63 = vld [vmem:[#allocation6 + $0xe98] sm:$0xff]  ;;  %v675_v7 = vrot.slane %v6425_v25, %v674_v61  ;;  %v5507_v11 = vcombine.high %v485_v44, %v489_v3  ;;  %v5506_v24 = vcombine.low %v485_v44, %v489_v3  ;;  %v5866_v3 = vld [vmem:[#allocation9 + $0x64] ss:$8 sps:$4 sm:$0xff]  }
 0x23f   :  { %3878 = vmatprep.subr.bf16.mxu0 %v5547_v8  ;;  %3921 = vmatprep.subr.bf16.mxu1 %v5675_v9  ;;  %v617_v6 = vld [vmem:[#allocation6 + $0xeb8] sm:$0xff]  ;;  %v5514_v8 = vcombine.low %v493_v52, %v497_v53  ;;  %v3301_v9 = vadd.f32 %v6373_v12, %v667_v5 }
 0x240   :  { %v3473_v14 = vadd.f32 %v6407_v36, %v675_v7  ;;  %v5635_v34 = vcombine.high %v613_v63, %v617_v6  ;;  %v609_v62 = vld [vmem:[#allocation6 + $0xe78] sm:$0xff]  ;;  %v3469_v20 = vadd.f32 %v6397_v42, %v675_v7 }
 0x241   :  { %v3344_v12 = vadd.f32 %v6375_v17, %v3301_v9  ;;  %v473_v35 = vld [vmem:[#allocation6 + $0xa38] sm:$0xff] }
 0x242   :  { %3879 = vmatpush2.bf16.msra.mxu0 %v5546_v16  ;;  %3922 = vmatpush2.bf16.msra.mxu1 %v5674_v18  ;;  %v477_v16 = vld [vmem:[#allocation6 + $0xa58] sm:$0xff]  ;;  %v3516_v36 = vadd.f32 %v6409_v40, %v3473_v14  ;;  %v3512_v41 = vadd.f32 %v6401_v45, %v3469_v20  ;;  %v5879_v14 = vld [vmem:[#allocation9 + $0x140] ss:$8 sps:$4 sm:$0xff]  }
 0x243   :  { %3880 = vmatprep.subr.bf16.mxu0 %v5539_v19  ;;  %3923 = vmatprep.subr.bf16.mxu1 %v5667_v37  ;;  %v481_v18 = vld [vmem:[#allocation6 + $0xa78] sm:$0xff]  ;;  %v3297_v19 = vadd.f32 %v6363_v39, %v667_v5  ;;  %v3387_v15 = vadd.f32 %v6391_v22, %v3344_v12  ;;  %v3601_v22 = vpop.f32.mrf.mxu1  ;;  %v5869_v5 = vld [vmem:[#allocation9 + $0x164] ss:$8 sps:$4 sm:$0xff]   ;;  %v5888_v20 = vld [vmem:[#allocation9 + $0x20] ss:$8 sps:$4 sm:$0xff]  }
 0x244   :  { %v605_v37 = vld [vmem:[#allocation6 + $0xe58] sm:$0xff]  ;;  %v3559_v17 = vadd.f32 %v3558_v27, %v3516_v36  ;;  %v5902_v36 = vld [vmem:[#allocation9 + $0x4] ss:$8 sps:$4 sm:$0xff]  }
 0x245   :  { %v3340_v39 = vadd.f32 %v6367_v43, %v3297_v19  ;;  %v597_v42 = vld [vmem:[#allocation6 + $0xe18] sm:$0xff]  ;;  %v5626_v40 = vcombine.low %v605_v37, %v609_v62  ;;  %v3430_v43 = vadd.f32 %v6393_v26, %v3387_v15 }
 0x246   :  { %3881 = vmatpush2.bf16.msra.mxu0 %v5538_v28  ;;  %3924 = vmatpush2.bf16.msra.mxu1 %v5666_v30  ;;  %v5634_v28 = vcombine.low %v613_v63, %v617_v6  ;;  %v5499_v30 = vcombine.high %v477_v16, %v481_v18  ;;  %v601_v38 = vld [vmem:[#allocation6 + $0xe38] sm:$0xff]  ;;  %v3602_v53 = vadd.f32 %v3601_v22, %v3559_v17  ;;  %v5867_v6 = vld [vmem:[#allocation9 + $0x160] ss:$8 sps:$4 sm:$0xff]   ;;  %v5917_v17 = vld [vmem:[#allocation9 + $0x1e4] ss:$8 sps:$4 sm:$0xff]  }
 0x247   :  { %3882 = vmatprep.subr.bf16.mxu0 %v5531_v31  ;;  %3925 = vmatprep.subr.bf16.mxu1 %v5659_v32  ;;  %v5627_v31 = vcombine.high %v605_v37, %v609_v62  ;;  %v469_v32 = vld [vmem:[#allocation6 + $0xa18] sm:$0xff]  ;;  %v5619_v52 = vcombine.high %v597_v42, %v601_v38  ;;  %v5618_v60 = vcombine.low %v597_v42, %v601_v38  ;;  %v5890_v37 = vld [vmem:[#allocation9 + $0x24] ss:$8 sps:$4 sm:$0xff]  }
 0x248   :  { %v5490_v55 = vcombine.low %v469_v32, %v473_v35  ;;  %v5861_v26 = vld [vmem:[#allocation9 + $0x170] ss:$8 sps:$4 sm:$0xff]   ;;  %v5872_v7 = vld [vmem:[#allocation9 + $0x54] ss:$8 sps:$4 sm:$0xff]   ;;  %v5893_v62 = vld [vmem:[#allocation9 + $0x124] ss:$8 sps:$4 sm:$0xff]  }
 0x249   :  { %v5870_v9 = vld [vmem:[#allocation9 + $0x50] ss:$8 sps:$4 sm:$0xff]   ;;  %v5896_v12 = vld [vmem:[#allocation9 + $0x14] ss:$8 sps:$4 sm:$0xff]   ;;  %v5929_v22 = vld [vmem:[#allocation9 + $0x1c4] ss:$8 sps:$4 sm:$0xff]  }
 0x24a   :  { %3883 = vmatpush2.bf16.msra.mxu0 %v5530_v48  ;;  %3926 = vmatpush2.bf16.msra.mxu1 %v5658_v49  ;;  %v5498_v48 = vcombine.low %v477_v16, %v481_v18  ;;  %v3383_v49 = vadd.f32 %v6380_v29, %v3340_v39  ;;  %v5860_v29 = vld [vmem:[#allocation9 + $0x74] ss:$8 sps:$4 sm:$0xff]   ;;  %v5882_v18 = vld [vmem:[#allocation9 + $0x30] ss:$8 sps:$4 sm:$0xff]  }
 0x24b   :  { %3884 = vmatprep.subr.bf16.mxu0 %v5523_v50  ;;  %3927 = vmatprep.subr.bf16.mxu1 %v5651_v51  ;;  %v5491_v50 = vcombine.high %v469_v32, %v473_v35  ;;  %v3555_v51 = vadd.f32 %v6414_v56, %v3512_v41  ;;  %v3959_v56 = vmax.f32 %v3602_v53, 0.0  ;;  %v5887_v16 = vld [vmem:[#allocation9 + $0x134] ss:$8 sps:$4 sm:$0xff]   ;;  %v5885_v19 = vld [vmem:[#allocation9 + $0x130] ss:$8 sps:$4 sm:$0xff]  }
 0x24c   :  { %v3426_v45 = vadd.f32 %v6382_v33, %v3383_v49  ;;  %v5899_v27 = vld [vmem:[#allocation9 + $0x114] ss:$8 sps:$4 sm:$0xff]   ;;  %v5900_v32 = vld [vmem:[#allocation9] ss:$8 sps:$4 sm:$0xff]   ;;  %v5906_v42 = vld [vmem:[#allocation9 + $0xf0] ss:$8 sps:$4 sm:$0xff]  }
 0x24d   :  { %v3598_v61 = vadd.f32 %v6416_v0, %v3555_v51  ;;  %v5864_v0 = vld [vmem:[#allocation9 + $0x60] ss:$8 sps:$4 sm:$0xff]   ;;  %v5908_v39 = vld [vmem:[#allocation9 + $0xf4] ss:$8 sps:$4 sm:$0xff]   ;;  %v5909_v38 = vld [vmem:[#allocation9 + $0x1f0] ss:$8 sps:$4 sm:$0xff]  }
 0x24e   :  { %3885 = vmatpush2.bf16.msra.mxu0 %v5522_v59  ;;  %3928 = vmatpush2.bf16.msra.mxu1 %v5650_v21  ;;  %v5863_v59 = vld [vmem:[#allocation9 + $0x174] ss:$8 sps:$4 sm:$0xff]   ;;  %v3957_v21 = vmax.f32 %v3430_v43, 0.0  ;;  %v5903_v35 = vld [vmem:[#allocation9 + $0x100] ss:$8 sps:$4 sm:$0xff]  }
 0x24f   :  { %3886 = vmatprep.subr.bf16.mxu0 %v5515_v2  ;;  %3929 = vmatprep.subr.bf16.mxu1 %v5643_v58  ;;  %v5858_v2 = vld [vmem:[#allocation9 + $0x70] ss:$8 sps:$4 sm:$0xff]   ;;  %v3949_v58 = vmax.f32 %v3426_v45, 0.0  ;;  %v3951_v44 = vmax.f32 %v3598_v61, 0.0  ;;  %v5911_v15 = vld [vmem:[#allocation9 + $0x1f4] ss:$8 sps:$4 sm:$0xff]  }
 0x250   :  { %v5914_v41 = vld [vmem:[#allocation9 + $0xe4] ss:$8 sps:$4 sm:$0xff]   ;;  %v5915_v49 = vld [vmem:[#allocation9 + $0x1e0] ss:$8 sps:$4 sm:$0xff]   ;;  %v5918_v51 = vld [vmem:[#allocation9 + $0xd0] ss:$8 sps:$4 sm:$0xff]  }
 0x251   :  { %v3965_v33 = vpack.c.bf16 %v3957_v21, %v3949_v58  ;;  %v3967_v63 = vpack.c.bf16 %v3959_v56, %v3951_v44  ;;  %v5926_v43 = vld [vmem:[#allocation9 + $0xc4] ss:$8 sps:$4 sm:$0xff]   ;;  %v5924_v53 = vld [vmem:[#allocation9 + $0xc0] ss:$8 sps:$4 sm:$0xff]   ;;  %v5932_v45 = vld [vmem:[#allocation9 + $0xb4] ss:$8 sps:$4 sm:$0xff]  }
 0x252   :  { %3887 = vmatpush2.bf16.msra.mxu0 %v5514_v8  ;;  %3930 = vmatpush2.bf16.msra.mxu1 %v5642_v10  ;;  %v5875_v8 = vld [vmem:[#allocation9 + $0x154] ss:$8 sps:$4 sm:$0xff]   ;;  %v5873_v10 = vld [vmem:[#allocation9 + $0x150] ss:$8 sps:$4 sm:$0xff]   ;;  %v5941_v21 = vld [vmem:[#allocation9 + $0x1a4] ss:$8 sps:$4 sm:$0xff]  }
 0x253   :  { %3888 = vmatprep.subr.bf16.mxu0 %v5507_v11  ;;  %3931 = vmatprep.subr.bf16.mxu1 %v5635_v34  ;;  %v5881_v11 = vld [vmem:[#allocation9 + $0x144] ss:$8 sps:$4 sm:$0xff]   ;;  %v5884_v34 = vld [vmem:[#allocation9 + $0x34] ss:$8 sps:$4 sm:$0xff]   ;;  %v5933_v61 = vld [vmem:[#allocation9 + $0x1b0] ss:$8 sps:$4 sm:$0xff]  }
 0x254   :  { %v5936_v56 = vld [vmem:[#allocation9 + $0xa0] ss:$8 sps:$4 sm:$0xff]  }
 0x255   :  { %v5939_v58 = vld [vmem:[#allocation9 + $0x1a0] ss:$8 sps:$4 sm:$0xff]  }
 0x256   :  { %3889 = vmatpush2.bf16.msra.mxu0 %v5506_v24  ;;  %3932 = vmatpush2.bf16.msra.mxu1 %v5634_v28  ;;  %v5891_v24 = vld [vmem:[#allocation9 + $0x120] ss:$8 sps:$4 sm:$0xff]   ;;  %v5894_v28 = vld [vmem:[#allocation9 + $0x10] ss:$8 sps:$4 sm:$0xff]  }
 0x257   :  { %3890 = vmatprep.subr.bf16.mxu0 %v5499_v30  ;;  %3933 = vmatprep.subr.bf16.mxu1 %v5627_v31  ;;  %v5897_v30 = vld [vmem:[#allocation9 + $0x110] ss:$8 sps:$4 sm:$0xff]   ;;  %v5905_v31 = vld [vmem:[#allocation9 + $0x104] ss:$8 sps:$4 sm:$0xff]  }
 0x25a   :  { %3891 = vmatpush2.bf16.msra.mxu0 %v5498_v48  ;;  %3934 = vmatpush2.bf16.msra.mxu1 %v5626_v40  ;;  %v5912_v48 = vld [vmem:[#allocation9 + $0xe0] ss:$8 sps:$4 sm:$0xff]   ;;  %v5920_v40 = vld [vmem:[#allocation9 + $0xd4] ss:$8 sps:$4 sm:$0xff]  }
 0x25b   :  { %3892 = vmatprep.subr.bf16.mxu0 %v5491_v50  ;;  %3935 = vmatprep.subr.bf16.mxu1 %v5619_v52  ;;  %v5923_v50 = vld [vmem:[#allocation9 + $0x1d4] ss:$8 sps:$4 sm:$0xff]   ;;  %v5921_v52 = vld [vmem:[#allocation9 + $0x1d0] ss:$8 sps:$4 sm:$0xff]  }
 0x25e   :  { %3893 = vmatpush2.bf16.msra.mxu0 %v5490_v55  ;;  %3936 = vmatpush2.bf16.msra.mxu1 %v5618_v60  ;;  %v5927_v55 = vld [vmem:[#allocation9 + $0x1c0] ss:$8 sps:$4 sm:$0xff]   ;;  %v5935_v60 = vld [vmem:[#allocation9 + $0x1b4] ss:$8 sps:$4 sm:$0xff]  }
 0x25f   :  { %4752 = vmatprep.subr.bf16.mxu0 %v5860_v29  ;;  %4795 = vmatprep.subr.bf16.mxu1 %v5863_v59  ;;  %v5930_v29 = vld [vmem:[#allocation9 + $0xb0] ss:$8 sps:$4 sm:$0xff]   ;;  %v5938_v59 = vld [vmem:[#allocation9 + $0xa4] ss:$8 sps:$4 sm:$0xff]  }
 0x261   :  { %3895 = vmatmul.mubr.bf16.vlgmr.msra.gmra.mxu0 %v6340_v46  ;;  %3938 = vmatmul.mubr.bf16.vlgmr.msra.gmra.mxu1 %v6342_v47  ;;  %v5878_v46 = vld [vmem:[#allocation9 + $0x44] ss:$8 sps:$4 sm:$0xff]   ;;  %v5876_v47 = vld [vmem:[#allocation9 + $0x40] ss:$8 sps:$4 sm:$0xff]   ;;  %v6449_v44 = vpop.f32.mrf.mxu1 }
 0x262   :  { %4753 = vmatpush1.bf16.msra.mxu0 %v5858_v2  ;;  %4784 = vmatprep.mubr.bf16.mxu0 %v3965_v33  ;;  %v6447_v2 = vpop.f32.mrf.mxu0  ;;  %v682_v33 = vsub.s32 5, %v6353_v4 }
 0x263   :  { %4796 = vmatpush1.bf16.msra.mxu1 %v5861_v26  ;;  %4827 = vmatprep.mubr.bf16.mxu1 %v3967_v63  ;;  %v5944_v26 = vld [vmem:[#allocation9 + $0x94] ss:$8 sps:$4 sm:$0xff]  }
 0x264   :  { %4754 = vmatprep.subr.bf16.mxu0 %v5866_v3  ;;  %4797 = vmatprep.subr.bf16.mxu1 %v5869_v5  ;;  %v5947_v3 = vld [vmem:[#allocation9 + $0x194] ss:$8 sps:$4 sm:$0xff]   ;;  %v5942_v5 = vld [vmem:[#allocation9 + $0x90] ss:$8 sps:$4 sm:$0xff]   ;;  %v3640_v63 = vpop.f32.mrf.mxu0 }
 0x266   :  { %4755 = vmatpush1.bf16.msra.mxu0 %v5864_v0  ;;  %v5945_v0 = vld [vmem:[#allocation9 + $0x190] ss:$8 sps:$4 sm:$0xff]  }
 0x267   :  { %4798 = vmatpush1.bf16.msra.mxu1 %v5867_v6  ;;  %4756 = vmatprep.subr.bf16.mxu0 %v5872_v7  ;;  %v5950_v6 = vld [vmem:[#allocation9 + $0x84] ss:$8 sps:$4 sm:$0xff]   ;;  %v3683_v7 = vpop.f32.mrf.mxu1 }
 0x268   :  { %4799 = vmatprep.subr.bf16.mxu1 %v5875_v8  ;;  %v5953_v8 = vld [vmem:[#allocation9 + $0x184] ss:$8 sps:$4 sm:$0xff]  }
 0x26a   :  { %4757 = vmatpush1.bf16.msra.mxu0 %v5870_v9  ;;  %v683_v9 = vrot.slane %v6425_v25, %v682_v33  ;;  %v6017_v33 = vld [vmem:[#allocation9 + $0x320] ss:$8 sps:$4 sm:$0xff]  }
 0x26b   :  { %4800 = vmatpush1.bf16.msra.mxu1 %v5873_v10  ;;  %4758 = vmatprep.subr.bf16.mxu0 %v5878_v46  ;;  %v5948_v10 = vld [vmem:[#allocation9 + $0x80] ss:$8 sps:$4 sm:$0xff]   ;;  %v6453_v46 = vpop.f32.mrf.mxu0 }
 0x26c   :  { %4801 = vmatprep.subr.bf16.mxu1 %v5881_v11  ;;  %v5951_v11 = vld [vmem:[#allocation9 + $0x180] ss:$8 sps:$4 sm:$0xff]  }
 0x26e   :  { %4759 = vmatpush1.bf16.msra.mxu0 %v5876_v47  ;;  %v5956_v47 = vld [vmem:[#allocation9 + $0x274] ss:$8 sps:$4 sm:$0xff]  }
 0x26f   :  { %4802 = vmatpush1.bf16.msra.mxu1 %v5879_v14  ;;  %4760 = vmatprep.subr.bf16.mxu0 %v5884_v34  ;;  %v6455_v14 = vpop.f32.mrf.mxu1  ;;  %v6004_v34 = vld [vmem:[#allocation9 + $0x374] ss:$8 sps:$4 sm:$0xff]  }
 0x270   :  { %4803 = vmatprep.subr.bf16.mxu1 %v5887_v16  ;;  %v3641_v16 = vadd.f32 %v3640_v63, %v683_v9  ;;  %v5972_v63 = vld [vmem:[#allocation9 + $0x210] ss:$8 sps:$4 sm:$0xff]  }
 0x272   :  { %4761 = vmatpush1.bf16.msra.mxu0 %v5882_v18  ;;  %v5954_v18 = vld [vmem:[#allocation9 + $0x270] ss:$8 sps:$4 sm:$0xff]  }
 0x273   :  { %4804 = vmatpush1.bf16.msra.mxu1 %v5885_v19  ;;  %4762 = vmatprep.subr.bf16.mxu0 %v5890_v37  ;;  %v3644_v19 = vpop.f32.mrf.mxu0  ;;  %v5959_v37 = vld [vmem:[#allocation9 + $0x264] ss:$8 sps:$4 sm:$0xff]  }
 0x274   :  { %4805 = vmatprep.subr.bf16.mxu1 %v5893_v62  ;;  %v6002_v62 = vld [vmem:[#allocation9 + $0x370] ss:$8 sps:$4 sm:$0xff]  }
 0x276   :  { %4763 = vmatpush1.bf16.msra.mxu0 %v5888_v20  ;;  %v3687_v20 = vpop.f32.mrf.mxu1 }
 0x277   :  { %4806 = vmatpush1.bf16.msra.mxu1 %v5891_v24  ;;  %4764 = vmatprep.subr.bf16.mxu0 %v5896_v12  ;;  %v6007_v24 = vld [vmem:[#allocation9 + $0x364] ss:$8 sps:$4 sm:$0xff]  }
 0x278   :  { %4807 = vmatprep.subr.bf16.mxu1 %v5899_v27  ;;  %v3684_v27 = vadd.f32 %v3683_v7, %v3641_v16  ;;  %v6025_v7 = vld [vmem:[#allocation9 + $0x304] ss:$8 sps:$4 sm:$0xff]   ;;  %v6026_v16 = vld [vmem:[#allocation9 + $0x3f0] ss:$8 sps:$4 sm:$0xff]  }
 0x27a   :  { %4765 = vmatpush1.bf16.msra.mxu0 %v5894_v28  ;;  %v3645_v28 = vadd.f32 %v3644_v19, %v683_v9  ;;  %v5980_v9 = vld [vmem:[#allocation9 + $0x2f4] ss:$8 sps:$4 sm:$0xff]   ;;  %v5981_v19 = vld [vmem:[#allocation9 + $0x2e0] ss:$8 sps:$4 sm:$0xff]  }
 0x27b   :  { %4808 = vmatpush1.bf16.msra.mxu1 %v5897_v30  ;;  %4766 = vmatprep.subr.bf16.mxu0 %v5902_v36  ;;  %v5957_v36 = vld [vmem:[#allocation9 + $0x260] ss:$8 sps:$4 sm:$0xff]  }
 0x27c   :  { %4809 = vmatprep.subr.bf16.mxu1 %v5905_v31 }
 0x27e   :  { %4767 = vmatpush1.bf16.msra.mxu0 %v5900_v32  ;;  %v5962_v32 = vld [vmem:[#allocation9 + $0x254] ss:$8 sps:$4 sm:$0xff]  }
 0x27f   :  { %4810 = vmatpush1.bf16.msra.mxu1 %v5903_v35  ;;  %4768 = vmatprep.subr.bf16.mxu0 %v5908_v39  ;;  %v6005_v35 = vld [vmem:[#allocation9 + $0x360] ss:$8 sps:$4 sm:$0xff]  }
 0x280   :  { %4811 = vmatprep.subr.bf16.mxu1 %v5911_v15 }
 0x282   :  { %4769 = vmatpush2.bf16.msra.mxu0 %v5906_v42  ;;  %v6010_v42 = vld [vmem:[#allocation9 + $0x354] ss:$8 sps:$4 sm:$0xff]  }
 0x283   :  { %4812 = vmatpush2.bf16.msra.mxu1 %v5909_v38  ;;  %4770 = vmatprep.subr.bf16.mxu0 %v5914_v41 }
 0x284   :  { %4813 = vmatprep.subr.bf16.mxu1 %v5917_v17  ;;  %v5960_v17 = vld [vmem:[#allocation9 + $0x250] ss:$8 sps:$4 sm:$0xff]  }
 0x286   :  { %4771 = vmatpush2.bf16.msra.mxu0 %v5912_v48 }
 0x287   :  { %4814 = vmatpush2.bf16.msra.mxu1 %v5915_v49  ;;  %4772 = vmatprep.subr.bf16.mxu0 %v5920_v40  ;;  %v6008_v49 = vld [vmem:[#allocation9 + $0x350] ss:$8 sps:$4 sm:$0xff]  }
 0x288   :  { %4815 = vmatprep.subr.bf16.mxu1 %v5923_v50 }
 0x28a   :  { %4773 = vmatpush2.bf16.msra.mxu0 %v5918_v51  ;;  %v6013_v51 = vld [vmem:[#allocation9 + $0x344] ss:$8 sps:$4 sm:$0xff]  }
 0x28b   :  { %4816 = vmatpush2.bf16.msra.mxu1 %v5921_v52  ;;  %4774 = vmatprep.subr.bf16.mxu0 %v5926_v43 }
 0x28c   :  { %4817 = vmatprep.subr.bf16.mxu1 %v5929_v22  ;;  %v5963_v22 = vld [vmem:[#allocation9 + $0x240] ss:$8 sps:$4 sm:$0xff]  }
 0x28e   :  { %4775 = vmatpush2.bf16.msra.mxu0 %v5924_v53  ;;  %v5968_v53 = vld [vmem:[#allocation9 + $0x234] ss:$8 sps:$4 sm:$0xff]  }
 0x28f   :  { %4818 = vmatpush2.bf16.msra.mxu1 %v5927_v55  ;;  %4776 = vmatprep.subr.bf16.mxu0 %v5932_v45  ;;  %v6011_v55 = vld [vmem:[#allocation9 + $0x340] ss:$8 sps:$4 sm:$0xff]  }
 0x290   :  { %4819 = vmatprep.subr.bf16.mxu1 %v5935_v60 }
 0x292   :  { %4777 = vmatpush2.bf16.msra.mxu0 %v5930_v29  ;;  %v6016_v29 = vld [vmem:[#allocation9 + $0x334] ss:$8 sps:$4 sm:$0xff]  }
 0x293   :  { %4820 = vmatpush2.bf16.msra.mxu1 %v5933_v61  ;;  %4778 = vmatprep.subr.bf16.mxu0 %v5938_v59  ;;  %v5966_v59 = vld [vmem:[#allocation9 + $0x230] ss:$8 sps:$4 sm:$0xff]  }
 0x294   :  { %4821 = vmatprep.subr.bf16.mxu1 %v5941_v21  ;;  %v5971_v21 = vld [vmem:[#allocation9 + $0x224] ss:$8 sps:$4 sm:$0xff]  }
 0x296   :  { %4779 = vmatpush2.bf16.msra.mxu0 %v5936_v56  ;;  %v6014_v56 = vld [vmem:[#allocation9 + $0x330] ss:$8 sps:$4 sm:$0xff]  }
 0x297   :  { %4822 = vmatpush2.bf16.msra.mxu1 %v5939_v58  ;;  %4780 = vmatprep.subr.bf16.mxu0 %v5944_v26  ;;  %v6019_v58 = vld [vmem:[#allocation9 + $0x324] ss:$8 sps:$4 sm:$0xff]   ;;  %v5969_v26 = vld [vmem:[#allocation9 + $0x220] ss:$8 sps:$4 sm:$0xff]  }
 0x298   :  { %4823 = vmatprep.subr.bf16.mxu1 %v5947_v3  ;;  %v5974_v3 = vld [vmem:[#allocation9 + $0x214] ss:$8 sps:$4 sm:$0xff]  }
 0x29a   :  { %4781 = vmatpush2.bf16.msra.mxu0 %v5942_v5  ;;  %v6022_v5 = vld [vmem:[#allocation9 + $0x314] ss:$8 sps:$4 sm:$0xff]  }
 0x29b   :  { %4824 = vmatpush2.bf16.msra.mxu1 %v5945_v0  ;;  %4782 = vmatprep.subr.bf16.mxu0 %v5950_v6  ;;  %v5977_v0 = vld [vmem:[#allocation9 + $0x204] ss:$8 sps:$4 sm:$0xff]   ;;  %v6020_v6 = vld [vmem:[#allocation9 + $0x310] ss:$8 sps:$4 sm:$0xff]  }
 0x29c   :  { %4825 = vmatprep.subr.bf16.mxu1 %v5953_v8  ;;  %v5975_v8 = vld [vmem:[#allocation9 + $0x200] ss:$8 sps:$4 sm:$0xff]  }
 0x29e   :  { %4783 = vmatpush2.bf16.msra.mxu0 %v5948_v10  ;;  %v6023_v10 = vld [vmem:[#allocation9 + $0x300] ss:$8 sps:$4 sm:$0xff]  }
 0x29f   :  { %4826 = vmatpush2.bf16.msra.mxu1 %v5951_v11  ;;  %4838 = vmatprep.subr.bf16.mxu0 %v5956_v47  ;;  %v6028_v11 = vld [vmem:[#allocation9 + $0x3f4] ss:$8 sps:$4 sm:$0xff]   ;;  %v5978_v47 = vld [vmem:[#allocation9 + $0x2f0] ss:$8 sps:$4 sm:$0xff]  }
 0x2a0   :  { %4881 = vmatprep.subr.bf16.mxu1 %v6004_v34  ;;  %v5983_v34 = vld [vmem:[#allocation9 + $0x2e4] ss:$8 sps:$4 sm:$0xff]  }
 0x2a1   :  { %v6457_v12 = vpop.f32.mrf.mxu0  ;;  %4785 = vmatmul.mubr.bf16.vlgmr.msra.gmra.mxu0 %v6387_v1  ;;  %v6460_v30 = vpop.f32.mrf.mxu1  ;;  %v3688_v1 = vadd.f32 %v3687_v20, %v3645_v28  ;;  %v6034_v20 = vld [vmem:[#allocation9 + $0x3d4] ss:$8 sps:$4 sm:$0xff]   ;;  %v5989_v28 = vld [vmem:[#allocation9 + $0x2c4] ss:$8 sps:$4 sm:$0xff]  }
 0x2a2   :  { %4828 = vmatmul.mubr.bf16.vlgmr.msra.gmra.mxu1 %v6421_v23  ;;  %4839 = vmatpush1.bf16.msra.mxu0 %v5954_v18  ;;  %v5965_v23 = vld [vmem:[#allocation9 + $0x244] ss:$8 sps:$4 sm:$0xff]  }
 0x2a3   :  { %v3726_v31 = vpop.f32.mrf.mxu0  ;;  %4840 = vmatprep.subr.bf16.mxu0 %v5959_v37  ;;  %4882 = vmatpush1.bf16.msra.mxu1 %v6002_v62  ;;  %v3769_v15 = vpop.f32.mrf.mxu1  ;;  %v6031_v18 = vld [vmem:[#allocation9 + $0x3e4] ss:$8 sps:$4 sm:$0xff]   ;;  %v5986_v37 = vld [vmem:[#allocation9 + $0x2d4] ss:$8 sps:$4 sm:$0xff]   ;;  %v6029_v62 = vld [vmem:[#allocation9 + $0x3e0] ss:$8 sps:$4 sm:$0xff]  }
 0x2a4   :  { %v3727_v39 = vadd.f32 %v3726_v31, %v3684_v27  ;;  %4883 = vmatprep.subr.bf16.mxu1 %v6007_v24  ;;  %v5984_v24 = vld [vmem:[#allocation9 + $0x2d0] ss:$8 sps:$4 sm:$0xff]   ;;  %v678_v27 = vsub.s32 4, %v6353_v4  ;;  %v6037_v31 = vld [vmem:[#allocation9 + $0x3c4] ss:$8 sps:$4 sm:$0xff]  }
 0x2a5   :  { %v6463_v38 = vpop.f32.mrf.mxu0  ;;  %v6465_v41 = vpop.f32.mrf.mxu1 }
 0x2a6   :  { %4841 = vmatpush1.bf16.msra.mxu0 %v5957_v36  ;;  %v3770_v40 = vadd.f32 %v3769_v15, %v3727_v39  ;;  %v6032_v36 = vld [vmem:[#allocation9 + $0x3d0] ss:$8 sps:$4 sm:$0xff]   ;;  %v5992_v39 = vld [vmem:[#allocation9 + $0x2b4] ss:$8 sps:$4 sm:$0xff]   ;;  %v6035_v15 = vld [vmem:[#allocation9 + $0x3c0] ss:$8 sps:$4 sm:$0xff]  }
 0x2a7   :  { %v3730_v48 = vpop.f32.mrf.mxu0  ;;  %4842 = vmatprep.subr.bf16.mxu0 %v5962_v32  ;;  %4884 = vmatpush1.bf16.msra.mxu1 %v6005_v35  ;;  %v3773_v52 = vpop.f32.mrf.mxu1  ;;  %v5987_v32 = vld [vmem:[#allocation9 + $0x2c0] ss:$8 sps:$4 sm:$0xff]   ;;  %v679_v35 = vrot.slane %v6425_v25, %v678_v27 }
 0x2a8   :  { %v3731_v50 = vadd.f32 %v3730_v48, %v3688_v1  ;;  %4885 = vmatprep.subr.bf16.mxu1 %v6010_v42  ;;  %v3953_v45 = vmax.f32 %v3770_v40, 0.0  ;;  %v6040_v42 = vld [vmem:[#allocation9 + $0x3b4] ss:$8 sps:$4 sm:$0xff]   ;;  %v6043_v40 = vld [vmem:[#allocation9 + $0x3a4] ss:$8 sps:$4 sm:$0xff]  }
 0x2a9   :  { %v3643_v1 = vadd.f32 %v6453_v46, %v679_v35  ;;  %v3639_v48 = vadd.f32 %v6447_v2, %v679_v35  ;;  %v5998_v46 = vld [vmem:[#allocation9 + $0x294] ss:$8 sps:$4 sm:$0xff]  }
 0x2aa   :  { %v3774_v43 = vadd.f32 %v3773_v52, %v3731_v50  ;;  %4843 = vmatpush1.bf16.msra.mxu0 %v5960_v17  ;;  %v5990_v17 = vld [vmem:[#allocation9 + $0x2b0] ss:$8 sps:$4 sm:$0xff]   ;;  %v6046_v2 = vld [vmem:[#allocation9 + $0x394] ss:$8 sps:$4 sm:$0xff]  }
 0x2ab   :  { %4844 = vmatprep.subr.bf16.mxu0 %v5965_v23  ;;  %4886 = vmatpush1.bf16.msra.mxu1 %v6008_v49  ;;  %v5995_v23 = vld [vmem:[#allocation9 + $0x2a4] ss:$8 sps:$4 sm:$0xff]   ;;  %v6038_v49 = vld [vmem:[#allocation9 + $0x3b0] ss:$8 sps:$4 sm:$0xff]   ;;  %v3686_v50 = vadd.f32 %v6455_v14, %v3643_v1  ;;  %v3682_v52 = vadd.f32 %v6449_v44, %v3639_v48 }
 0x2ac   :  { %v3961_v60 = vmax.f32 %v3774_v43, 0.0  ;;  %4887 = vmatprep.subr.bf16.mxu1 %v6013_v51  ;;  %v5993_v51 = vld [vmem:[#allocation9 + $0x2a0] ss:$8 sps:$4 sm:$0xff]   ;;  %v6001_v14 = vld [vmem:[#allocation9 + $0x284] ss:$8 sps:$4 sm:$0xff]  }
 0x2ad   :  { %v3729_v43 = vadd.f32 %v6463_v38, %v3686_v50  ;;  %v6049_v44 = vld [vmem:[#allocation9 + $0x384] ss:$8 sps:$4 sm:$0xff]  }
 0x2ae   :  { %v3969_v61 = vpack.c.bf16 %v3961_v60, %v3953_v45  ;;  %4845 = vmatpush1.bf16.msra.mxu0 %v5963_v22  ;;  %v6041_v22 = vld [vmem:[#allocation9 + $0x3a0] ss:$8 sps:$4 sm:$0xff]   ;;  %v6044_v60 = vld [vmem:[#allocation9 + $0x390] ss:$8 sps:$4 sm:$0xff]  }
 0x2af   :  { %4846 = vmatprep.subr.bf16.mxu0 %v5968_v53  ;;  %4888 = vmatpush1.bf16.msra.mxu1 %v6011_v55  ;;  %v3725_v53 = vadd.f32 %v6457_v12, %v3682_v52  ;;  %v5996_v55 = vld [vmem:[#allocation9 + $0x290] ss:$8 sps:$4 sm:$0xff]   ;;  %v3772_v45 = vadd.f32 %v6465_v41, %v3729_v43  ;;  %v6052_v1 = vld [vmem:[%s6547_s5 + $0x70] sm:$0xff]   ;;  %v6054_v52 = vld [vmem:[%s6547_s5 + $0x68] sm:$0xff]  }
 0x2b0   :  { %4870 = vmatprep.mubr.bf16.mxu0 %v3969_v61  ;;  %4889 = vmatprep.subr.bf16.mxu1 %v6016_v29  ;;  %v5999_v29 = vld [vmem:[#allocation9 + $0x280] ss:$8 sps:$4 sm:$0xff]  }
 0x2b1   :  { %v3768_v38 = vadd.f32 %v6460_v30, %v3725_v53  ;;  %v3960_v61 = vmax.f32 %v3772_v45, 0.0  ;;  %v6056_v53 = vld [vmem:[%s6547_s5 + $0x60] sm:$0xff]   ;;  %v6058_v45 = vld [vmem:[%s6547_s5 + $0x58] sm:$0xff]  }
 0x2b2   :  { %4847 = vmatpush1.bf16.msra.mxu0 %v5966_v59  ;;  %v6047_v59 = vld [vmem:[#allocation9 + $0x380] ss:$8 sps:$4 sm:$0xff]  }
 0x2b3   :  { %4848 = vmatprep.subr.bf16.mxu0 %v5971_v21  ;;  %4890 = vmatpush1.bf16.msra.mxu1 %v6014_v56  ;;  %v3952_v12 = vmax.f32 %v3768_v38, 0.0  ;;  %v6062_v38 = vld [vmem:[%s6547_s5 + $0x48] sm:$0xff]  }
 0x2b4   :  { %4891 = vmatprep.subr.bf16.mxu1 %v6019_v58  ;;  %v690_v58 = vsub.s32 7, %v6353_v4 }
 0x2b5   :  { %v3968_v21 = vpack.c.bf16 %v3960_v61, %v3952_v12  ;;  %v6064_v61 = vld [vmem:[%s6547_s5 + $0x40] sm:$0xff]  }
 0x2b6   :  { %4849 = vmatpush1.bf16.msra.mxu0 %v5969_v26  ;;  %v686_v26 = vsub.s32 6, %v6353_v4 }
 0x2b7   :  { %4850 = vmatprep.subr.bf16.mxu0 %v5974_v3  ;;  %4892 = vmatpush1.bf16.msra.mxu1 %v6017_v33  ;;  %v691_v33 = vrot.slane %v6425_v25, %v690_v58 }
 0x2b8   :  { %4893 = vmatprep.subr.bf16.mxu1 %v6022_v5  ;;  %v687_v5 = vrot.slane %v6425_v25, %v686_v26 }
 0x2ba   :  { %4851 = vmatpush1.bf16.msra.mxu0 %v5972_v63 }
 0x2bb   :  { %4852 = vmatprep.subr.bf16.mxu0 %v5977_v0  ;;  %4894 = vmatpush1.bf16.msra.mxu1 %v6020_v6 }
 0x2bc   :  { %4895 = vmatprep.subr.bf16.mxu1 %v6025_v7 }
 0x2be   :  { %4853 = vmatpush1.bf16.msra.mxu0 %v5975_v8 }
 0x2bf   :  { %4854 = vmatprep.subr.bf16.mxu0 %v5980_v9  ;;  %4896 = vmatpush1.bf16.msra.mxu1 %v6023_v10 }
 0x2c0   :  { %4897 = vmatprep.subr.bf16.mxu1 %v6028_v11 }
 0x2c2   :  { %4855 = vmatpush2.bf16.msra.mxu0 %v5978_v47 }
 0x2c3   :  { %4856 = vmatprep.subr.bf16.mxu0 %v5983_v34  ;;  %4898 = vmatpush2.bf16.msra.mxu1 %v6026_v16 }
 0x2c4   :  { %4899 = vmatprep.subr.bf16.mxu1 %v6031_v18 }
 0x2c6   :  { %4857 = vmatpush2.bf16.msra.mxu0 %v5981_v19 }
 0x2c7   :  { %4858 = vmatprep.subr.bf16.mxu0 %v5986_v37  ;;  %4900 = vmatpush2.bf16.msra.mxu1 %v6029_v62 }
 0x2c8   :  { %4901 = vmatprep.subr.bf16.mxu1 %v6034_v20 }
 0x2ca   :  { %4859 = vmatpush2.bf16.msra.mxu0 %v5984_v24 }
 0x2cb   :  { %4860 = vmatprep.subr.bf16.mxu0 %v5989_v28  ;;  %4902 = vmatpush2.bf16.msra.mxu1 %v6032_v36 }
 0x2cc   :  { %4903 = vmatprep.subr.bf16.mxu1 %v6037_v31 }
 0x2ce   :  { %4861 = vmatpush2.bf16.msra.mxu0 %v5987_v32 }
 0x2cf   :  { %4862 = vmatprep.subr.bf16.mxu0 %v5992_v39  ;;  %4904 = vmatpush2.bf16.msra.mxu1 %v6035_v15  ;;  %v6050_v15 = vld [vmem:[%s6547_s5 + $0x78] sm:$0xff]  }
 0x2d0   :  { %4905 = vmatprep.subr.bf16.mxu1 %v6040_v42  ;;  %v6051_v42 = vld [vmem:[%s6547_s5 + $0x38] sm:$0xff]  }
 0x2d2   :  { %4863 = vmatpush2.bf16.msra.mxu0 %v5990_v17 }
 0x2d3   :  { %4864 = vmatprep.subr.bf16.mxu0 %v5995_v23  ;;  %4906 = vmatpush2.bf16.msra.mxu1 %v6038_v49 }
 0x2d4   :  { %4907 = vmatprep.subr.bf16.mxu1 %v6043_v40  ;;  %v6053_v40 = vld [vmem:[%s6547_s5 + $0x30] sm:$0xff]  }
 0x2d6   :  { %4865 = vmatpush2.bf16.msra.mxu0 %v5993_v51 }
 0x2d7   :  { %4866 = vmatprep.subr.bf16.mxu0 %v5998_v46  ;;  %4908 = vmatpush2.bf16.msra.mxu1 %v6041_v22 }
 0x2d8   :  { %4909 = vmatprep.subr.bf16.mxu1 %v6046_v2  ;;  %v6055_v2 = vld [vmem:[%s6547_s5 + $0x28] sm:$0xff]  }
 0x2da   :  { %4867 = vmatpush2.bf16.msra.mxu0 %v5996_v55  ;;  %v6057_v55 = vld [vmem:[%s6547_s5 + $0x20] sm:$0xff]  }
 0x2db   :  { %4868 = vmatprep.subr.bf16.mxu0 %v6001_v14  ;;  %4910 = vmatpush2.bf16.msra.mxu1 %v6044_v60  ;;  %v6059_v14 = vld [vmem:[%s6547_s5 + $0x18] sm:$0xff]   ;;  %v6060_v60 = vld [vmem:[%s6547_s5 + $0x50] sm:$0xff]  }
 0x2dc   :  { %4911 = vmatprep.subr.bf16.mxu1 %v6049_v44  ;;  %v6061_v44 = vld [vmem:[%s6547_s5 + $0x10] sm:$0xff]  }
 0x2de   :  { %4869 = vmatpush2.bf16.msra.mxu0 %v5999_v29  ;;  %v6063_v29 = vld [vmem:[%s6547_s5 + $0x8] sm:$0xff]  }
 0x2df   :  { %4912 = vmatpush2.bf16.msra.mxu1 %v6047_v59  ;;  %5822 = vmatprep.subr.bf16.mxu0 %v6050_v15  ;;  %v6065_v59 = vld [vmem:[%s6547_s5] sm:$0xff]  }
 0x2e1   :  { %4871 = vmatmul.mubr.bf16.vlgmr.msra.gmra.mxu0 %v3968_v21  ;;  %v3810_v41 = vpop.f32.mrf.mxu0  ;;  %v3853_v56 = vpop.f32.mrf.mxu1 }
 0x2e2   :  { %v3811_v7 = vadd.f32 %v3810_v41, %v687_v5  ;;  %5823 = vmatpush3.bf16.msra.mxu0 %v6051_v42 }
 0x2e3   :  { %v3812_v3 = vpop.f32.mrf.mxu0  ;;  %v3855_v30 = vpop.f32.mrf.mxu1  ;;  %5824 = vmatprep.subr.bf16.mxu0 %v6052_v1 }
 0x2e4   :  { %v3813_v6 = vadd.f32 %v3812_v3, %v691_v33  ;;  %v3854_v18 = vadd.f32 %v3853_v56, %v3811_v7 }
 0x2e5   :  { %v3814_v63 = vpop.f32.mrf.mxu0  ;;  %v3857_v0 = vpop.f32.mrf.mxu1 }
 0x2e6   :  { %v3815_v9 = vadd.f32 %v3814_v63, %v687_v5  ;;  %v3856_v47 = vadd.f32 %v3855_v30, %v3813_v6  ;;  %5825 = vmatpush3.bf16.msra.mxu0 %v6053_v40  ;;  %v4100_v30 = vld [vmem:[#allocation11] sm:$0x3] }
 0x2e7   :  { %v3816_v8 = vpop.f32.mrf.mxu0  ;;  %v3859_v10 = vpop.f32.mrf.mxu1  ;;  %5826 = vmatprep.subr.bf16.mxu0 %v6054_v52  ;;  %v4105_v5 = vrot.slane %v4100_v30, %v662_v13 }
 0x2e8   :  { %v3817_v34 = vadd.f32 %v3816_v8, %v691_v33  ;;  %v3858_v37 = vadd.f32 %v3857_v0, %v3815_v9  ;;  %v4109_v33 = vrot.slane %v4100_v30, %v666_v54 }
 0x2ea   :  { %v3860_v28 = vadd.f32 %v3859_v10, %v3817_v34  ;;  %5827 = vmatpush3.bf16.msra.mxu0 %v6055_v2 }
 0x2eb   :  { %5828 = vmatprep.subr.bf16.mxu0 %v6056_v53 }
 0x2ee   :  { %5829 = vmatpush3.bf16.msra.mxu0 %v6057_v55 }
 0x2ef   :  { %5830 = vmatprep.subr.bf16.mxu0 %v6058_v45 }
 0x2f2   :  { %5831 = vmatpush3.bf16.msra.mxu0 %v6059_v14 }
 0x2f3   :  { %5832 = vmatprep.subr.bf16.mxu0 %v6060_v60 }
 0x2f6   :  { %5833 = vmatpush3.bf16.msra.mxu0 %v6061_v44  ;;  %v5131_v44 = vand.u32 127, %v660_v57 }
 0x2f7   :  { %5834 = vmatprep.subr.bf16.mxu0 %v6062_v38 }
 0x2f8   :  { %v5136_v38 = vadd.s32 4294967288, %v5131_v44 }
 0x2fa   :  { %5835 = vmatpush3.bf16.msra.mxu0 %v6063_v29  ;;  %v5125_v29 = vstv %s6550_s8  ;;  %s6211_s8 = scalar_lea.vmem %s5153_s29, 32 }
 0x2fb   :  { %5836 = vmatprep.subr.bf16.mxu0 %v6064_v61  ;;  %p6213_p9 = scmp.lt.s32.totalorder %s6211_s8, %s6207_s30 }
 0x2fd   :  { %p6214_p10 = por %p6213_p9, %p6212_p8 }
 0x2fe   :  { %5837 = vmatpush3.bf16.msra.mxu0 %v6065_v59  ;;  %v5134_v59 = vsub.s32 %v5131_v44, %v6353_v4 }
 0x2ff   :  { %p6215_p11 = pnand %p6214_p10, %p6208_p7 }
 0x321   :  { %v3896_v11 = vpop.f32.mrf.mxu0  ;;  %v3939_v16 = vpop.f32.mrf.mxu1 }
 0x322   :  { %v3897_v24 = vadd.f32 %v3896_v11, %v3854_v18 }
 0x323   :  { %v3898_v19 = vpop.f32.mrf.mxu0  ;;  %v3941_v20 = vpop.f32.mrf.mxu1 }
 0x324   :  { %v3899_v62 = vadd.f32 %v3898_v19, %v3856_v47  ;;  %v3940_v17 = vadd.f32 %v3939_v16, %v3897_v24 }
 0x325   :  { %v3900_v27 = vpop.f32.mrf.mxu0  ;;  %v3943_v36 = vpop.f32.mrf.mxu1 }
 0x326   :  { %v3901_v25 = vadd.f32 %v3900_v27, %v3858_v37  ;;  %v3942_v32 = vadd.f32 %v3941_v20, %v3899_v62  ;;  %v3954_v43 = vmax.f32 %v3940_v17, 0.0 }
 0x327   :  { %v3902_v31 = vpop.f32.mrf.mxu0  ;;  %v3945_v48 = vpop.f32.mrf.mxu1 }
 0x328   :  { %v3944_v35 = vadd.f32 %v3943_v36, %v3901_v25  ;;  %v3903_v39 = vadd.f32 %v3902_v31, %v3860_v28  ;;  %v3955_v50 = vmax.f32 %v3942_v32, 0.0 }
 0x32a   :  { %v3946_v23 = vadd.f32 %v3945_v48, %v3903_v39  ;;  %v3962_v49 = vmax.f32 %v3944_v35, 0.0 }
 0x32c   :  { %v3963_v51 = vmax.f32 %v3946_v23, 0.0  ;;  %v3970_v22 = vpack.c.bf16 %v3962_v49, %v3954_v43  ;;  %v5804_v23 = vld [vmem:[#allocation12] ss:$0 sm:$0xff]  ;;  %v5821_v43 = vld [vmem:[#allocation14] ss:$0 sm:$0xff] }
 0x32e   :  { %v3971_v46 = vpack.c.bf16 %v3963_v51, %v3955_v50 }
 0x330   :  { %4913 = vmatprep.mubr.bf16.mxu1 %v3971_v46 }
 0x331   :  { %4914 = vmatmul.mubr.bf16.vlgmr.msra.gmra.mxu1 %v3970_v22 }
 0x361   :  { %v4786_v12 = vpop.f32.mrf.mxu0 }
 0x362   :  { %v4829_v56 = vpop.f32.mrf.mxu1  ;;  %v4787_v8 = vadd.f32 %v4786_v12, %v4105_v5 }
 0x363   :  { %v4788_v21 = vpop.f32.mrf.mxu0 }
 0x364   :  { %v4831_v26 = vpop.f32.mrf.mxu1  ;;  %v4789_v6 = vadd.f32 %v4788_v21, %v4109_v33  ;;  %v4830_v18 = vadd.f32 %v4829_v56, %v4787_v8  ;;  %v5139_v21 = vsub.s32 %v5136_v38, %v6353_v4 }
 0x365   :  { %v4790_v41 = vpop.f32.mrf.mxu0 }
 0x366   :  { %v4833_v63 = vpop.f32.mrf.mxu1  ;;  %v4791_v7 = vadd.f32 %v4790_v41, %v4105_v5  ;;  %v4832_v34 = vadd.f32 %v4831_v26, %v4789_v6 }
 0x367   :  { %v4792_v58 = vpop.f32.mrf.mxu0 }
 0x368   :  { %v4835_v9 = vpop.f32.mrf.mxu1  ;;  %v4793_v11 = vadd.f32 %v4792_v58, %v4109_v33  ;;  %v4834_v16 = vadd.f32 %v4833_v63, %v4791_v7 }
 0x36a   :  { %v4836_v62 = vadd.f32 %v4835_v9, %v4793_v11 }
 0x3a1   :  { %v4872_v3 = vpop.f32.mrf.mxu0 }
 0x3a2   :  { %v4873_v24 = vadd.f32 %v4872_v3, %v4830_v18 }
 0x3a3   :  { %v4874_v0 = vpop.f32.mrf.mxu0 }
 0x3a4   :  { %v4875_v20 = vadd.f32 %v4874_v0, %v4832_v34 }
 0x3a5   :  { %v4876_v10 = vpop.f32.mrf.mxu0 }
 0x3a6   :  { %v4877_v54 = vadd.f32 %v4876_v10, %v4834_v16 }
 0x3a7   :  { %v4878_v19 = vpop.f32.mrf.mxu0 }
 0x3a8   :  { %v4879_v13 = vadd.f32 %v4878_v19, %v4836_v62 }
 0x3f1   :  { %v4915_v47 = vpop.f32.mrf.mxu1 }
 0x3f2   :  { %v4916_v36 = vadd.f32 %v4915_v47, %v4873_v24 }
 0x3f3   :  { %v4917_v37 = vpop.f32.mrf.mxu1 }
 0x3f4   :  { %v4918_v28 = vadd.f32 %v4917_v37, %v4875_v20  ;;  %v4924_v42 = vmax.f32 %v4916_v36, 0.0 }
 0x3f5   :  { %v4919_v27 = vpop.f32.mrf.mxu1 }
 0x3f6   :  { %v4920_v25 = vadd.f32 %v4919_v27, %v4877_v54  ;;  %v4925_v39 = vmax.f32 %v4918_v28, 0.0 }
 0x3f7   :  { %v4921_v31 = vpop.f32.mrf.mxu1 }
 0x3f8   :  { %v4922_v32 = vadd.f32 %v4921_v31, %v4879_v13  ;;  %v4926_v35 = vmax.f32 %v4920_v25, 0.0 }
 0x3fa   :  { %v4927_v15 = vmax.f32 %v4922_v32, 0.0  ;;  %v4928_v17 = vpack.c.bf16 %v4926_v35, %v4924_v42 }
 0x3fc   :  { %v4929_v1 = vpack.c.bf16 %v4927_v15, %v4925_v39 }
 0x3fe   :  { %5097 = vmatprep.mubr.bf16.mxu0 %v4929_v1 }
 0x3ff   :  { %5098 = vmatmul.mubr.bf16.vlgmr.msra.gmra.mxu0 %v4928_v17 }
 0x4bf   :  { %v5838_v48 = vpop.f32.mrf.mxu0 }
 0x4c1   :  { %v5839_v49 = vpop.f32.mrf.mxu0 }
 0x4c2   :  { %v5840_v40 = vadd.f32 %v5839_v49, %v5838_v48 }
 0x4c3   :  { %v5841_v50 = vpop.f32.mrf.mxu0 }
 0x4c4   :  { %v5100_v51 = vadd.f32 %v5840_v40, %v5804_v23 }
 0x4c5   :  { %v5842_v52 = vpop.f32.mrf.mxu0 }
 0x4c6   :  { %v5106_v46 = vmax.f32 %v5100_v51, 0.0  ;;  %v5843_v22 = vadd.f32 %v5842_v52, %v5841_v50 }
 0x4c8   :  { %v5103_v2 = vadd.f32 %v5843_v22, %v5804_v23  ;;  %v5115_v53 = vmul.f32 %v5821_v43, %v5106_v46 }
 0x4ca   :  { %v5107_v55 = vmax.f32 %v5103_v2, 0.0  ;;  %v5118_v45 = vsel %vm5117_vm0, %v5115_v53, 0.0 }
 0x4cb   :  { %5119 = vadd.xlane.f32.xlu0 %v5118_v45 }
 0x4cc   :  { %v5116_v14 = vmul.f32 %v5821_v43, %v5107_v55 }
 0x4ce   :  { %v5121_v60 = vsel %vm5117_vm0, %v5116_v14, 0.0 }
 0x4cf   :  { %5122 = vadd.xlane.f32.xlu0 %v5121_v60 }
 0x554   :  { %v5120_v61 = vpop.xlane.xlu0 %5119 }
 0x555   :  { %v5126_v12 = vadd.f32 %v5125_v29, %v5120_v61 }
 0x557   :  { %v5135_v58 = vrot.slane %v5126_v12, %v5134_v59 }
 0x558   :  { %v5123_v41 = vpop.xlane.xlu0 %5122 }
 0x559   :  { %v5127_v56 = vadd.f32 %v5125_v29, %v5123_v41 }
 0x55b   :  { %v5140_v26 = vrot.slane %v5127_v56, %v5139_v21 }
 0x55d   :  { %v5142_v57 = vsel %vm5141_vm1, %v5140_v26, %v5135_v58 }
 0x55e   :  { %5145 = vst.msk [vmem:[#allocation15] sm:$0x1] %vm5144_vm2, %v5142_v57 }
 0x55f   :  { %6218 = shalt.err (!%p6215_p11)
}
 0x560   :  { %5155 = dma.vmem_to_hbm [thread:$0]  %s5153_s29, 16, %s6551_s9, [#allocation5]  }
 0x561   :  { %6235 = dma.done.wait [#allocation5], 16  }
 0x562   :  { %6236 = vsyncadd [#allocation5], 4294967280 }
 0x563   :  { %5159 = vsyncpa [#allocation4], 1 }
 0x564   :  { %5160 = vsyncpa [#allocation7], 1 }
 0x565   :  { %5161 = vsyncpa [#allocation10], 1 }
 0x566   :  { %5162 = vsyncpa [#allocation13], 1 }
 0x567   :  { %5163 = vsyncpa [#allocation5], 1 }

</bundles_post_ra>
